<compile_context>
chip_gen: v7x
topology: tpu7x:2x2x1
jax: 0.10.0
libtpu: 0.0.40
codegen_flags: <defaults>
</compile_context>

<pallas_src>
import math

import jax
import jax.numpy as jnp
from jax.experimental import pallas as pl
from jax.experimental.pallas import tpu as pltpu

# ------------------- scaled-down hyper-params (same structure) ----------------
IMG = 32            # input spatial size   (224 in the PyTorch module)
PATCH = 16          # patch size
IN_CH = 3
EMBED = 32          # encoder embed_dim    (768 in vit_base)
DEPTH = 2           # transformer blocks   (12 in vit_base)
HEADS = 4
HEAD_DIM = EMBED // HEADS
MLP_DIM = 4 * EMBED
DEC_CH = (512, 256, 128, 64)     # decoder channels, identical to the module
LN_EPS = 1e-6

HP = IMG // PATCH                # 2  patches per side
NP = HP * HP                     # 4  patches
S_TOK = NP + 1                   # 5  tokens (cls + patches)
CPP = IN_CH * PATCH * PATCH      # 768 features per patch
N_PIX = NP * 4 ** len(DEC_CH)    # 1024 output pixels per batch (32 x 32)
MXU_DT = jnp.bfloat16            # MXU input dtype (accumulation stays f32)


# ------------------------------ fused forward kernel --------------------------
def _vit_fused_kernel(
    patches_ref,                 # (1, S, CPP)  f32   row 0 is zeros (cls slot)
    patch_w_ref,                 # (CPP, E)     bf16
    addpos_ref,                  # (S, E)       f32   cls/pos/patch-bias folded in
    ln1_g_ref, ln1_b_ref,        # (D, 1, E)    f32
    qkv_w_ref,                   # (D, E, 3E)   bf16  fused qkv projection
    qkv_b_ref,                   # (D, 1, 3E)   f32
    proj_w_ref,                  # (D, E, E)    bf16  fused output projection
    proj_b_ref,                  # (D, 1, E)    f32
    ln2_g_ref, ln2_b_ref,        # (D, 1, E)    f32
    fc1_w_ref,                   # (D, E, MLP)  bf16
    fc1_b_ref,                   # (D, 1, MLP)  f32
    fc2_w_ref,                   # (D, MLP, E)  bf16
    fc2_b_ref,                   # (D, 1, E)    f32
    norm_g_ref, norm_b_ref,      # (1, E)       f32
    dw1_ref, db1_ref,            # (32, 2048) bf16 / (1, 2048) f32  (4 kh/kw slabs merged)
    dw2_ref, db2_ref,            # (512, 1024)    / (1, 1024)
    dw3_ref, db3_ref,            # (256, 512)     / (1, 512)
    dw4_ref, db4_ref,            # (128, 256)     / (1, 256)
    wsel_ref,                    # (4, 256) bf16  block-diag final 1x1 conv weight
    fb_ref,                      # (1, 1)   f32   final conv bias
    out_ref,                     # (1, 4, 256) f32   lane-dense output block
    act1_ref, act2_ref, act3_ref,  # bf16 VMEM scratch for decoder activations
):
    f32 = jnp.float32

    def ln(x, g, b):
        mu = jnp.mean(x, axis=-1, keepdims=True)
        xc = x - mu
        var = jnp.mean(xc * xc, axis=-1, keepdims=True)
        return xc * jax.lax.rsqrt(var + LN_EPS) * g + b

    def mm(x, w):                # bf16 MXU inputs, f32 accumulation
        return jnp.dot(x.astype(MXU_DT), w, preferred_element_type=f32)

    # ----------------------------- encoder ------------------------------------
    # patch embed as one (S, CPP) @ (CPP, E) matmul; cls token, pos-embed and the
    # patch bias arrive pre-combined in addpos, so no in-kernel concat is needed.
    xs = mm(patches_ref[0], patch_w_ref[...]) + addpos_ref[...]          # (S, E) f32

    scale = 1.0 / math.sqrt(HEAD_DIM)
    for d in range(DEPTH):
        # --- multi-head self-attention: one fused QKV matmul per block ---
        h = ln(xs, ln1_g_ref[d], ln1_b_ref[d]).astype(MXU_DT)            # (S, E)
        qkv = jnp.dot(h, qkv_w_ref[d], preferred_element_type=f32) + qkv_b_ref[d]  # (S, 3E)
        heads = []
        for hh in range(HEADS):
            q = qkv[:, hh * HEAD_DIM:(hh + 1) * HEAD_DIM]
            k = qkv[:, EMBED + hh * HEAD_DIM:EMBED + (hh + 1) * HEAD_DIM]
            v = qkv[:, 2 * EMBED + hh * HEAD_DIM:2 * EMBED + (hh + 1) * HEAD_DIM]
            s = jax.lax.dot_general(q * scale, k, (((1,), (1,)), ((), ())),
                                    preferred_element_type=f32)          # (S, S)
            s = s - jnp.max(s, axis=-1, keepdims=True)
            p = jnp.exp(s)
            p = p * pl.reciprocal(jnp.sum(p, axis=-1, keepdims=True), approx=True)
            heads.append(jnp.dot(p, v, preferred_element_type=f32))      # (S, Dh)
        # concat(heads) @ proj_w : ONE (S,E)@(E,E) matmul (was 4 K=8 matmuls)
        o_cat = jnp.concatenate(heads, axis=-1).astype(MXU_DT)           # (S, E)
        attn = jnp.dot(o_cat, proj_w_ref[d], preferred_element_type=f32) + proj_b_ref[d]
        xs = xs + attn

        # --- MLP (exact erf-GELU, as nn.GELU) ---
        h = ln(xs, ln2_g_ref[d], ln2_b_ref[d])
        h = mm(h, fc1_w_ref[d]) + fc1_b_ref[d]
        h = 0.5 * h * (1.0 + jax.lax.erf(h * (1.0 / math.sqrt(2.0))))
        h = mm(h, fc2_w_ref[d]) + fc2_b_ref[d]
        xs = xs + h

    xs = ln(xs, norm_g_ref[...], norm_b_ref[...])                        # (S, E)
    x = xs[1:, :].astype(MXU_DT)                                         # drop cls -> (NP, E)

    # ----------------------------- decoder ------------------------------------
    # ConvTranspose2d(k=2, s=2): out[2i+a, 2j+c, :] = in[i, j, :] @ W[:, :, a, c] + b
    # The 4 (a, c) slabs are merged along the weight's lane axis -> ONE matmul
    # per layer; slabs are then lane-sliced (boundaries at multiples of Cout,
    # all 128-aligned) and row-stacked into bf16 VMEM scratch.
    for w_ref, b_ref, act_ref, cout in ((dw1_ref, db1_ref, act1_ref, DEC_CH[0]),
                                        (dw2_ref, db2_ref, act2_ref, DEC_CH[1]),
                                        (dw3_ref, db3_ref, act3_ref, DEC_CH[2])):
        n_rows = x.shape[0]
        y = jnp.dot(x, w_ref[...], preferred_element_type=f32) + b_ref[...]
        y = jnp.maximum(y, 0.0).astype(MXU_DT)                           # (n_rows, 4*cout)
        for kk in range(4):
            act_ref[pl.ds(kk * n_rows, n_rows), :] = y[:, kk * cout:(kk + 1) * cout]
        x = act_ref[...]                                                 # bf16, no reload cast

    # last deconv (merged slabs) + ReLU + final 1x1 conv fused via a block-diag
    # (4, 256) weight: out[kk, p] = sum_c relu(y[p, kk*64+c]) * fw[c] + fb.
    y = jnp.dot(x, dw4_ref[...], preferred_element_type=f32) + db4_ref[...]   # (256, 256)
    y = jnp.maximum(y, 0.0).astype(MXU_DT)
    z = jax.lax.dot_general(wsel_ref[...], y, (((1,), (1,)), ((), ())),
                            preferred_element_type=f32)                 # (4, 256) lane-dense
    out_ref[0, :, :] = z + fb_ref[...]


# ------------------------------- block specs -----------------------------------
def _batch_spec(shape):
    n = len(shape)
    return pl.BlockSpec((1,) + tuple(shape[1:]),
                        lambda b: (b,) + (0,) * (n - 1))


def _full_spec(shape):
    n = len(shape)
    return pl.BlockSpec(tuple(shape), lambda b: (0,) * n)


# ----------------------------- parameter creation ------------------------------
def init_params(key):
    keys = iter(jax.random.split(key, 64))

    def nrm(shape, std=0.02):
        return std * jax.random.normal(next(keys), shape, jnp.float32)

    params = {
        "patch_w": nrm((CPP, EMBED)),           # Conv2d(3, E, 16, stride=16) as matmul
        "patch_b": jnp.zeros((EMBED,), jnp.float32),
        "cls_token": nrm((1, 1, EMBED)),
        "pos_embed": nrm((1, S_TOK, EMBED)),
        "norm_g": jnp.ones((1, EMBED), jnp.float32),
        "norm_b": jnp.zeros((1, EMBED), jnp.float32),
    }
    blocks = []
    for _ in range(DEPTH):
        blocks.append(dict(
            ln1_g=jnp.ones((1, EMBED), jnp.float32), ln1_b=jnp.zeros((1, EMBED), jnp.float32),
            qkv_w=nrm((EMBED, 3 * EMBED)), qkv_b=jnp.zeros((3 * EMBED,), jnp.float32),
            proj_w=nrm((EMBED, EMBED)), proj_b=jnp.zeros((EMBED,), jnp.float32),
            ln2_g=jnp.ones((1, EMBED), jnp.float32), ln2_b=jnp.zeros((1, EMBED), jnp.float32),
            fc1_w=nrm((EMBED, MLP_DIM)), fc1_b=jnp.zeros((MLP_DIM,), jnp.float32),
            fc2_w=nrm((MLP_DIM, EMBED)), fc2_b=jnp.zeros((EMBED,), jnp.float32),
        ))
    params["blocks"] = blocks

    deconvs = []
    cin = EMBED
    for cout in DEC_CH:
        # ConvTranspose2d weight layout: (in_ch, out_ch, 2, 2), like PyTorch
        deconvs.append((nrm((cin, cout, 2, 2)), jnp.zeros((cout,), jnp.float32)))
        cin = cout
    params["deconvs"] = deconvs
    params["final_w"] = nrm((1, cin, 1, 1))     # Conv2d(64, 1, kernel_size=1)
    params["final_b"] = jnp.zeros((1,), jnp.float32)
    return params


# ----------------------------------- forward -----------------------------------
def vit_forward(x, params):
    B, C, H, W = x.shape
    assert (C, H, W) == (IN_CH, IMG, IMG), (C, H, W)

    # ---- tiny JAX-side glue: patch extraction + weight packing ----
    xp = x.reshape(B, C, HP, PATCH, HP, PATCH).transpose(0, 2, 4, 1, 3, 5)
    xp = xp.reshape(B, NP, CPP)
    # prepend a zero feature row per batch (the cls slot); cls token, pos-embed
    # and the patch-embed bias are folded into one additive (S, E) term.
    xp = jnp.concatenate([jnp.zeros((B, 1, CPP), xp.dtype), xp], axis=1)   # (B, S, CPP)

    addpos = params["pos_embed"][0] + jnp.concatenate(
        [params["cls_token"].reshape(1, EMBED),
         jnp.broadcast_to(params["patch_b"].reshape(1, EMBED), (NP, EMBED))], axis=0)

    stk = lambda name: jnp.stack([blk[name] for blk in params["blocks"]])
    # fused qkv: (D, E, 3E); output lane axis ordered (q/k/v, head, head_dim)
    qkv_w = stk("qkv_w").astype(MXU_DT)
    qkv_b = stk("qkv_b").reshape(DEPTH, 1, 3 * EMBED)
    # fused output projection: (D, E, E); input axis = heads-major concat
    proj_w = stk("proj_w").astype(MXU_DT)
    proj_b = stk("proj_b").reshape(DEPTH, 1, EMBED)
    fc1_w = stk("fc1_w").astype(MXU_DT)
    fc1_b = stk("fc1_b").reshape(DEPTH, 1, MLP_DIM)
    fc2_w = stk("fc2_w").astype(MXU_DT)
    fc2_b = stk("fc2_b").reshape(DEPTH, 1, EMBED)
    ln1_g, ln1_b = stk("ln1_g"), stk("ln1_b")
    ln2_g, ln2_b = stk("ln2_g"), stk("ln2_b")

    # ConvTranspose weights: merge the 4 (kh, kw) slabs along the output lane
    # axis -> (cin, 4*cout) with lane index (2*kh + kw) * cout + co.
    dws, dbs = [], []
    for w, b in params["deconvs"]:
        cin, cout = w.shape[0], w.shape[1]
        dws.append(w.transpose(0, 2, 3, 1).reshape(cin, 4 * cout).astype(MXU_DT))
        dbs.append(jnp.tile(b.reshape(1, cout), (1, 4)))
    # final 1x1 conv as a block-diagonal (4, 4*64) weight acting on the merged
    # last-deconv output; fb stays a separate scalar bias.
    fw = params["final_w"].reshape(DEC_CH[-1])
    wsel = jnp.kron(jnp.eye(4, dtype=jnp.float32), fw.reshape(1, DEC_CH[-1])).astype(MXU_DT)
    fb = params["final_b"].reshape(1, 1)
    patch_w = params["patch_w"].astype(MXU_DT)

    operands = (xp, patch_w, addpos,
                ln1_g, ln1_b, qkv_w, qkv_b, proj_w, proj_b,
                ln2_g, ln2_b, fc1_w, fc1_b, fc2_w, fc2_b,
                params["norm_g"], params["norm_b"],
                dws[0], dbs[0], dws[1], dbs[1], dws[2], dbs[2], dws[3], dbs[3],
                wsel, fb)

    in_specs = [_batch_spec(xp.shape)] + [_full_spec(o.shape) for o in operands[1:]]

    # TODO(synk): at real ViT-Base scale (EMBED=768, DEPTH=12, big B) add a grid
    # axis over DEPTH with per-block weight BlockSpecs and block the batch axis
    # (Bb images/step); at this toy size grid=(B,) "parallel" is the right call.
    out_shape = (B, 4, N_PIX // 4)                # lane-dense (B, 4, 256)
    dec = pl.pallas_call(
        _vit_fused_kernel,
        out_shape=jax.ShapeDtypeStruct(out_shape, jnp.float32),
        grid=(B,),
        in_specs=in_specs,
        out_specs=_batch_spec(out_shape),
        scratch_shapes=[pltpu.VMEM((4 * NP, DEC_CH[0]), MXU_DT),     # (16, 512)  bf16
                        pltpu.VMEM((16 * NP, DEC_CH[1]), MXU_DT),    # (64, 256)  bf16
                        pltpu.VMEM((64 * NP, DEC_CH[2]), MXU_DT)],   # (256, 128) bf16
        compiler_params=pltpu.CompilerParams(dimension_semantics=("parallel",)),
    )(*operands)

    # un-interleave decoder pixel order: flat index bits (msb->lsb) are
    # (a4, c4, a3, c3, a2, c2, a1, c1, i1, j1); the spatial position is
    # row = 16*i1 + 8*a1 + 4*a2 + 2*a3 + a4, col = 16*j1 + 8*c1 + 4*c2 + 2*c3 + c4.
    y = dec.reshape((B,) + (2,) * 10)
    y = y.transpose(0, 9, 7, 5, 3, 1, 10, 8, 6, 4, 2)
    return y.reshape(B, 1, IMG, IMG)


# ------------------------------------- main -------------------------------------
if __name__ == "__main__":
    key = jax.random.PRNGKey(0)
    pkey, xkey = jax.random.split(key)
    params = init_params(pkey)
    x = jax.random.normal(xkey, (2, IN_CH, IMG, IMG), jnp.float32)   # NCHW, as PyTorch

    out = jax.jit(vit_forward)(x, params)
    out = jax.block_until_ready(out)
    assert out.shape == (2, 1, IMG, IMG), out.shape
    assert bool(jnp.all(jnp.isfinite(out)))
    print("KERNEL_OK")
</pallas_src>

<mosaic_0001>
module attributes {stable_mosaic.version = 11 : i64} {
  func.func @_vit_fused_kernel(%arg0: i32, %arg1: memref<1x5x768xf32, #tpu.memory_space<vmem>>, %arg2: memref<768x32xbf16, #tpu.memory_space<vmem>>, %arg3: memref<5x32xf32, #tpu.memory_space<vmem>>, %arg4: memref<2x1x32xf32, #tpu.memory_space<vmem>>, %arg5: memref<2x1x32xf32, #tpu.memory_space<vmem>>, %arg6: memref<2x32x96xbf16, #tpu.memory_space<vmem>>, %arg7: memref<2x1x96xf32, #tpu.memory_space<vmem>>, %arg8: memref<2x32x32xbf16, #tpu.memory_space<vmem>>, %arg9: memref<2x1x32xf32, #tpu.memory_space<vmem>>, %arg10: memref<2x1x32xf32, #tpu.memory_space<vmem>>, %arg11: memref<2x1x32xf32, #tpu.memory_space<vmem>>, %arg12: memref<2x32x128xbf16, #tpu.memory_space<vmem>>, %arg13: memref<2x1x128xf32, #tpu.memory_space<vmem>>, %arg14: memref<2x128x32xbf16, #tpu.memory_space<vmem>>, %arg15: memref<2x1x32xf32, #tpu.memory_space<vmem>>, %arg16: memref<1x32xf32, #tpu.memory_space<vmem>>, %arg17: memref<1x32xf32, #tpu.memory_space<vmem>>, %arg18: memref<32x2048xbf16, #tpu.memory_space<vmem>>, %arg19: memref<1x2048xf32, #tpu.memory_space<vmem>>, %arg20: memref<512x1024xbf16, #tpu.memory_space<vmem>>, %arg21: memref<1x1024xf32, #tpu.memory_space<vmem>>, %arg22: memref<256x512xbf16, #tpu.memory_space<vmem>>, %arg23: memref<1x512xf32, #tpu.memory_space<vmem>>, %arg24: memref<128x256xbf16, #tpu.memory_space<vmem>>, %arg25: memref<1x256xf32, #tpu.memory_space<vmem>>, %arg26: memref<4x256xbf16, #tpu.memory_space<vmem>>, %arg27: memref<1x1xf32, #tpu.memory_space<vmem>>, %arg28: memref<1x4x256xf32, #tpu.memory_space<vmem>>, %arg29: memref<16x512xbf16, #tpu.memory_space<vmem>>, %arg30: memref<64x256xbf16, #tpu.memory_space<vmem>>, %arg31: memref<256x128xbf16, #tpu.memory_space<vmem>>) attributes {dimension_semantics = [#tpu.dimension_semantics<parallel>], iteration_bounds = array<i64: 2>, scalar_prefetch = 0 : i64, scratch_operands = 3 : i64, tpu.core_type = #tpu.core_type<tc>, window_params = [{transform_indices = @transform_0, window_bounds = array<i64: 1, 5, 768>}, {pipeline_mode = #tpu.pipeline_mode<synchronous>, transform_indices = @transform_1, window_bounds = array<i64: 768, 32>}, {pipeline_mode = #tpu.pipeline_mode<synchronous>, transform_indices = @transform_2, window_bounds = array<i64: 5, 32>}, {pipeline_mode = #tpu.pipeline_mode<synchronous>, transform_indices = @transform_3, window_bounds = array<i64: 2, 1, 32>}, {pipeline_mode = #tpu.pipeline_mode<synchronous>, transform_indices = @transform_4, window_bounds = array<i64: 2, 1, 32>}, {pipeline_mode = #tpu.pipeline_mode<synchronous>, transform_indices = @transform_5, window_bounds = array<i64: 2, 32, 96>}, {pipeline_mode = #tpu.pipeline_mode<synchronous>, transform_indices = @transform_6, window_bounds = array<i64: 2, 1, 96>}, {pipeline_mode = #tpu.pipeline_mode<synchronous>, transform_indices = @transform_7, window_bounds = array<i64: 2, 32, 32>}, {pipeline_mode = #tpu.pipeline_mode<synchronous>, transform_indices = @transform_8, window_bounds = array<i64: 2, 1, 32>}, {pipeline_mode = #tpu.pipeline_mode<synchronous>, transform_indices = @transform_9, window_bounds = array<i64: 2, 1, 32>}, {pipeline_mode = #tpu.pipeline_mode<synchronous>, transform_indices = @transform_10, window_bounds = array<i64: 2, 1, 32>}, {pipeline_mode = #tpu.pipeline_mode<synchronous>, transform_indices = @transform_11, window_bounds = array<i64: 2, 32, 128>}, {pipeline_mode = #tpu.pipeline_mode<synchronous>, transform_indices = @transform_12, window_bounds = array<i64: 2, 1, 128>}, {pipeline_mode = #tpu.pipeline_mode<synchronous>, transform_indices = @transform_13, window_bounds = array<i64: 2, 128, 32>}, {pipeline_mode = #tpu.pipeline_mode<synchronous>, transform_indices = @transform_14, window_bounds = array<i64: 2, 1, 32>}, {pipeline_mode = #tpu.pipeline_mode<synchronous>, transform_indices = @transform_15, window_bounds = array<i64: 1, 32>}, {pipeline_mode = #tpu.pipeline_mode<synchronous>, transform_indices = @transform_16, window_bounds = array<i64: 1, 32>}, {pipeline_mode = #tpu.pipeline_mode<synchronous>, transform_indices = @transform_17, window_bounds = array<i64: 32, 2048>}, {pipeline_mode = #tpu.pipeline_mode<synchronous>, transform_indices = @transform_18, window_bounds = array<i64: 1, 2048>}, {pipeline_mode = #tpu.pipeline_mode<synchronous>, transform_indices = @transform_19, window_bounds = array<i64: 512, 1024>}, {pipeline_mode = #tpu.pipeline_mode<synchronous>, transform_indices = @transform_20, window_bounds = array<i64: 1, 1024>}, {pipeline_mode = #tpu.pipeline_mode<synchronous>, transform_indices = @transform_21, window_bounds = array<i64: 256, 512>}, {pipeline_mode = #tpu.pipeline_mode<synchronous>, transform_indices = @transform_22, window_bounds = array<i64: 1, 512>}, {pipeline_mode = #tpu.pipeline_mode<synchronous>, transform_indices = @transform_23, window_bounds = array<i64: 128, 256>}, {pipeline_mode = #tpu.pipeline_mode<synchronous>, transform_indices = @transform_24, window_bounds = array<i64: 1, 256>}, {pipeline_mode = #tpu.pipeline_mode<synchronous>, transform_indices = @transform_25, window_bounds = array<i64: 4, 256>}, {pipeline_mode = #tpu.pipeline_mode<synchronous>, transform_indices = @transform_26, window_bounds = array<i64: 1, 1>}, {transform_indices = @transform_27, window_bounds = array<i64: 1, 4, 256>}]} {
    %c0 = arith.constant 0 : index
    %c0_0 = arith.constant 0 : index
    %c0_1 = arith.constant 0 : index
    %0 = vector.load %arg1[%c0, %c0_0, %c0_1] : memref<1x5x768xf32, #tpu.memory_space<vmem>>, vector<1x5x768xf32>
    %1 = vector.shape_cast %0 : vector<1x5x768xf32> to vector<5x768xf32>
    %c0_2 = arith.constant 0 : index
    %c0_3 = arith.constant 0 : index
    %2 = vector.load %arg2[%c0_2, %c0_3] : memref<768x32xbf16, #tpu.memory_space<vmem>>, vector<768x32xbf16>
    %3 = arith.truncf %1 : vector<5x768xf32> to vector<5x768xbf16>
    %cst = arith.constant dense<0.000000e+00> : vector<5x32xf32>
    %4 = tpu.matmul %3, %2, %cst {dimension_numbers = #tpu.dot_dimension_numbers<[1], [0], [0], [1], [0, 0, 1, 1], [], []>} : vector<5x768xbf16>, vector<768x32xbf16>, vector<5x32xf32> -> vector<5x32xf32>
    %c0_4 = arith.constant 0 : index
    %c0_5 = arith.constant 0 : index
    %5 = vector.load %arg3[%c0_4, %c0_5] : memref<5x32xf32, #tpu.memory_space<vmem>>, vector<5x32xf32>
    %6 = arith.addf %4, %5 : vector<5x32xf32>
    %c0_6 = arith.constant 0 : index
    %c0_7 = arith.constant 0 : index
    %c0_8 = arith.constant 0 : index
    %7 = vector.load %arg4[%c0_6, %c0_7, %c0_8] : memref<2x1x32xf32, #tpu.memory_space<vmem>>, vector<1x1x32xf32>
    %8 = vector.shape_cast %7 : vector<1x1x32xf32> to vector<1x32xf32>
    %c0_9 = arith.constant 0 : index
    %c0_10 = arith.constant 0 : index
    %c0_11 = arith.constant 0 : index
    %9 = vector.load %arg5[%c0_9, %c0_10, %c0_11] : memref<2x1x32xf32, #tpu.memory_space<vmem>>, vector<1x1x32xf32>
    %10 = vector.shape_cast %9 : vector<1x1x32xf32> to vector<1x32xf32>
    %cst_12 = arith.constant dense<0.000000e+00> : vector<5xf32>
    %11 = vector.multi_reduction <add>, %6, %cst_12 [1] : vector<5x32xf32> to vector<5xf32>
    %12 = vector.shape_cast %11 : vector<5xf32> to vector<5x1xf32>
    %cst_13 = arith.constant 3.200000e+01 : f32
    %13 = vector.broadcast %cst_13 : f32 to vector<5x1xf32>
    %14 = arith.divf %12, %13 : vector<5x1xf32>
    %15 = vector.broadcast %14 : vector<5x1xf32> to vector<5x32xf32>
    %16 = arith.subf %6, %15 : vector<5x32xf32>
    %17 = arith.mulf %16, %16 : vector<5x32xf32>
    %cst_14 = arith.constant dense<0.000000e+00> : vector<5xf32>
    %18 = vector.multi_reduction <add>, %17, %cst_14 [1] : vector<5x32xf32> to vector<5xf32>
    %19 = vector.shape_cast %18 : vector<5xf32> to vector<5x1xf32>
    %cst_15 = arith.constant 3.200000e+01 : f32
    %20 = vector.broadcast %cst_15 : f32 to vector<5x1xf32>
    %21 = arith.divf %19, %20 : vector<5x1xf32>
    %cst_16 = arith.constant 9.99999997E-7 : f32
    %22 = vector.broadcast %cst_16 : f32 to vector<5x1xf32>
    %23 = arith.addf %21, %22 : vector<5x1xf32>
    %24 = math.rsqrt %23 : vector<5x1xf32>
    %25 = vector.broadcast %24 : vector<5x1xf32> to vector<5x32xf32>
    %26 = arith.mulf %16, %25 : vector<5x32xf32>
    %27 = vector.broadcast %8 : vector<1x32xf32> to vector<5x32xf32>
    %28 = arith.mulf %26, %27 : vector<5x32xf32>
    %29 = vector.broadcast %10 : vector<1x32xf32> to vector<5x32xf32>
    %30 = arith.addf %28, %29 : vector<5x32xf32>
    %31 = arith.truncf %30 : vector<5x32xf32> to vector<5x32xbf16>
    %c0_17 = arith.constant 0 : index
    %c0_18 = arith.constant 0 : index
    %c0_19 = arith.constant 0 : index
    %32 = vector.load %arg6[%c0_17, %c0_18, %c0_19] : memref<2x32x96xbf16, #tpu.memory_space<vmem>>, vector<1x32x96xbf16>
    %33 = vector.shape_cast %32 : vector<1x32x96xbf16> to vector<32x96xbf16>
    %cst_20 = arith.constant dense<0.000000e+00> : vector<5x96xf32>
    %34 = tpu.matmul %31, %33, %cst_20 {dimension_numbers = #tpu.dot_dimension_numbers<[1], [0], [0], [1], [0, 0, 1, 1], [], []>} : vector<5x32xbf16>, vector<32x96xbf16>, vector<5x96xf32> -> vector<5x96xf32>
    %c0_21 = arith.constant 0 : index
    %c0_22 = arith.constant 0 : index
    %c0_23 = arith.constant 0 : index
    %35 = vector.load %arg7[%c0_21, %c0_22, %c0_23] : memref<2x1x96xf32, #tpu.memory_space<vmem>>, vector<1x1x96xf32>
    %36 = vector.shape_cast %35 : vector<1x1x96xf32> to vector<1x96xf32>
    %37 = vector.broadcast %36 : vector<1x96xf32> to vector<5x96xf32>
    %38 = arith.addf %34, %37 : vector<5x96xf32>
    %39 = vector.extract_strided_slice %38 {offsets = [0, 0], sizes = [5, 8], strides = [1, 1]} : vector<5x96xf32> to vector<5x8xf32>
    %40 = vector.extract_strided_slice %38 {offsets = [0, 32], sizes = [5, 8], strides = [1, 1]} : vector<5x96xf32> to vector<5x8xf32>
    %41 = vector.extract_strided_slice %38 {offsets = [0, 64], sizes = [5, 8], strides = [1, 1]} : vector<5x96xf32> to vector<5x8xf32>
    %cst_24 = arith.constant 0.353553385 : f32
    %42 = vector.broadcast %cst_24 : f32 to vector<5x8xf32>
    %43 = arith.mulf %39, %42 : vector<5x8xf32>
    %cst_25 = arith.constant dense<0.000000e+00> : vector<5x5xf32>
    %44 = tpu.matmul %43, %40, %cst_25 {dimension_numbers = #tpu.dot_dimension_numbers<[1], [1], [0], [0], [0, 0, 1, 0], [], []>} : vector<5x8xf32>, vector<5x8xf32>, vector<5x5xf32> -> vector<5x5xf32>
    %cst_26 = arith.constant dense<0xFF800000> : vector<5xf32>
    %45 = vector.multi_reduction <maximumf>, %44, %cst_26 [1] : vector<5x5xf32> to vector<5xf32>
    %46 = vector.shape_cast %45 : vector<5xf32> to vector<5x1xf32>
    %47 = vector.broadcast %46 : vector<5x1xf32> to vector<5x5xf32>
    %48 = arith.subf %44, %47 : vector<5x5xf32>
    %49 = math.exp %48 : vector<5x5xf32>
    %cst_27 = arith.constant dense<0.000000e+00> : vector<5xf32>
    %50 = vector.multi_reduction <add>, %49, %cst_27 [1] : vector<5x5xf32> to vector<5xf32>
    %51 = vector.shape_cast %50 : vector<5xf32> to vector<5x1xf32>
    %52 = tpu.reciprocal %51 {approx = true} : vector<5x1xf32> -> vector<5x1xf32>
    %53 = vector.broadcast %52 : vector<5x1xf32> to vector<5x5xf32>
    %54 = arith.mulf %49, %53 : vector<5x5xf32>
    %cst_28 = arith.constant dense<0.000000e+00> : vector<5x8xf32>
    %55 = tpu.matmul %54, %41, %cst_28 {dimension_numbers = #tpu.dot_dimension_numbers<[1], [0], [0], [1], [0, 0, 1, 1], [], []>} : vector<5x5xf32>, vector<5x8xf32>, vector<5x8xf32> -> vector<5x8xf32>
    %56 = vector.extract_strided_slice %38 {offsets = [0, 8], sizes = [5, 8], strides = [1, 1]} : vector<5x96xf32> to vector<5x8xf32>
    %57 = vector.extract_strided_slice %38 {offsets = [0, 40], sizes = [5, 8], strides = [1, 1]} : vector<5x96xf32> to vector<5x8xf32>
    %58 = vector.extract_strided_slice %38 {offsets = [0, 72], sizes = [5, 8], strides = [1, 1]} : vector<5x96xf32> to vector<5x8xf32>
    %cst_29 = arith.constant 0.353553385 : f32
    %59 = vector.broadcast %cst_29 : f32 to vector<5x8xf32>
    %60 = arith.mulf %56, %59 : vector<5x8xf32>
    %cst_30 = arith.constant dense<0.000000e+00> : vector<5x5xf32>
    %61 = tpu.matmul %60, %57, %cst_30 {dimension_numbers = #tpu.dot_dimension_numbers<[1], [1], [0], [0], [0, 0, 1, 0], [], []>} : vector<5x8xf32>, vector<5x8xf32>, vector<5x5xf32> -> vector<5x5xf32>
    %cst_31 = arith.constant dense<0xFF800000> : vector<5xf32>
    %62 = vector.multi_reduction <maximumf>, %61, %cst_31 [1] : vector<5x5xf32> to vector<5xf32>
    %63 = vector.shape_cast %62 : vector<5xf32> to vector<5x1xf32>
    %64 = vector.broadcast %63 : vector<5x1xf32> to vector<5x5xf32>
    %65 = arith.subf %61, %64 : vector<5x5xf32>
    %66 = math.exp %65 : vector<5x5xf32>
    %cst_32 = arith.constant dense<0.000000e+00> : vector<5xf32>
    %67 = vector.multi_reduction <add>, %66, %cst_32 [1] : vector<5x5xf32> to vector<5xf32>
    %68 = vector.shape_cast %67 : vector<5xf32> to vector<5x1xf32>
    %69 = tpu.reciprocal %68 {approx = true} : vector<5x1xf32> -> vector<5x1xf32>
    %70 = vector.broadcast %69 : vector<5x1xf32> to vector<5x5xf32>
    %71 = arith.mulf %66, %70 : vector<5x5xf32>
    %cst_33 = arith.constant dense<0.000000e+00> : vector<5x8xf32>
    %72 = tpu.matmul %71, %58, %cst_33 {dimension_numbers = #tpu.dot_dimension_numbers<[1], [0], [0], [1], [0, 0, 1, 1], [], []>} : vector<5x5xf32>, vector<5x8xf32>, vector<5x8xf32> -> vector<5x8xf32>
    %73 = vector.extract_strided_slice %38 {offsets = [0, 16], sizes = [5, 8], strides = [1, 1]} : vector<5x96xf32> to vector<5x8xf32>
    %74 = vector.extract_strided_slice %38 {offsets = [0, 48], sizes = [5, 8], strides = [1, 1]} : vector<5x96xf32> to vector<5x8xf32>
    %75 = vector.extract_strided_slice %38 {offsets = [0, 80], sizes = [5, 8], strides = [1, 1]} : vector<5x96xf32> to vector<5x8xf32>
    %cst_34 = arith.constant 0.353553385 : f32
    %76 = vector.broadcast %cst_34 : f32 to vector<5x8xf32>
    %77 = arith.mulf %73, %76 : vector<5x8xf32>
    %cst_35 = arith.constant dense<0.000000e+00> : vector<5x5xf32>
    %78 = tpu.matmul %77, %74, %cst_35 {dimension_numbers = #tpu.dot_dimension_numbers<[1], [1], [0], [0], [0, 0, 1, 0], [], []>} : vector<5x8xf32>, vector<5x8xf32>, vector<5x5xf32> -> vector<5x5xf32>
    %cst_36 = arith.constant dense<0xFF800000> : vector<5xf32>
    %79 = vector.multi_reduction <maximumf>, %78, %cst_36 [1] : vector<5x5xf32> to vector<5xf32>
    %80 = vector.shape_cast %79 : vector<5xf32> to vector<5x1xf32>
    %81 = vector.broadcast %80 : vector<5x1xf32> to vector<5x5xf32>
    %82 = arith.subf %78, %81 : vector<5x5xf32>
    %83 = math.exp %82 : vector<5x5xf32>
    %cst_37 = arith.constant dense<0.000000e+00> : vector<5xf32>
    %84 = vector.multi_reduction <add>, %83, %cst_37 [1] : vector<5x5xf32> to vector<5xf32>
    %85 = vector.shape_cast %84 : vector<5xf32> to vector<5x1xf32>
    %86 = tpu.reciprocal %85 {approx = true} : vector<5x1xf32> -> vector<5x1xf32>
    %87 = vector.broadcast %86 : vector<5x1xf32> to vector<5x5xf32>
    %88 = arith.mulf %83, %87 : vector<5x5xf32>
    %cst_38 = arith.constant dense<0.000000e+00> : vector<5x8xf32>
    %89 = tpu.matmul %88, %75, %cst_38 {dimension_numbers = #tpu.dot_dimension_numbers<[1], [0], [0], [1], [0, 0, 1, 1], [], []>} : vector<5x5xf32>, vector<5x8xf32>, vector<5x8xf32> -> vector<5x8xf32>
    %90 = vector.extract_strided_slice %38 {offsets = [0, 24], sizes = [5, 8], strides = [1, 1]} : vector<5x96xf32> to vector<5x8xf32>
    %91 = vector.extract_strided_slice %38 {offsets = [0, 56], sizes = [5, 8], strides = [1, 1]} : vector<5x96xf32> to vector<5x8xf32>
    %92 = vector.extract_strided_slice %38 {offsets = [0, 88], sizes = [5, 8], strides = [1, 1]} : vector<5x96xf32> to vector<5x8xf32>
    %cst_39 = arith.constant 0.353553385 : f32
    %93 = vector.broadcast %cst_39 : f32 to vector<5x8xf32>
    %94 = arith.mulf %90, %93 : vector<5x8xf32>
    %cst_40 = arith.constant dense<0.000000e+00> : vector<5x5xf32>
    %95 = tpu.matmul %94, %91, %cst_40 {dimension_numbers = #tpu.dot_dimension_numbers<[1], [1], [0], [0], [0, 0, 1, 0], [], []>} : vector<5x8xf32>, vector<5x8xf32>, vector<5x5xf32> -> vector<5x5xf32>
    %cst_41 = arith.constant dense<0xFF800000> : vector<5xf32>
    %96 = vector.multi_reduction <maximumf>, %95, %cst_41 [1] : vector<5x5xf32> to vector<5xf32>
    %97 = vector.shape_cast %96 : vector<5xf32> to vector<5x1xf32>
    %98 = vector.broadcast %97 : vector<5x1xf32> to vector<5x5xf32>
    %99 = arith.subf %95, %98 : vector<5x5xf32>
    %100 = math.exp %99 : vector<5x5xf32>
    %cst_42 = arith.constant dense<0.000000e+00> : vector<5xf32>
    %101 = vector.multi_reduction <add>, %100, %cst_42 [1] : vector<5x5xf32> to vector<5xf32>
    %102 = vector.shape_cast %101 : vector<5xf32> to vector<5x1xf32>
    %103 = tpu.reciprocal %102 {approx = true} : vector<5x1xf32> -> vector<5x1xf32>
    %104 = vector.broadcast %103 : vector<5x1xf32> to vector<5x5xf32>
    %105 = arith.mulf %100, %104 : vector<5x5xf32>
    %cst_43 = arith.constant dense<0.000000e+00> : vector<5x8xf32>
    %106 = tpu.matmul %105, %92, %cst_43 {dimension_numbers = #tpu.dot_dimension_numbers<[1], [0], [0], [1], [0, 0, 1, 1], [], []>} : vector<5x5xf32>, vector<5x8xf32>, vector<5x8xf32> -> vector<5x8xf32>
    %107 = tpu.concatenate %55, %72, %89, %106 in 1 : vector<5x8xf32>, vector<5x8xf32>, vector<5x8xf32>, vector<5x8xf32> -> vector<5x32xf32>
    %108 = arith.truncf %107 : vector<5x32xf32> to vector<5x32xbf16>
    %c0_44 = arith.constant 0 : index
    %c0_45 = arith.constant 0 : index
    %c0_46 = arith.constant 0 : index
    %109 = vector.load %arg8[%c0_44, %c0_45, %c0_46] : memref<2x32x32xbf16, #tpu.memory_space<vmem>>, vector<1x32x32xbf16>
    %110 = vector.shape_cast %109 : vector<1x32x32xbf16> to vector<32x32xbf16>
    %cst_47 = arith.constant dense<0.000000e+00> : vector<5x32xf32>
    %111 = tpu.matmul %108, %110, %cst_47 {dimension_numbers = #tpu.dot_dimension_numbers<[1], [0], [0], [1], [0, 0, 1, 1], [], []>} : vector<5x32xbf16>, vector<32x32xbf16>, vector<5x32xf32> -> vector<5x32xf32>
    %c0_48 = arith.constant 0 : index
    %c0_49 = arith.constant 0 : index
    %c0_50 = arith.constant 0 : index
    %112 = vector.load %arg9[%c0_48, %c0_49, %c0_50] : memref<2x1x32xf32, #tpu.memory_space<vmem>>, vector<1x1x32xf32>
    %113 = vector.shape_cast %112 : vector<1x1x32xf32> to vector<1x32xf32>
    %114 = vector.broadcast %113 : vector<1x32xf32> to vector<5x32xf32>
    %115 = arith.addf %111, %114 : vector<5x32xf32>
    %116 = arith.addf %6, %115 : vector<5x32xf32>
    %c0_51 = arith.constant 0 : index
    %c0_52 = arith.constant 0 : index
    %c0_53 = arith.constant 0 : index
    %117 = vector.load %arg10[%c0_51, %c0_52, %c0_53] : memref<2x1x32xf32, #tpu.memory_space<vmem>>, vector<1x1x32xf32>
    %118 = vector.shape_cast %117 : vector<1x1x32xf32> to vector<1x32xf32>
    %c0_54 = arith.constant 0 : index
    %c0_55 = arith.constant 0 : index
    %c0_56 = arith.constant 0 : index
    %119 = vector.load %arg11[%c0_54, %c0_55, %c0_56] : memref<2x1x32xf32, #tpu.memory_space<vmem>>, vector<1x1x32xf32>
    %120 = vector.shape_cast %119 : vector<1x1x32xf32> to vector<1x32xf32>
    %cst_57 = arith.constant dense<0.000000e+00> : vector<5xf32>
    %121 = vector.multi_reduction <add>, %116, %cst_57 [1] : vector<5x32xf32> to vector<5xf32>
    %122 = vector.shape_cast %121 : vector<5xf32> to vector<5x1xf32>
    %cst_58 = arith.constant 3.200000e+01 : f32
    %123 = vector.broadcast %cst_58 : f32 to vector<5x1xf32>
    %124 = arith.divf %122, %123 : vector<5x1xf32>
    %125 = vector.broadcast %124 : vector<5x1xf32> to vector<5x32xf32>
    %126 = arith.subf %116, %125 : vector<5x32xf32>
    %127 = arith.mulf %126, %126 : vector<5x32xf32>
    %cst_59 = arith.constant dense<0.000000e+00> : vector<5xf32>
    %128 = vector.multi_reduction <add>, %127, %cst_59 [1] : vector<5x32xf32> to vector<5xf32>
    %129 = vector.shape_cast %128 : vector<5xf32> to vector<5x1xf32>
    %cst_60 = arith.constant 3.200000e+01 : f32
    %130 = vector.broadcast %cst_60 : f32 to vector<5x1xf32>
    %131 = arith.divf %129, %130 : vector<5x1xf32>
    %cst_61 = arith.constant 9.99999997E-7 : f32
    %132 = vector.broadcast %cst_61 : f32 to vector<5x1xf32>
    %133 = arith.addf %131, %132 : vector<5x1xf32>
    %134 = math.rsqrt %133 : vector<5x1xf32>
    %135 = vector.broadcast %134 : vector<5x1xf32> to vector<5x32xf32>
    %136 = arith.mulf %126, %135 : vector<5x32xf32>
    %137 = vector.broadcast %118 : vector<1x32xf32> to vector<5x32xf32>
    %138 = arith.mulf %136, %137 : vector<5x32xf32>
    %139 = vector.broadcast %120 : vector<1x32xf32> to vector<5x32xf32>
    %140 = arith.addf %138, %139 : vector<5x32xf32>
    %c0_62 = arith.constant 0 : index
    %c0_63 = arith.constant 0 : index
    %c0_64 = arith.constant 0 : index
    %141 = vector.load %arg12[%c0_62, %c0_63, %c0_64] : memref<2x32x128xbf16, #tpu.memory_space<vmem>>, vector<1x32x128xbf16>
    %142 = vector.shape_cast %141 : vector<1x32x128xbf16> to vector<32x128xbf16>
    %143 = arith.truncf %140 : vector<5x32xf32> to vector<5x32xbf16>
    %cst_65 = arith.constant dense<0.000000e+00> : vector<5x128xf32>
    %144 = tpu.matmul %143, %142, %cst_65 {dimension_numbers = #tpu.dot_dimension_numbers<[1], [0], [0], [1], [0, 0, 1, 1], [], []>} : vector<5x32xbf16>, vector<32x128xbf16>, vector<5x128xf32> -> vector<5x128xf32>
    %c0_66 = arith.constant 0 : index
    %c0_67 = arith.constant 0 : index
    %c0_68 = arith.constant 0 : index
    %145 = vector.load %arg13[%c0_66, %c0_67, %c0_68] : memref<2x1x128xf32, #tpu.memory_space<vmem>>, vector<1x1x128xf32>
    %146 = vector.shape_cast %145 : vector<1x1x128xf32> to vector<1x128xf32>
    %147 = vector.broadcast %146 : vector<1x128xf32> to vector<5x128xf32>
    %148 = arith.addf %144, %147 : vector<5x128xf32>
    %cst_69 = arith.constant 5.000000e-01 : f32
    %149 = vector.broadcast %cst_69 : f32 to vector<5x128xf32>
    %150 = arith.mulf %149, %148 : vector<5x128xf32>
    %cst_70 = arith.constant 0.707106769 : f32
    %151 = vector.broadcast %cst_70 : f32 to vector<5x128xf32>
    %152 = arith.mulf %148, %151 : vector<5x128xf32>
    %153 = math.erf %152 : vector<5x128xf32>
    %cst_71 = arith.constant 1.000000e+00 : f32
    %154 = vector.broadcast %cst_71 : f32 to vector<5x128xf32>
    %155 = arith.addf %154, %153 : vector<5x128xf32>
    %156 = arith.mulf %150, %155 : vector<5x128xf32>
    %c0_72 = arith.constant 0 : index
    %c0_73 = arith.constant 0 : index
    %c0_74 = arith.constant 0 : index
    %157 = vector.load %arg14[%c0_72, %c0_73, %c0_74] : memref<2x128x32xbf16, #tpu.memory_space<vmem>>, vector<1x128x32xbf16>
    %158 = vector.shape_cast %157 : vector<1x128x32xbf16> to vector<128x32xbf16>
    %159 = arith.truncf %156 : vector<5x128xf32> to vector<5x128xbf16>
    %cst_75 = arith.constant dense<0.000000e+00> : vector<5x32xf32>
    %160 = tpu.matmul %159, %158, %cst_75 {dimension_numbers = #tpu.dot_dimension_numbers<[1], [0], [0], [1], [0, 0, 1, 1], [], []>} : vector<5x128xbf16>, vector<128x32xbf16>, vector<5x32xf32> -> vector<5x32xf32>
    %c0_76 = arith.constant 0 : index
    %c0_77 = arith.constant 0 : index
    %c0_78 = arith.constant 0 : index
    %161 = vector.load %arg15[%c0_76, %c0_77, %c0_78] : memref<2x1x32xf32, #tpu.memory_space<vmem>>, vector<1x1x32xf32>
    %162 = vector.shape_cast %161 : vector<1x1x32xf32> to vector<1x32xf32>
    %163 = vector.broadcast %162 : vector<1x32xf32> to vector<5x32xf32>
    %164 = arith.addf %160, %163 : vector<5x32xf32>
    %165 = arith.addf %116, %164 : vector<5x32xf32>
    %c1 = arith.constant 1 : index
    %c0_79 = arith.constant 0 : index
    %c0_80 = arith.constant 0 : index
    %166 = vector.load %arg4[%c1, %c0_79, %c0_80] : memref<2x1x32xf32, #tpu.memory_space<vmem>>, vector<1x1x32xf32>
    %167 = vector.shape_cast %166 : vector<1x1x32xf32> to vector<1x32xf32>
    %c1_81 = arith.constant 1 : index
    %c0_82 = arith.constant 0 : index
    %c0_83 = arith.constant 0 : index
    %168 = vector.load %arg5[%c1_81, %c0_82, %c0_83] : memref<2x1x32xf32, #tpu.memory_space<vmem>>, vector<1x1x32xf32>
    %169 = vector.shape_cast %168 : vector<1x1x32xf32> to vector<1x32xf32>
    %cst_84 = arith.constant dense<0.000000e+00> : vector<5xf32>
    %170 = vector.multi_reduction <add>, %165, %cst_84 [1] : vector<5x32xf32> to vector<5xf32>
    %171 = vector.shape_cast %170 : vector<5xf32> to vector<5x1xf32>
    %cst_85 = arith.constant 3.200000e+01 : f32
    %172 = vector.broadcast %cst_85 : f32 to vector<5x1xf32>
    %173 = arith.divf %171, %172 : vector<5x1xf32>
    %174 = vector.broadcast %173 : vector<5x1xf32> to vector<5x32xf32>
    %175 = arith.subf %165, %174 : vector<5x32xf32>
    %176 = arith.mulf %175, %175 : vector<5x32xf32>
    %cst_86 = arith.constant dense<0.000000e+00> : vector<5xf32>
    %177 = vector.multi_reduction <add>, %176, %cst_86 [1] : vector<5x32xf32> to vector<5xf32>
    %178 = vector.shape_cast %177 : vector<5xf32> to vector<5x1xf32>
    %cst_87 = arith.constant 3.200000e+01 : f32
    %179 = vector.broadcast %cst_87 : f32 to vector<5x1xf32>
    %180 = arith.divf %178, %179 : vector<5x1xf32>
    %cst_88 = arith.constant 9.99999997E-7 : f32
    %181 = vector.broadcast %cst_88 : f32 to vector<5x1xf32>
    %182 = arith.addf %180, %181 : vector<5x1xf32>
    %183 = math.rsqrt %182 : vector<5x1xf32>
    %184 = vector.broadcast %183 : vector<5x1xf32> to vector<5x32xf32>
    %185 = arith.mulf %175, %184 : vector<5x32xf32>
    %186 = vector.broadcast %167 : vector<1x32xf32> to vector<5x32xf32>
    %187 = arith.mulf %185, %186 : vector<5x32xf32>
    %188 = vector.broadcast %169 : vector<1x32xf32> to vector<5x32xf32>
    %189 = arith.addf %187, %188 : vector<5x32xf32>
    %190 = arith.truncf %189 : vector<5x32xf32> to vector<5x32xbf16>
    %c1_89 = arith.constant 1 : index
    %c0_90 = arith.constant 0 : index
    %c0_91 = arith.constant 0 : index
    %191 = vector.load %arg6[%c1_89, %c0_90, %c0_91] : memref<2x32x96xbf16, #tpu.memory_space<vmem>>, vector<1x32x96xbf16>
    %192 = vector.shape_cast %191 : vector<1x32x96xbf16> to vector<32x96xbf16>
    %cst_92 = arith.constant dense<0.000000e+00> : vector<5x96xf32>
    %193 = tpu.matmul %190, %192, %cst_92 {dimension_numbers = #tpu.dot_dimension_numbers<[1], [0], [0], [1], [0, 0, 1, 1], [], []>} : vector<5x32xbf16>, vector<32x96xbf16>, vector<5x96xf32> -> vector<5x96xf32>
    %c1_93 = arith.constant 1 : index
    %c0_94 = arith.constant 0 : index
    %c0_95 = arith.constant 0 : index
    %194 = vector.load %arg7[%c1_93, %c0_94, %c0_95] : memref<2x1x96xf32, #tpu.memory_space<vmem>>, vector<1x1x96xf32>
    %195 = vector.shape_cast %194 : vector<1x1x96xf32> to vector<1x96xf32>
    %196 = vector.broadcast %195 : vector<1x96xf32> to vector<5x96xf32>
    %197 = arith.addf %193, %196 : vector<5x96xf32>
    %198 = vector.extract_strided_slice %197 {offsets = [0, 0], sizes = [5, 8], strides = [1, 1]} : vector<5x96xf32> to vector<5x8xf32>
    %199 = vector.extract_strided_slice %197 {offsets = [0, 32], sizes = [5, 8], strides = [1, 1]} : vector<5x96xf32> to vector<5x8xf32>
    %200 = vector.extract_strided_slice %197 {offsets = [0, 64], sizes = [5, 8], strides = [1, 1]} : vector<5x96xf32> to vector<5x8xf32>
    %cst_96 = arith.constant 0.353553385 : f32
    %201 = vector.broadcast %cst_96 : f32 to vector<5x8xf32>
    %202 = arith.mulf %198, %201 : vector<5x8xf32>
    %cst_97 = arith.constant dense<0.000000e+00> : vector<5x5xf32>
    %203 = tpu.matmul %202, %199, %cst_97 {dimension_numbers = #tpu.dot_dimension_numbers<[1], [1], [0], [0], [0, 0, 1, 0], [], []>} : vector<5x8xf32>, vector<5x8xf32>, vector<5x5xf32> -> vector<5x5xf32>
    %cst_98 = arith.constant dense<0xFF800000> : vector<5xf32>
    %204 = vector.multi_reduction <maximumf>, %203, %cst_98 [1] : vector<5x5xf32> to vector<5xf32>
    %205 = vector.shape_cast %204 : vector<5xf32> to vector<5x1xf32>
    %206 = vector.broadcast %205 : vector<5x1xf32> to vector<5x5xf32>
    %207 = arith.subf %203, %206 : vector<5x5xf32>
    %208 = math.exp %207 : vector<5x5xf32>
    %cst_99 = arith.constant dense<0.000000e+00> : vector<5xf32>
    %209 = vector.multi_reduction <add>, %208, %cst_99 [1] : vector<5x5xf32> to vector<5xf32>
    %210 = vector.shape_cast %209 : vector<5xf32> to vector<5x1xf32>
    %211 = tpu.reciprocal %210 {approx = true} : vector<5x1xf32> -> vector<5x1xf32>
    %212 = vector.broadcast %211 : vector<5x1xf32> to vector<5x5xf32>
    %213 = arith.mulf %208, %212 : vector<5x5xf32>
    %cst_100 = arith.constant dense<0.000000e+00> : vector<5x8xf32>
    %214 = tpu.matmul %213, %200, %cst_100 {dimension_numbers = #tpu.dot_dimension_numbers<[1], [0], [0], [1], [0, 0, 1, 1], [], []>} : vector<5x5xf32>, vector<5x8xf32>, vector<5x8xf32> -> vector<5x8xf32>
    %215 = vector.extract_strided_slice %197 {offsets = [0, 8], sizes = [5, 8], strides = [1, 1]} : vector<5x96xf32> to vector<5x8xf32>
    %216 = vector.extract_strided_slice %197 {offsets = [0, 40], sizes = [5, 8], strides = [1, 1]} : vector<5x96xf32> to vector<5x8xf32>
    %217 = vector.extract_strided_slice %197 {offsets = [0, 72], sizes = [5, 8], strides = [1, 1]} : vector<5x96xf32> to vector<5x8xf32>
    %cst_101 = arith.constant 0.353553385 : f32
    %218 = vector.broadcast %cst_101 : f32 to vector<5x8xf32>
    %219 = arith.mulf %215, %218 : vector<5x8xf32>
    %cst_102 = arith.constant dense<0.000000e+00> : vector<5x5xf32>
    %220 = tpu.matmul %219, %216, %cst_102 {dimension_numbers = #tpu.dot_dimension_numbers<[1], [1], [0], [0], [0, 0, 1, 0], [], []>} : vector<5x8xf32>, vector<5x8xf32>, vector<5x5xf32> -> vector<5x5xf32>
    %cst_103 = arith.constant dense<0xFF800000> : vector<5xf32>
    %221 = vector.multi_reduction <maximumf>, %220, %cst_103 [1] : vector<5x5xf32> to vector<5xf32>
    %222 = vector.shape_cast %221 : vector<5xf32> to vector<5x1xf32>
    %223 = vector.broadcast %222 : vector<5x1xf32> to vector<5x5xf32>
    %224 = arith.subf %220, %223 : vector<5x5xf32>
    %225 = math.exp %224 : vector<5x5xf32>
    %cst_104 = arith.constant dense<0.000000e+00> : vector<5xf32>
    %226 = vector.multi_reduction <add>, %225, %cst_104 [1] : vector<5x5xf32> to vector<5xf32>
    %227 = vector.shape_cast %226 : vector<5xf32> to vector<5x1xf32>
    %228 = tpu.reciprocal %227 {approx = true} : vector<5x1xf32> -> vector<5x1xf32>
    %229 = vector.broadcast %228 : vector<5x1xf32> to vector<5x5xf32>
    %230 = arith.mulf %225, %229 : vector<5x5xf32>
    %cst_105 = arith.constant dense<0.000000e+00> : vector<5x8xf32>
    %231 = tpu.matmul %230, %217, %cst_105 {dimension_numbers = #tpu.dot_dimension_numbers<[1], [0], [0], [1], [0, 0, 1, 1], [], []>} : vector<5x5xf32>, vector<5x8xf32>, vector<5x8xf32> -> vector<5x8xf32>
    %232 = vector.extract_strided_slice %197 {offsets = [0, 16], sizes = [5, 8], strides = [1, 1]} : vector<5x96xf32> to vector<5x8xf32>
    %233 = vector.extract_strided_slice %197 {offsets = [0, 48], sizes = [5, 8], strides = [1, 1]} : vector<5x96xf32> to vector<5x8xf32>
    %234 = vector.extract_strided_slice %197 {offsets = [0, 80], sizes = [5, 8], strides = [1, 1]} : vector<5x96xf32> to vector<5x8xf32>
    %cst_106 = arith.constant 0.353553385 : f32
    %235 = vector.broadcast %cst_106 : f32 to vector<5x8xf32>
    %236 = arith.mulf %232, %235 : vector<5x8xf32>
    %cst_107 = arith.constant dense<0.000000e+00> : vector<5x5xf32>
    %237 = tpu.matmul %236, %233, %cst_107 {dimension_numbers = #tpu.dot_dimension_numbers<[1], [1], [0], [0], [0, 0, 1, 0], [], []>} : vector<5x8xf32>, vector<5x8xf32>, vector<5x5xf32> -> vector<5x5xf32>
    %cst_108 = arith.constant dense<0xFF800000> : vector<5xf32>
    %238 = vector.multi_reduction <maximumf>, %237, %cst_108 [1] : vector<5x5xf32> to vector<5xf32>
    %239 = vector.shape_cast %238 : vector<5xf32> to vector<5x1xf32>
    %240 = vector.broadcast %239 : vector<5x1xf32> to vector<5x5xf32>
    %241 = arith.subf %237, %240 : vector<5x5xf32>
    %242 = math.exp %241 : vector<5x5xf32>
    %cst_109 = arith.constant dense<0.000000e+00> : vector<5xf32>
    %243 = vector.multi_reduction <add>, %242, %cst_109 [1] : vector<5x5xf32> to vector<5xf32>
    %244 = vector.shape_cast %243 : vector<5xf32> to vector<5x1xf32>
    %245 = tpu.reciprocal %244 {approx = true} : vector<5x1xf32> -> vector<5x1xf32>
    %246 = vector.broadcast %245 : vector<5x1xf32> to vector<5x5xf32>
    %247 = arith.mulf %242, %246 : vector<5x5xf32>
    %cst_110 = arith.constant dense<0.000000e+00> : vector<5x8xf32>
    %248 = tpu.matmul %247, %234, %cst_110 {dimension_numbers = #tpu.dot_dimension_numbers<[1], [0], [0], [1], [0, 0, 1, 1], [], []>} : vector<5x5xf32>, vector<5x8xf32>, vector<5x8xf32> -> vector<5x8xf32>
    %249 = vector.extract_strided_slice %197 {offsets = [0, 24], sizes = [5, 8], strides = [1, 1]} : vector<5x96xf32> to vector<5x8xf32>
    %250 = vector.extract_strided_slice %197 {offsets = [0, 56], sizes = [5, 8], strides = [1, 1]} : vector<5x96xf32> to vector<5x8xf32>
    %251 = vector.extract_strided_slice %197 {offsets = [0, 88], sizes = [5, 8], strides = [1, 1]} : vector<5x96xf32> to vector<5x8xf32>
    %cst_111 = arith.constant 0.353553385 : f32
    %252 = vector.broadcast %cst_111 : f32 to vector<5x8xf32>
    %253 = arith.mulf %249, %252 : vector<5x8xf32>
    %cst_112 = arith.constant dense<0.000000e+00> : vector<5x5xf32>
    %254 = tpu.matmul %253, %250, %cst_112 {dimension_numbers = #tpu.dot_dimension_numbers<[1], [1], [0], [0], [0, 0, 1, 0], [], []>} : vector<5x8xf32>, vector<5x8xf32>, vector<5x5xf32> -> vector<5x5xf32>
    %cst_113 = arith.constant dense<0xFF800000> : vector<5xf32>
    %255 = vector.multi_reduction <maximumf>, %254, %cst_113 [1] : vector<5x5xf32> to vector<5xf32>
    %256 = vector.shape_cast %255 : vector<5xf32> to vector<5x1xf32>
    %257 = vector.broadcast %256 : vector<5x1xf32> to vector<5x5xf32>
    %258 = arith.subf %254, %257 : vector<5x5xf32>
    %259 = math.exp %258 : vector<5x5xf32>
    %cst_114 = arith.constant dense<0.000000e+00> : vector<5xf32>
    %260 = vector.multi_reduction <add>, %259, %cst_114 [1] : vector<5x5xf32> to vector<5xf32>
    %261 = vector.shape_cast %260 : vector<5xf32> to vector<5x1xf32>
    %262 = tpu.reciprocal %261 {approx = true} : vector<5x1xf32> -> vector<5x1xf32>
    %263 = vector.broadcast %262 : vector<5x1xf32> to vector<5x5xf32>
    %264 = arith.mulf %259, %263 : vector<5x5xf32>
    %cst_115 = arith.constant dense<0.000000e+00> : vector<5x8xf32>
    %265 = tpu.matmul %264, %251, %cst_115 {dimension_numbers = #tpu.dot_dimension_numbers<[1], [0], [0], [1], [0, 0, 1, 1], [], []>} : vector<5x5xf32>, vector<5x8xf32>, vector<5x8xf32> -> vector<5x8xf32>
    %266 = tpu.concatenate %214, %231, %248, %265 in 1 : vector<5x8xf32>, vector<5x8xf32>, vector<5x8xf32>, vector<5x8xf32> -> vector<5x32xf32>
    %267 = arith.truncf %266 : vector<5x32xf32> to vector<5x32xbf16>
    %c1_116 = arith.constant 1 : index
    %c0_117 = arith.constant 0 : index
    %c0_118 = arith.constant 0 : index
    %268 = vector.load %arg8[%c1_116, %c0_117, %c0_118] : memref<2x32x32xbf16, #tpu.memory_space<vmem>>, vector<1x32x32xbf16>
    %269 = vector.shape_cast %268 : vector<1x32x32xbf16> to vector<32x32xbf16>
    %cst_119 = arith.constant dense<0.000000e+00> : vector<5x32xf32>
    %270 = tpu.matmul %267, %269, %cst_119 {dimension_numbers = #tpu.dot_dimension_numbers<[1], [0], [0], [1], [0, 0, 1, 1], [], []>} : vector<5x32xbf16>, vector<32x32xbf16>, vector<5x32xf32> -> vector<5x32xf32>
    %c1_120 = arith.constant 1 : index
    %c0_121 = arith.constant 0 : index
    %c0_122 = arith.constant 0 : index
    %271 = vector.load %arg9[%c1_120, %c0_121, %c0_122] : memref<2x1x32xf32, #tpu.memory_space<vmem>>, vector<1x1x32xf32>
    %272 = vector.shape_cast %271 : vector<1x1x32xf32> to vector<1x32xf32>
    %273 = vector.broadcast %272 : vector<1x32xf32> to vector<5x32xf32>
    %274 = arith.addf %270, %273 : vector<5x32xf32>
    %275 = arith.addf %165, %274 : vector<5x32xf32>
    %c1_123 = arith.constant 1 : index
    %c0_124 = arith.constant 0 : index
    %c0_125 = arith.constant 0 : index
    %276 = vector.load %arg10[%c1_123, %c0_124, %c0_125] : memref<2x1x32xf32, #tpu.memory_space<vmem>>, vector<1x1x32xf32>
    %277 = vector.shape_cast %276 : vector<1x1x32xf32> to vector<1x32xf32>
    %c1_126 = arith.constant 1 : index
    %c0_127 = arith.constant 0 : index
    %c0_128 = arith.constant 0 : index
    %278 = vector.load %arg11[%c1_126, %c0_127, %c0_128] : memref<2x1x32xf32, #tpu.memory_space<vmem>>, vector<1x1x32xf32>
    %279 = vector.shape_cast %278 : vector<1x1x32xf32> to vector<1x32xf32>
    %cst_129 = arith.constant dense<0.000000e+00> : vector<5xf32>
    %280 = vector.multi_reduction <add>, %275, %cst_129 [1] : vector<5x32xf32> to vector<5xf32>
    %281 = vector.shape_cast %280 : vector<5xf32> to vector<5x1xf32>
    %cst_130 = arith.constant 3.200000e+01 : f32
    %282 = vector.broadcast %cst_130 : f32 to vector<5x1xf32>
    %283 = arith.divf %281, %282 : vector<5x1xf32>
    %284 = vector.broadcast %283 : vector<5x1xf32> to vector<5x32xf32>
    %285 = arith.subf %275, %284 : vector<5x32xf32>
    %286 = arith.mulf %285, %285 : vector<5x32xf32>
    %cst_131 = arith.constant dense<0.000000e+00> : vector<5xf32>
    %287 = vector.multi_reduction <add>, %286, %cst_131 [1] : vector<5x32xf32> to vector<5xf32>
    %288 = vector.shape_cast %287 : vector<5xf32> to vector<5x1xf32>
    %cst_132 = arith.constant 3.200000e+01 : f32
    %289 = vector.broadcast %cst_132 : f32 to vector<5x1xf32>
    %290 = arith.divf %288, %289 : vector<5x1xf32>
    %cst_133 = arith.constant 9.99999997E-7 : f32
    %291 = vector.broadcast %cst_133 : f32 to vector<5x1xf32>
    %292 = arith.addf %290, %291 : vector<5x1xf32>
    %293 = math.rsqrt %292 : vector<5x1xf32>
    %294 = vector.broadcast %293 : vector<5x1xf32> to vector<5x32xf32>
    %295 = arith.mulf %285, %294 : vector<5x32xf32>
    %296 = vector.broadcast %277 : vector<1x32xf32> to vector<5x32xf32>
    %297 = arith.mulf %295, %296 : vector<5x32xf32>
    %298 = vector.broadcast %279 : vector<1x32xf32> to vector<5x32xf32>
    %299 = arith.addf %297, %298 : vector<5x32xf32>
    %c1_134 = arith.constant 1 : index
    %c0_135 = arith.constant 0 : index
    %c0_136 = arith.constant 0 : index
    %300 = vector.load %arg12[%c1_134, %c0_135, %c0_136] : memref<2x32x128xbf16, #tpu.memory_space<vmem>>, vector<1x32x128xbf16>
    %301 = vector.shape_cast %300 : vector<1x32x128xbf16> to vector<32x128xbf16>
    %302 = arith.truncf %299 : vector<5x32xf32> to vector<5x32xbf16>
    %cst_137 = arith.constant dense<0.000000e+00> : vector<5x128xf32>
    %303 = tpu.matmul %302, %301, %cst_137 {dimension_numbers = #tpu.dot_dimension_numbers<[1], [0], [0], [1], [0, 0, 1, 1], [], []>} : vector<5x32xbf16>, vector<32x128xbf16>, vector<5x128xf32> -> vector<5x128xf32>
    %c1_138 = arith.constant 1 : index
    %c0_139 = arith.constant 0 : index
    %c0_140 = arith.constant 0 : index
    %304 = vector.load %arg13[%c1_138, %c0_139, %c0_140] : memref<2x1x128xf32, #tpu.memory_space<vmem>>, vector<1x1x128xf32>
    %305 = vector.shape_cast %304 : vector<1x1x128xf32> to vector<1x128xf32>
    %306 = vector.broadcast %305 : vector<1x128xf32> to vector<5x128xf32>
    %307 = arith.addf %303, %306 : vector<5x128xf32>
    %cst_141 = arith.constant 5.000000e-01 : f32
    %308 = vector.broadcast %cst_141 : f32 to vector<5x128xf32>
    %309 = arith.mulf %308, %307 : vector<5x128xf32>
    %cst_142 = arith.constant 0.707106769 : f32
    %310 = vector.broadcast %cst_142 : f32 to vector<5x128xf32>
    %311 = arith.mulf %307, %310 : vector<5x128xf32>
    %312 = math.erf %311 : vector<5x128xf32>
    %cst_143 = arith.constant 1.000000e+00 : f32
    %313 = vector.broadcast %cst_143 : f32 to vector<5x128xf32>
    %314 = arith.addf %313, %312 : vector<5x128xf32>
    %315 = arith.mulf %309, %314 : vector<5x128xf32>
    %c1_144 = arith.constant 1 : index
    %c0_145 = arith.constant 0 : index
    %c0_146 = arith.constant 0 : index
    %316 = vector.load %arg14[%c1_144, %c0_145, %c0_146] : memref<2x128x32xbf16, #tpu.memory_space<vmem>>, vector<1x128x32xbf16>
    %317 = vector.shape_cast %316 : vector<1x128x32xbf16> to vector<128x32xbf16>
    %318 = arith.truncf %315 : vector<5x128xf32> to vector<5x128xbf16>
    %cst_147 = arith.constant dense<0.000000e+00> : vector<5x32xf32>
    %319 = tpu.matmul %318, %317, %cst_147 {dimension_numbers = #tpu.dot_dimension_numbers<[1], [0], [0], [1], [0, 0, 1, 1], [], []>} : vector<5x128xbf16>, vector<128x32xbf16>, vector<5x32xf32> -> vector<5x32xf32>
    %c1_148 = arith.constant 1 : index
    %c0_149 = arith.constant 0 : index
    %c0_150 = arith.constant 0 : index
    %320 = vector.load %arg15[%c1_148, %c0_149, %c0_150] : memref<2x1x32xf32, #tpu.memory_space<vmem>>, vector<1x1x32xf32>
    %321 = vector.shape_cast %320 : vector<1x1x32xf32> to vector<1x32xf32>
    %322 = vector.broadcast %321 : vector<1x32xf32> to vector<5x32xf32>
    %323 = arith.addf %319, %322 : vector<5x32xf32>
    %324 = arith.addf %275, %323 : vector<5x32xf32>
    %c0_151 = arith.constant 0 : index
    %c0_152 = arith.constant 0 : index
    %325 = vector.load %arg16[%c0_151, %c0_152] : memref<1x32xf32, #tpu.memory_space<vmem>>, vector<1x32xf32>
    %c0_153 = arith.constant 0 : index
    %c0_154 = arith.constant 0 : index
    %326 = vector.load %arg17[%c0_153, %c0_154] : memref<1x32xf32, #tpu.memory_space<vmem>>, vector<1x32xf32>
    %cst_155 = arith.constant dense<0.000000e+00> : vector<5xf32>
    %327 = vector.multi_reduction <add>, %324, %cst_155 [1] : vector<5x32xf32> to vector<5xf32>
    %328 = vector.shape_cast %327 : vector<5xf32> to vector<5x1xf32>
    %cst_156 = arith.constant 3.200000e+01 : f32
    %329 = vector.broadcast %cst_156 : f32 to vector<5x1xf32>
    %330 = arith.divf %328, %329 : vector<5x1xf32>
    %331 = vector.broadcast %330 : vector<5x1xf32> to vector<5x32xf32>
    %332 = arith.subf %324, %331 : vector<5x32xf32>
    %333 = arith.mulf %332, %332 : vector<5x32xf32>
    %cst_157 = arith.constant dense<0.000000e+00> : vector<5xf32>
    %334 = vector.multi_reduction <add>, %333, %cst_157 [1] : vector<5x32xf32> to vector<5xf32>
    %335 = vector.shape_cast %334 : vector<5xf32> to vector<5x1xf32>
    %cst_158 = arith.constant 3.200000e+01 : f32
    %336 = vector.broadcast %cst_158 : f32 to vector<5x1xf32>
    %337 = arith.divf %335, %336 : vector<5x1xf32>
    %cst_159 = arith.constant 9.99999997E-7 : f32
    %338 = vector.broadcast %cst_159 : f32 to vector<5x1xf32>
    %339 = arith.addf %337, %338 : vector<5x1xf32>
    %340 = math.rsqrt %339 : vector<5x1xf32>
    %341 = vector.broadcast %340 : vector<5x1xf32> to vector<5x32xf32>
    %342 = arith.mulf %332, %341 : vector<5x32xf32>
    %343 = vector.broadcast %325 : vector<1x32xf32> to vector<5x32xf32>
    %344 = arith.mulf %342, %343 : vector<5x32xf32>
    %345 = vector.broadcast %326 : vector<1x32xf32> to vector<5x32xf32>
    %346 = arith.addf %344, %345 : vector<5x32xf32>
    %347 = vector.extract_strided_slice %346 {offsets = [1, 0], sizes = [4, 32], strides = [1, 1]} : vector<5x32xf32> to vector<4x32xf32>
    %348 = arith.truncf %347 : vector<4x32xf32> to vector<4x32xbf16>
    %c0_160 = arith.constant 0 : index
    %c0_161 = arith.constant 0 : index
    %349 = vector.load %arg18[%c0_160, %c0_161] : memref<32x2048xbf16, #tpu.memory_space<vmem>>, vector<32x2048xbf16>
    %cst_162 = arith.constant dense<0.000000e+00> : vector<4x2048xf32>
    %350 = tpu.matmul %348, %349, %cst_162 {dimension_numbers = #tpu.dot_dimension_numbers<[1], [0], [0], [1], [0, 0, 1, 1], [], []>} : vector<4x32xbf16>, vector<32x2048xbf16>, vector<4x2048xf32> -> vector<4x2048xf32>
    %c0_163 = arith.constant 0 : index
    %c0_164 = arith.constant 0 : index
    %351 = vector.load %arg19[%c0_163, %c0_164] : memref<1x2048xf32, #tpu.memory_space<vmem>>, vector<1x2048xf32>
    %352 = vector.broadcast %351 : vector<1x2048xf32> to vector<4x2048xf32>
    %353 = arith.addf %350, %352 : vector<4x2048xf32>
    %cst_165 = arith.constant 0.000000e+00 : f32
    %354 = vector.broadcast %cst_165 : f32 to vector<4x2048xf32>
    %355 = arith.maximumf %353, %354 : vector<4x2048xf32>
    %356 = arith.truncf %355 : vector<4x2048xf32> to vector<4x2048xbf16>
    %357 = vector.extract_strided_slice %356 {offsets = [0, 0], sizes = [4, 512], strides = [1, 1]} : vector<4x2048xbf16> to vector<4x512xbf16>
    %c0_166 = arith.constant 0 : index
    %c0_167 = arith.constant 0 : index
    %358 = vector.load %arg29[%c0_166, %c0_167] : memref<16x512xbf16, #tpu.memory_space<vmem>>, vector<4x512xbf16>
    tpu.vector_store %arg29[%c0_166, %c0_167], %357 {strides = array<i32>} : memref<16x512xbf16, #tpu.memory_space<vmem>>, vector<4x512xbf16>,
    %359 = vector.extract_strided_slice %356 {offsets = [0, 512], sizes = [4, 512], strides = [1, 1]} : vector<4x2048xbf16> to vector<4x512xbf16>
    %c4 = arith.constant 4 : index
    %c0_168 = arith.constant 0 : index
    %360 = vector.load %arg29[%c4, %c0_168] : memref<16x512xbf16, #tpu.memory_space<vmem>>, vector<4x512xbf16>
    tpu.vector_store %arg29[%c4, %c0_168], %359 {strides = array<i32>} : memref<16x512xbf16, #tpu.memory_space<vmem>>, vector<4x512xbf16>,
    %361 = vector.extract_strided_slice %356 {offsets = [0, 1024], sizes = [4, 512], strides = [1, 1]} : vector<4x2048xbf16> to vector<4x512xbf16>
    %c8 = arith.constant 8 : index
    %c0_169 = arith.constant 0 : index
    %362 = vector.load %arg29[%c8, %c0_169] : memref<16x512xbf16, #tpu.memory_space<vmem>>, vector<4x512xbf16>
    tpu.vector_store %arg29[%c8, %c0_169], %361 {strides = array<i32>} : memref<16x512xbf16, #tpu.memory_space<vmem>>, vector<4x512xbf16>,
    %363 = vector.extract_strided_slice %356 {offsets = [0, 1536], sizes = [4, 512], strides = [1, 1]} : vector<4x2048xbf16> to vector<4x512xbf16>
    %c12 = arith.constant 12 : index
    %c0_170 = arith.constant 0 : index
    %364 = vector.load %arg29[%c12, %c0_170] : memref<16x512xbf16, #tpu.memory_space<vmem>>, vector<4x512xbf16>
    tpu.vector_store %arg29[%c12, %c0_170], %363 {strides = array<i32>} : memref<16x512xbf16, #tpu.memory_space<vmem>>, vector<4x512xbf16>,
    %c0_171 = arith.constant 0 : index
    %c0_172 = arith.constant 0 : index
    %365 = vector.load %arg29[%c0_171, %c0_172] : memref<16x512xbf16, #tpu.memory_space<vmem>>, vector<16x512xbf16>
    %c0_173 = arith.constant 0 : index
    %c0_174 = arith.constant 0 : index
    %366 = vector.load %arg20[%c0_173, %c0_174] : memref<512x1024xbf16, #tpu.memory_space<vmem>>, vector<512x1024xbf16>
    %cst_175 = arith.constant dense<0.000000e+00> : vector<16x1024xf32>
    %367 = tpu.matmul %365, %366, %cst_175 {dimension_numbers = #tpu.dot_dimension_numbers<[1], [0], [0], [1], [0, 0, 1, 1], [], []>} : vector<16x512xbf16>, vector<512x1024xbf16>, vector<16x1024xf32> -> vector<16x1024xf32>
    %c0_176 = arith.constant 0 : index
    %c0_177 = arith.constant 0 : index
    %368 = vector.load %arg21[%c0_176, %c0_177] : memref<1x1024xf32, #tpu.memory_space<vmem>>, vector<1x1024xf32>
    %369 = vector.broadcast %368 : vector<1x1024xf32> to vector<16x1024xf32>
    %370 = arith.addf %367, %369 : vector<16x1024xf32>
    %cst_178 = arith.constant 0.000000e+00 : f32
    %371 = vector.broadcast %cst_178 : f32 to vector<16x1024xf32>
    %372 = arith.maximumf %370, %371 : vector<16x1024xf32>
    %373 = arith.truncf %372 : vector<16x1024xf32> to vector<16x1024xbf16>
    %374 = vector.extract_strided_slice %373 {offsets = [0, 0], sizes = [16, 256], strides = [1, 1]} : vector<16x1024xbf16> to vector<16x256xbf16>
    %c0_179 = arith.constant 0 : index
    %c0_180 = arith.constant 0 : index
    %375 = vector.load %arg30[%c0_179, %c0_180] : memref<64x256xbf16, #tpu.memory_space<vmem>>, vector<16x256xbf16>
    tpu.vector_store %arg30[%c0_179, %c0_180], %374 {strides = array<i32>} : memref<64x256xbf16, #tpu.memory_space<vmem>>, vector<16x256xbf16>,
    %376 = vector.extract_strided_slice %373 {offsets = [0, 256], sizes = [16, 256], strides = [1, 1]} : vector<16x1024xbf16> to vector<16x256xbf16>
    %c16 = arith.constant 16 : index
    %c0_181 = arith.constant 0 : index
    %377 = vector.load %arg30[%c16, %c0_181] : memref<64x256xbf16, #tpu.memory_space<vmem>>, vector<16x256xbf16>
    tpu.vector_store %arg30[%c16, %c0_181], %376 {strides = array<i32>} : memref<64x256xbf16, #tpu.memory_space<vmem>>, vector<16x256xbf16>,
    %378 = vector.extract_strided_slice %373 {offsets = [0, 512], sizes = [16, 256], strides = [1, 1]} : vector<16x1024xbf16> to vector<16x256xbf16>
    %c32 = arith.constant 32 : index
    %c0_182 = arith.constant 0 : index
    %379 = vector.load %arg30[%c32, %c0_182] : memref<64x256xbf16, #tpu.memory_space<vmem>>, vector<16x256xbf16>
    tpu.vector_store %arg30[%c32, %c0_182], %378 {strides = array<i32>} : memref<64x256xbf16, #tpu.memory_space<vmem>>, vector<16x256xbf16>,
    %380 = vector.extract_strided_slice %373 {offsets = [0, 768], sizes = [16, 256], strides = [1, 1]} : vector<16x1024xbf16> to vector<16x256xbf16>
    %c48 = arith.constant 48 : index
    %c0_183 = arith.constant 0 : index
    %381 = vector.load %arg30[%c48, %c0_183] : memref<64x256xbf16, #tpu.memory_space<vmem>>, vector<16x256xbf16>
    tpu.vector_store %arg30[%c48, %c0_183], %380 {strides = array<i32>} : memref<64x256xbf16, #tpu.memory_space<vmem>>, vector<16x256xbf16>,
    %c0_184 = arith.constant 0 : index
    %c0_185 = arith.constant 0 : index
    %382 = vector.load %arg30[%c0_184, %c0_185] : memref<64x256xbf16, #tpu.memory_space<vmem>>, vector<64x256xbf16>
    %c0_186 = arith.constant 0 : index
    %c0_187 = arith.constant 0 : index
    %383 = vector.load %arg22[%c0_186, %c0_187] : memref<256x512xbf16, #tpu.memory_space<vmem>>, vector<256x512xbf16>
    %cst_188 = arith.constant dense<0.000000e+00> : vector<64x512xf32>
    %384 = tpu.matmul %382, %383, %cst_188 {dimension_numbers = #tpu.dot_dimension_numbers<[1], [0], [0], [1], [0, 0, 1, 1], [], []>} : vector<64x256xbf16>, vector<256x512xbf16>, vector<64x512xf32> -> vector<64x512xf32>
    %c0_189 = arith.constant 0 : index
    %c0_190 = arith.constant 0 : index
    %385 = vector.load %arg23[%c0_189, %c0_190] : memref<1x512xf32, #tpu.memory_space<vmem>>, vector<1x512xf32>
    %386 = vector.broadcast %385 : vector<1x512xf32> to vector<64x512xf32>
    %387 = arith.addf %384, %386 : vector<64x512xf32>
    %cst_191 = arith.constant 0.000000e+00 : f32
    %388 = vector.broadcast %cst_191 : f32 to vector<64x512xf32>
    %389 = arith.maximumf %387, %388 : vector<64x512xf32>
    %390 = arith.truncf %389 : vector<64x512xf32> to vector<64x512xbf16>
    %391 = vector.extract_strided_slice %390 {offsets = [0, 0], sizes = [64, 128], strides = [1, 1]} : vector<64x512xbf16> to vector<64x128xbf16>
    %c0_192 = arith.constant 0 : index
    %c0_193 = arith.constant 0 : index
    %392 = vector.load %arg31[%c0_192, %c0_193] : memref<256x128xbf16, #tpu.memory_space<vmem>>, vector<64x128xbf16>
    tpu.vector_store %arg31[%c0_192, %c0_193], %391 {strides = array<i32>} : memref<256x128xbf16, #tpu.memory_space<vmem>>, vector<64x128xbf16>,
    %393 = vector.extract_strided_slice %390 {offsets = [0, 128], sizes = [64, 128], strides = [1, 1]} : vector<64x512xbf16> to vector<64x128xbf16>
    %c64 = arith.constant 64 : index
    %c0_194 = arith.constant 0 : index
    %394 = vector.load %arg31[%c64, %c0_194] : memref<256x128xbf16, #tpu.memory_space<vmem>>, vector<64x128xbf16>
    tpu.vector_store %arg31[%c64, %c0_194], %393 {strides = array<i32>} : memref<256x128xbf16, #tpu.memory_space<vmem>>, vector<64x128xbf16>,
    %395 = vector.extract_strided_slice %390 {offsets = [0, 256], sizes = [64, 128], strides = [1, 1]} : vector<64x512xbf16> to vector<64x128xbf16>
    %c128 = arith.constant 128 : index
    %c0_195 = arith.constant 0 : index
    %396 = vector.load %arg31[%c128, %c0_195] : memref<256x128xbf16, #tpu.memory_space<vmem>>, vector<64x128xbf16>
    tpu.vector_store %arg31[%c128, %c0_195], %395 {strides = array<i32>} : memref<256x128xbf16, #tpu.memory_space<vmem>>, vector<64x128xbf16>,
    %397 = vector.extract_strided_slice %390 {offsets = [0, 384], sizes = [64, 128], strides = [1, 1]} : vector<64x512xbf16> to vector<64x128xbf16>
    %c192 = arith.constant 192 : index
    %c0_196 = arith.constant 0 : index
    %398 = vector.load %arg31[%c192, %c0_196] : memref<256x128xbf16, #tpu.memory_space<vmem>>, vector<64x128xbf16>
    tpu.vector_store %arg31[%c192, %c0_196], %397 {strides = array<i32>} : memref<256x128xbf16, #tpu.memory_space<vmem>>, vector<64x128xbf16>,
    %c0_197 = arith.constant 0 : index
    %c0_198 = arith.constant 0 : index
    %399 = vector.load %arg31[%c0_197, %c0_198] : memref<256x128xbf16, #tpu.memory_space<vmem>>, vector<256x128xbf16>
    %c0_199 = arith.constant 0 : index
    %c0_200 = arith.constant 0 : index
    %400 = vector.load %arg24[%c0_199, %c0_200] : memref<128x256xbf16, #tpu.memory_space<vmem>>, vector<128x256xbf16>
    %cst_201 = arith.constant dense<0.000000e+00> : vector<256x256xf32>
    %401 = tpu.matmul %399, %400, %cst_201 {dimension_numbers = #tpu.dot_dimension_numbers<[1], [0], [0], [1], [0, 0, 1, 1], [], []>} : vector<256x128xbf16>, vector<128x256xbf16>, vector<256x256xf32> -> vector<256x256xf32>
    %c0_202 = arith.constant 0 : index
    %c0_203 = arith.constant 0 : index
    %402 = vector.load %arg25[%c0_202, %c0_203] : memref<1x256xf32, #tpu.memory_space<vmem>>, vector<1x256xf32>
    %403 = vector.broadcast %402 : vector<1x256xf32> to vector<256x256xf32>
    %404 = arith.addf %401, %403 : vector<256x256xf32>
    %cst_204 = arith.constant 0.000000e+00 : f32
    %405 = vector.broadcast %cst_204 : f32 to vector<256x256xf32>
    %406 = arith.maximumf %404, %405 : vector<256x256xf32>
    %407 = arith.truncf %406 : vector<256x256xf32> to vector<256x256xbf16>
    %c0_205 = arith.constant 0 : index
    %c0_206 = arith.constant 0 : index
    %408 = vector.load %arg26[%c0_205, %c0_206] : memref<4x256xbf16, #tpu.memory_space<vmem>>, vector<4x256xbf16>
    %cst_207 = arith.constant dense<0.000000e+00> : vector<4x256xf32>
    %409 = tpu.matmul %408, %407, %cst_207 {dimension_numbers = #tpu.dot_dimension_numbers<[1], [1], [0], [0], [0, 0, 1, 0], [], []>} : vector<4x256xbf16>, vector<256x256xbf16>, vector<4x256xf32> -> vector<4x256xf32>
    %c0_208 = arith.constant 0 : index
    %c0_209 = arith.constant 0 : index
    %410 = vector.load %arg27[%c0_208, %c0_209] : memref<1x1xf32, #tpu.memory_space<vmem>>, vector<1x1xf32>
    %411 = vector.broadcast %410 : vector<1x1xf32> to vector<4x256xf32>
    %412 = arith.addf %409, %411 : vector<4x256xf32>
    %c0_210 = arith.constant 0 : index
    %c0_211 = arith.constant 0 : index
    %c0_212 = arith.constant 0 : index
    %413 = vector.load %arg28[%c0_210, %c0_211, %c0_212] : memref<1x4x256xf32, #tpu.memory_space<vmem>>, vector<1x4x256xf32>
    %414 = vector.shape_cast %413 : vector<1x4x256xf32> to vector<4x256xf32>
    %415 = vector.shape_cast %412 : vector<4x256xf32> to vector<1x4x256xf32>
    tpu.vector_store %arg28[%c0_210, %c0_211, %c0_212], %415 {strides = array<i32>} : memref<1x4x256xf32, #tpu.memory_space<vmem>>, vector<1x4x256xf32>,
    return
  }
  func.func @transform_0(%arg0: i32) -> (i32, i32, i32) {
    %c0_i32 = arith.constant 0 : i32
    %c0_i32_0 = arith.constant 0 : i32
    %c0_i32_1 = arith.constant 0 : i32
    return %arg0, %c0_i32, %c0_i32_0 : i32, i32, i32
  }
  func.func @transform_1(%arg0: i32) -> (i32, i32) {
    %c0_i32 = arith.constant 0 : i32
    %c0_i32_0 = arith.constant 0 : i32
    %c0_i32_1 = arith.constant 0 : i32
    return %c0_i32, %c0_i32_0 : i32, i32
  }
  func.func @transform_2(%arg0: i32) -> (i32, i32) {
    %c0_i32 = arith.constant 0 : i32
    %c0_i32_0 = arith.constant 0 : i32
    %c0_i32_1 = arith.constant 0 : i32
    return %c0_i32, %c0_i32_0 : i32, i32
  }
  func.func @transform_3(%arg0: i32) -> (i32, i32, i32) {
    %c0_i32 = arith.constant 0 : i32
    %c0_i32_0 = arith.constant 0 : i32
    %c0_i32_1 = arith.constant 0 : i32
    %c0_i32_2 = arith.constant 0 : i32
    return %c0_i32, %c0_i32_0, %c0_i32_1 : i32, i32, i32
  }
  func.func @transform_4(%arg0: i32) -> (i32, i32, i32) {
    %c0_i32 = arith.constant 0 : i32
    %c0_i32_0 = arith.constant 0 : i32
    %c0_i32_1 = arith.constant 0 : i32
    %c0_i32_2 = arith.constant 0 : i32
    return %c0_i32, %c0_i32_0, %c0_i32_1 : i32, i32, i32
  }
  func.func @transform_5(%arg0: i32) -> (i32, i32, i32) {
    %c0_i32 = arith.constant 0 : i32
    %c0_i32_0 = arith.constant 0 : i32
    %c0_i32_1 = arith.constant 0 : i32
    %c0_i32_2 = arith.constant 0 : i32
    return %c0_i32, %c0_i32_0, %c0_i32_1 : i32, i32, i32
  }
  func.func @transform_6(%arg0: i32) -> (i32, i32, i32) {
    %c0_i32 = arith.constant 0 : i32
    %c0_i32_0 = arith.constant 0 : i32
    %c0_i32_1 = arith.constant 0 : i32
    %c0_i32_2 = arith.constant 0 : i32
    return %c0_i32, %c0_i32_0, %c0_i32_1 : i32, i32, i32
  }
  func.func @transform_7(%arg0: i32) -> (i32, i32, i32) {
    %c0_i32 = arith.constant 0 : i32
    %c0_i32_0 = arith.constant 0 : i32
    %c0_i32_1 = arith.constant 0 : i32
    %c0_i32_2 = arith.constant 0 : i32
    return %c0_i32, %c0_i32_0, %c0_i32_1 : i32, i32, i32
  }
  func.func @transform_8(%arg0: i32) -> (i32, i32, i32) {
    %c0_i32 = arith.constant 0 : i32
    %c0_i32_0 = arith.constant 0 : i32
    %c0_i32_1 = arith.constant 0 : i32
    %c0_i32_2 = arith.constant 0 : i32
    return %c0_i32, %c0_i32_0, %c0_i32_1 : i32, i32, i32
  }
  func.func @transform_9(%arg0: i32) -> (i32, i32, i32) {
    %c0_i32 = arith.constant 0 : i32
    %c0_i32_0 = arith.constant 0 : i32
    %c0_i32_1 = arith.constant 0 : i32
    %c0_i32_2 = arith.constant 0 : i32
    return %c0_i32, %c0_i32_0, %c0_i32_1 : i32, i32, i32
  }
  func.func @transform_10(%arg0: i32) -> (i32, i32, i32) {
    %c0_i32 = arith.constant 0 : i32
    %c0_i32_0 = arith.constant 0 : i32
    %c0_i32_1 = arith.constant 0 : i32
    %c0_i32_2 = arith.constant 0 : i32
    return %c0_i32, %c0_i32_0, %c0_i32_1 : i32, i32, i32
  }
  func.func @transform_11(%arg0: i32) -> (i32, i32, i32) {
    %c0_i32 = arith.constant 0 : i32
    %c0_i32_0 = arith.constant 0 : i32
    %c0_i32_1 = arith.constant 0 : i32
    %c0_i32_2 = arith.constant 0 : i32
    return %c0_i32, %c0_i32_0, %c0_i32_1 : i32, i32, i32
  }
  func.func @transform_12(%arg0: i32) -> (i32, i32, i32) {
    %c0_i32 = arith.constant 0 : i32
    %c0_i32_0 = arith.constant 0 : i32
    %c0_i32_1 = arith.constant 0 : i32
    %c0_i32_2 = arith.constant 0 : i32
    return %c0_i32, %c0_i32_0, %c0_i32_1 : i32, i32, i32
  }
  func.func @transform_13(%arg0: i32) -> (i32, i32, i32) {
    %c0_i32 = arith.constant 0 : i32
    %c0_i32_0 = arith.constant 0 : i32
    %c0_i32_1 = arith.constant 0 : i32
    %c0_i32_2 = arith.constant 0 : i32
    return %c0_i32, %c0_i32_0, %c0_i32_1 : i32, i32, i32
  }
  func.func @transform_14(%arg0: i32) -> (i32, i32, i32) {
    %c0_i32 = arith.constant 0 : i32
    %c0_i32_0 = arith.constant 0 : i32
    %c0_i32_1 = arith.constant 0 : i32
    %c0_i32_2 = arith.constant 0 : i32
    return %c0_i32, %c0_i32_0, %c0_i32_1 : i32, i32, i32
  }
  func.func @transform_15(%arg0: i32) -> (i32, i32) {
    %c0_i32 = arith.constant 0 : i32
    %c0_i32_0 = arith.constant 0 : i32
    %c0_i32_1 = arith.constant 0 : i32
    return %c0_i32, %c0_i32_0 : i32, i32
  }
  func.func @transform_16(%arg0: i32) -> (i32, i32) {
    %c0_i32 = arith.constant 0 : i32
    %c0_i32_0 = arith.constant 0 : i32
    %c0_i32_1 = arith.constant 0 : i32
    return %c0_i32, %c0_i32_0 : i32, i32
  }
  func.func @transform_17(%arg0: i32) -> (i32, i32) {
    %c0_i32 = arith.constant 0 : i32
    %c0_i32_0 = arith.constant 0 : i32
    %c0_i32_1 = arith.constant 0 : i32
    return %c0_i32, %c0_i32_0 : i32, i32
  }
  func.func @transform_18(%arg0: i32) -> (i32, i32) {
    %c0_i32 = arith.constant 0 : i32
    %c0_i32_0 = arith.constant 0 : i32
    %c0_i32_1 = arith.constant 0 : i32
    return %c0_i32, %c0_i32_0 : i32, i32
  }
  func.func @transform_19(%arg0: i32) -> (i32, i32) {
    %c0_i32 = arith.constant 0 : i32
    %c0_i32_0 = arith.constant 0 : i32
    %c0_i32_1 = arith.constant 0 : i32
    return %c0_i32, %c0_i32_0 : i32, i32
  }
  func.func @transform_20(%arg0: i32) -> (i32, i32) {
    %c0_i32 = arith.constant 0 : i32
    %c0_i32_0 = arith.constant 0 : i32
    %c0_i32_1 = arith.constant 0 : i32
    return %c0_i32, %c0_i32_0 : i32, i32
  }
  func.func @transform_21(%arg0: i32) -> (i32, i32) {
    %c0_i32 = arith.constant 0 : i32
    %c0_i32_0 = arith.constant 0 : i32
    %c0_i32_1 = arith.constant 0 : i32
    return %c0_i32, %c0_i32_0 : i32, i32
  }
  func.func @transform_22(%arg0: i32) -> (i32, i32) {
    %c0_i32 = arith.constant 0 : i32
    %c0_i32_0 = arith.constant 0 : i32
    %c0_i32_1 = arith.constant 0 : i32
    return %c0_i32, %c0_i32_0 : i32, i32
  }
  func.func @transform_23(%arg0: i32) -> (i32, i32) {
    %c0_i32 = arith.constant 0 : i32
    %c0_i32_0 = arith.constant 0 : i32
    %c0_i32_1 = arith.constant 0 : i32
    return %c0_i32, %c0_i32_0 : i32, i32
  }
  func.func @transform_24(%arg0: i32) -> (i32, i32) {
    %c0_i32 = arith.constant 0 : i32
    %c0_i32_0 = arith.constant 0 : i32
    %c0_i32_1 = arith.constant 0 : i32
    return %c0_i32, %c0_i32_0 : i32, i32
  }
  func.func @transform_25(%arg0: i32) -> (i32, i32) {
    %c0_i32 = arith.constant 0 : i32
    %c0_i32_0 = arith.constant 0 : i32
    %c0_i32_1 = arith.constant 0 : i32
    return %c0_i32, %c0_i32_0 : i32, i32
  }
  func.func @transform_26(%arg0: i32) -> (i32, i32) {
    %c0_i32 = arith.constant 0 : i32
    %c0_i32_0 = arith.constant 0 : i32
    %c0_i32_1 = arith.constant 0 : i32
    return %c0_i32, %c0_i32_0 : i32, i32
  }
  func.func @transform_27(%arg0: i32) -> (i32, i32, i32) {
    %c0_i32 = arith.constant 0 : i32
    %c0_i32_0 = arith.constant 0 : i32
    %c0_i32_1 = arith.constant 0 : i32
    return %arg0, %c0_i32, %c0_i32_0 : i32, i32, i32
  }
}

</mosaic_0001>

<bundles_post_ra>
// kernel: vit_forward.1
= control target key start
LH: loop header
LB: loop body
LE: loop exit
PB: predicated region body
PF: predicated region fallthrough
CT: control target
= control target key end

     0   :  { %s10651_s0 = inlined_call_operand.vmem [shape: f32[2,5,768], index: 0, kind: input, shape index: {}]   ;;  %s10652_s1 = inlined_call_operand.vmem [shape: bf16[768,32], index: 1, kind: input, shape index: {}]   ;;  %s10653_s2 = inlined_call_operand.vmem [shape: f32[5,32], index: 2, kind: input, shape index: {}]   ;;  %s10654_s3 = inlined_call_operand.vmem [shape: f32[2,1,32], index: 3, kind: input, shape index: {}]   ;;  %s10655_s4 = inlined_call_operand.vmem [shape: f32[2,1,32], index: 4, kind: input, shape index: {}]   ;;  %s10656_s5 = inlined_call_operand.vmem [shape: bf16[2,32,96], index: 5, kind: input, shape index: {}]   ;;  %s10657_s6 = inlined_call_operand.vmem [shape: f32[2,1,96], index: 6, kind: input, shape index: {}]   ;;  %s10658_s7 = inlined_call_operand.vmem [shape: bf16[2,32,32], index: 7, kind: input, shape index: {}]   ;;  %s10659_s8 = inlined_call_operand.vmem [shape: f32[2,1,32], index: 8, kind: input, shape index: {}]   ;;  %s10660_s9 = inlined_call_operand.vmem [shape: f32[2,1,32], index: 9, kind: input, shape index: {}]   ;;  %s10661_s10 = inlined_call_operand.vmem [shape: f32[2,1,32], index: 10, kind: input, shape index: {}]   ;;  %s10662_s11 = inlined_call_operand.vmem [shape: bf16[2,32,128], index: 11, kind: input, shape index: {}]   ;;  %s10663_s12 = inlined_call_operand.vmem [shape: f32[2,1,128], index: 12, kind: input, shape index: {}]   ;;  %s10664_s13 = inlined_call_operand.vmem [shape: bf16[2,128,32], index: 13, kind: input, shape index: {}]   ;;  %s10665_s14 = inlined_call_operand.vmem [shape: f32[2,1,32], index: 14, kind: input, shape index: {}]   ;;  %s10666_s15 = inlined_call_operand.vmem [shape: f32[1,32], index: 15, kind: input, shape index: {}]   ;;  %s10667_s16 = inlined_call_operand.vmem [shape: f32[1,32], index: 16, kind: input, shape index: {}]   ;;  %s10668_s17 = inlined_call_operand.vmem [shape: bf16[32,2048], index: 17, kind: input, shape index: {}]   ;;  %s10669_s18 = inlined_call_operand.vmem [shape: f32[1,2048], index: 18, kind: input, shape index: {}]   ;;  %s10670_s19 = inlined_call_operand.vmem [shape: bf16[512,1024], index: 19, kind: input, shape index: {}]   ;;  %s10671_s20 = inlined_call_operand.vmem [shape: f32[1,1024], index: 20, kind: input, shape index: {}]   ;;  %s10672_s21 = inlined_call_operand.vmem [shape: bf16[256,512], index: 21, kind: input, shape index: {}]   ;;  %s10673_s22 = inlined_call_operand.vmem [shape: f32[1,512], index: 22, kind: input, shape index: {}]   ;;  %s10674_s23 = inlined_call_operand.vmem [shape: bf16[128,256], index: 23, kind: input, shape index: {}]   ;;  %s10675_s24 = inlined_call_operand.vmem [shape: f32[1,256], index: 24, kind: input, shape index: {}]   ;;  %s10676_s25 = inlined_call_operand.vmem [shape: bf16[4,256], index: 25, kind: input, shape index: {}]   ;;  %s10677_s26 = inlined_call_operand.<no memory space> [shape: f32[1,1], index: 26, kind: input, shape index: {}]   ;;  %s10678_s27 = inlined_call_operand.vmem [shape: f32[2,4,256], index: 27, kind: output, shape index: {}]  }
   0x1   :  { %10708 = sst [smem:[#allocation7_spill]] %s10651_s0  ;;  %v32_v0 = vstv %s10677_s26 }
   0x2   :  { %10709 = sst [smem:[#allocation8_spill]] %s10652_s1  ;;  %33 = vst [vmem:[#allocation5] sm:$0x1] %v32_v0 }
   0x3   :  { %10710 = sst [smem:[#allocation9_spill]] %s10653_s2 }
   0x4   :  { %10711 = sst [smem:[#allocation10_spill]] %s10654_s3 }
   0x5   :  { %10712 = sst [smem:[#allocation11_spill]] %s10655_s4 }
   0x6   :  { %10713 = sst [smem:[#allocation12_spill]] %s10656_s5 }
   0x7   :  { %10714 = sst [smem:[#allocation13_spill]] %s10657_s6 }
   0x8   :  { %10715 = sst [smem:[#allocation14_spill]] %s10658_s7 }
   0x9   :  { %10716 = sst [smem:[#allocation15_spill]] %s10659_s8  ;;  %s8651_s8 = smov 0  }
   0xa   :  { %10717 = sst [smem:[#allocation16_spill]] %s10660_s9 }
   0xb   :  { %10718 = sst [smem:[#allocation17_spill]] %s10661_s10 }
   0xc   :  { %10719 = sst [smem:[#allocation18_spill]] %s10662_s11 }
   0xd   :  { %10720 = sst [smem:[#allocation19_spill]] %s10678_s27 }
   0xe LB: > { %10721 = sst [smem:[#allocation6_spill]] %s8489_s8  ;;  %s7322_s30 = sadd.s32 4294967295, %s8489_s8   ;;  %s8489_s8 = sphi %s8651_s8, %s39_s8  }
   0xf   : > { %p7326_p0 = scmp.ge.s32.totalorder %s8489_s8, 1  ;;  %p739_p1 = scmp.lt.s32.totalorder %s8489_s8, 3 }
  0x11   : > { %p740_p2 = pnand %p7326_p0, %p739_p1 }
  0x12   : > { %s10722_s28 = sld [smem:[#allocation8_spill]] (!%p740_p2)  ;;  %p811_p3 = scmp.lt.s32.totalorder (!%p740_p2), %s7322_s30, 1  ;;  %vm1341_vm0 = vcmask (!%p740_p2), 258048   ;;  %vm8492_vm1 = vmmov (!%p740_p2), 0   ;;  %vm1394_vm2 = vcmask (!%p740_p2), 261120   ;;  %vm1442_vm3 = vcmask (!%p740_p2), 64512  }
  0x13   : > { %743 = sbr.rel (%p740_p2) target bundleno = 10204 (0x27dc), region = 128  ;;  %s10723_s2 = sld [smem:[#allocation7_spill]] (!%p740_p2)  ;;  %vm1536_vm4 = vcmask (!%p740_p2), 1044480   ;;  %vm1518_vm5 = vcmask (!%p740_p2), 36864   ;;  %vm1532_vm6 = vcmask (!%p740_p2), 39936   ;;  %vm2120_vm7 = vcmask (!%p740_p2), 130048  }
  0x14   : > { %s10725_s10 = sld [smem:[#allocation12_spill]] (!%p740_p2)  ;;  %s10727_s5 = sld [smem:[#allocation11_spill]] (!%p740_p2)  ;;  %vm2122_vm8 = vcmask (!%p740_p2), 195584  }
  0x15   : > { %s10702_s0 = smov (!%p740_p2), 64   ;;  %s10701_s29 = smov (!%p740_p2), 96  }
  0x16   : > { %s10700_s1 = smov (!%p740_p2), 88   ;;  %s10698_s6 = smov (!%p740_p2), 120  }
  0x17   : > { %s10697_s11 = smov (!%p740_p2), 56   ;;  %s10696_s4 = smov (!%p740_p2), 80  }
  0x18   : > { %v8241_v1 = vld [vmem:[%s10722_s28 + $0x40] sm:$0xff] (!%p740_p2)   ;;  %v8245_v5 = vld [vmem:[%s10722_s28 + $0x48] sm:$0xff] (!%p740_p2)   ;;  %v8249_v9 = vld [vmem:[%s10722_s28 + $0x50] sm:$0xff] (!%p740_p2)   ;;  %s10692_s9 = smov (!%p740_p2), 112   ;;  %s10691_s26 = smov (!%p740_p2), 48  }
  0x19   : > { %v8242_v2 = vld [vmem:[%s10722_s28] sm:$0xff] (!%p740_p2)   ;;  %7879 = vmatprep.subr.bf16.mxu0 (!%p740_p2), %v8241_v1  ;;  %v8246_v6 = vld [vmem:[%s10722_s28 + $0x8] sm:$0xff] (!%p740_p2)   ;;  %v8250_v10 = vld [vmem:[%s10722_s28 + $0x10] sm:$0xff] (!%p740_p2)   ;;  %s10734_s8 = smov (!%p740_p2), 64   ;;  %s10736_s27 = smov (!%p740_p2), 88  }
  0x1a   : > { %v8243_v3 = vld [vmem:[%s10722_s28 + $0xc0] sm:$0xff]   ;;  %7880 = vmatpush3.bf16.msra.mxu0 %v8242_v2  ;;  %v8247_v7 = vld [vmem:[%s10722_s28 + $0xc8] sm:$0xff]   ;;  %v8251_v11 = vld [vmem:[%s10722_s28 + $0xd0] sm:$0xff]   ;;  %s10751_s30 = smov (!%p811_p3, %s7322_s30), 1 }
  0x1b   : > { %v8244_v4 = vld [vmem:[%s10722_s28 + $0x80] sm:$0xff]   ;;  %7901 = vmatprep.subr.bf16.mxu1 %v8243_v3  ;;  %7881 = vmatprep.subr.bf16.mxu0 %v8245_v5  ;;  %v8248_v8 = vld [vmem:[%s10722_s28 + $0x88] sm:$0xff]   ;;  %v8252_v12 = vld [vmem:[%s10722_s28 + $0x90] sm:$0xff]   ;;  %s8213_s7 = smul.u32 48, %s10751_s30 }
  0x1c   : > { %7902 = vmatpush3.bf16.msra.mxu1 %v8244_v4  ;;  %v8253_v13 = vld [vmem:[%s10722_s28 + $0x58] sm:$0xff]   ;;  %v8257_v17 = vld [vmem:[%s10722_s28 + $0x60] sm:$0xff]   ;;  %v8261_v21 = vld [vmem:[%s10722_s28 + $0x68] sm:$0xff]  }
  0x1d   : > { %7903 = vmatprep.subr.bf16.mxu1 %v8247_v7  ;;  %v8254_v14 = vld [vmem:[%s10722_s28 + $0x18] sm:$0xff]   ;;  %v8258_v18 = vld [vmem:[%s10722_s28 + $0x20] sm:$0xff]   ;;  %v8262_v22 = vld [vmem:[%s10722_s28 + $0x28] sm:$0xff]   ;;  %s8756_s3 = scalar_lea.vmem %s10723_s2, %s8213_s7  ;;  %s10724_s7 = sld [smem:[#allocation9_spill]] }
  0x1e   : > { %7882 = vmatpush3.bf16.msra.mxu0 %v8246_v6  ;;  %v8255_v15 = vld [vmem:[%s10722_s28 + $0xd8] sm:$0xff]   ;;  %v8259_v19 = vld [vmem:[%s10722_s28 + $0xe0] sm:$0xff]   ;;  %v8263_v23 = vld [vmem:[%s10722_s28 + $0xe8] sm:$0xff]   ;;  %s10726_s2 = sld [smem:[#allocation10_spill]] }
  0x1f   : > { %7883 = vmatprep.subr.bf16.mxu0 %v8249_v9  ;;  %v8256_v16 = vld [vmem:[%s10722_s28 + $0x98] sm:$0xff]   ;;  %v8260_v20 = vld [vmem:[%s10722_s28 + $0xa0] sm:$0xff]   ;;  %v8264_v24 = vld [vmem:[%s10722_s28 + $0xa8] sm:$0xff]  }
  0x20   : > { %7904 = vmatpush3.bf16.msra.mxu1 %v8248_v8  ;;  %v8265_v25 = vld [vmem:[%s10722_s28 + $0x70] sm:$0xff]   ;;  %v8269_v29 = vld [vmem:[%s10722_s28 + $0x78] sm:$0xff]   ;;  %v823_v32 = vld [vmem:[%s8756_s3 + $0x8] sm:$0x1f] }
  0x21   : > { %7905 = vmatprep.subr.bf16.mxu1 %v8251_v11  ;;  %v8266_v26 = vld [vmem:[%s10722_s28 + $0x30] sm:$0xff]   ;;  %v8270_v30 = vld [vmem:[%s10722_s28 + $0x38] sm:$0xff]   ;;  %v925_v33 = vpack.c.bf16 %v823_v32, %v823_v32  ;;  %v822_v35 = vld [vmem:[%s8756_s3] sm:$0x1f] }
  0x22   : > { %7884 = vmatpush3.bf16.msra.mxu0 %v8250_v10  ;;  %v8267_v27 = vld [vmem:[%s10722_s28 + $0xf0] sm:$0xff]   ;;  %v8271_v31 = vld [vmem:[%s10722_s28 + $0xf8] sm:$0xff]   ;;  %v924_v36 = vpack.c.bf16 %v822_v35, %v822_v35  ;;  %v8273_v37 = vld [vmem:[%s10722_s28 + $0x140] sm:$0xff]  }
  0x23   : > { %7885 = vmatprep.subr.bf16.mxu0 %v8253_v13  ;;  %v8268_v28 = vld [vmem:[%s10722_s28 + $0xb0] sm:$0xff]   ;;  %v8272_v34 = vld [vmem:[%s10722_s28 + $0xb8] sm:$0xff]   ;;  %1251 = vmatprep.mubr.bf16.mxu0 %v925_v33  ;;  %v8274_v40 = vld [vmem:[%s10722_s28 + $0x100] sm:$0xff]  }
  0x24   : > { %7906 = vmatpush3.bf16.msra.mxu1 %v8252_v12  ;;  %v825_v38 = vld [vmem:[%s8756_s3 + $0x18] sm:$0x1f]  ;;  %v824_v41 = vld [vmem:[%s8756_s3 + $0x10] sm:$0x1f]  ;;  %v8275_v43 = vld [vmem:[%s10722_s28 + $0x148] sm:$0xff]  }
  0x25   : > { %7907 = vmatprep.subr.bf16.mxu1 %v8255_v15  ;;  %v927_v39 = vpack.c.bf16 %v825_v38, %v825_v38  ;;  %v926_v42 = vpack.c.bf16 %v824_v41, %v824_v41  ;;  %v8276_v44 = vld [vmem:[%s10722_s28 + $0x108] sm:$0xff]   ;;  %v8277_v45 = vld [vmem:[%s10722_s28 + $0x150] sm:$0xff]   ;;  %v8279_v47 = vld [vmem:[%s10722_s28 + $0x158] sm:$0xff]  }
  0x26   : > { %7886 = vmatpush3.bf16.msra.mxu0 %v8254_v14  ;;  %v8278_v46 = vld [vmem:[%s10722_s28 + $0x110] sm:$0xff]   ;;  %v8280_v48 = vld [vmem:[%s10722_s28 + $0x118] sm:$0xff]   ;;  %v8281_v49 = vld [vmem:[%s10722_s28 + $0x160] sm:$0xff]  }
  0x27   : > { %7887 = vmatprep.subr.bf16.mxu0 %v8257_v17  ;;  %1291 = vmatprep.mubr.bf16.mxu1 %v927_v39  ;;  %v8282_v50 = vld [vmem:[%s10722_s28 + $0x120] sm:$0xff]   ;;  %v8283_v51 = vld [vmem:[%s10722_s28 + $0x168] sm:$0xff]   ;;  %v8285_v55 = vld [vmem:[%s10722_s28 + $0x170] sm:$0xff]  }
  0x28   : > { %7908 = vmatpush3.bf16.msra.mxu1 %v8256_v16  ;;  %v827_v52 = vld [vmem:[%s8756_s3 + $0x28] sm:$0x1f]  ;;  %v8286_v56 = vld [vmem:[%s10722_s28 + $0x130] sm:$0xff]   ;;  %v8287_v57 = vld [vmem:[%s10722_s28 + $0x178] sm:$0xff]  }
  0x29   : > { %7909 = vmatprep.subr.bf16.mxu1 %v8259_v19  ;;  %v8284_v53 = vld [vmem:[%s10722_s28 + $0x128] sm:$0xff]   ;;  %v929_v54 = vpack.c.bf16 %v827_v52, %v827_v52  ;;  %v8288_v58 = vld [vmem:[%s10722_s28 + $0x138] sm:$0xff]   ;;  %v826_v59 = vld [vmem:[%s8756_s3 + $0x20] sm:$0x1f]  ;;  %s10728_s3 = sld [smem:[#allocation13_spill]]  ;;  %s10732_s28 = sld [smem:[#allocation16_spill]] }
  0x2a   : > { %7888 = vmatpush3.bf16.msra.mxu0 %v8258_v18  ;;  %v928_v60 = vpack.c.bf16 %v826_v59, %v826_v59  ;;  %v930_v62 = vld [vmem:[%s10724_s7] sm:$0x1f]  ;;  %s10689_s7 = smov 72  }
  0x2b   : > { %7889 = vmatprep.subr.bf16.mxu0 %v8261_v21 }
  0x2c   : > { %7910 = vmatpush3.bf16.msra.mxu1 %v8260_v20 }
  0x2d   : > { %7911 = vmatprep.subr.bf16.mxu1 %v8263_v23  ;;  %v8491_v23 = vmov 0.0  }
  0x2e   : > { %7890 = vmatpush3.bf16.msra.mxu0 %v8262_v22  ;;  %v8289_v22 = vld [vmem:[%s10725_s10] sm:$0xff]  }
  0x2f   : > { %7891 = vmatprep.subr.bf16.mxu0 %v8265_v25  ;;  %v7380_v35 = vld [vmem:[%s10728_s3] ss:$0 sm:$0xff] }
  0x30   : > { %7912 = vmatpush3.bf16.msra.mxu1 %v8264_v24  ;;  %v8290_v24 = vld [vmem:[%s10725_s10 + $0x8] sm:$0xff]  }
  0x31   : > { %7913 = vmatprep.subr.bf16.mxu1 %v8267_v27 }
  0x32   : > { %7892 = vmatpush3.bf16.msra.mxu0 %v8266_v26 }
  0x33   : > { %7893 = vmatprep.subr.bf16.mxu0 %v8269_v29  ;;  %v7378_v29 = vld [vmem:[%s10726_s2] ss:$0 sm:$0xff] }
  0x34   : > { %7914 = vmatpush3.bf16.msra.mxu1 %v8268_v28 }
  0x35   : > { %7915 = vmatprep.subr.bf16.mxu1 %v8271_v31  ;;  %v7379_v31 = vld [vmem:[%s10727_s5] ss:$0 sm:$0xff] }
  0x36   : > { %7894 = vmatpush3.bf16.msra.mxu0 %v8270_v30 }
  0x37   : > { %7923 = vmatprep.subr.bf16.mxu0 %v8273_v37 }
  0x38   : > { %7916 = vmatpush3.bf16.msra.mxu1 %v8272_v34 }
  0x39   : > { %1252 = vmatmul.mubr.bf16.vlgmr.msra.gmra.mrb[0].mxu0 %v924_v36  ;;  %8013 = vmatprep.subr.bf16.mxu1 %v8491_v23 }
  0x3a   : > { %7924 = vmatpush3.bf16.msra.mxu0 %v8274_v40  ;;  %1331 = vmatprep.mubr.bf16.mxu0 %v929_v54 }
  0x3b   : > { %1292 = vmatmul.mubr.bf16.vlgmr.msra.gmra.mrb[0].mxu1 %v926_v42  ;;  %7925 = vmatprep.subr.bf16.mxu0 %v8275_v43 }
  0x3c   : > { %8017 = vmatprep.mubr.msk.bf16.mxu1 %vm8492_vm1, %v8491_v23  ;;  %8014 = vmatpush3.bf16.msra.mxu1 %v8289_v22 }
  0x3d   : > { %8015 = vmatprep.subr.bf16.mxu1 %v8491_v23 }
  0x3e   : > { %7926 = vmatpush3.bf16.msra.mxu0 %v8276_v44 }
  0x3f   : > { %7927 = vmatprep.subr.bf16.mxu0 %v8277_v45 }
  0x40   : > { %8016 = vmatpush3.bf16.msra.mxu1 %v8290_v24 }
  0x41   : > { %8021 = vmatprep.subr.mxu1 %v8491_v23 }
  0x42   : > { %7928 = vmatpush3.bf16.msra.mxu0 %v8278_v46 }
  0x43   : > { %7929 = vmatprep.subr.bf16.mxu0 %v8279_v47 }
  0x46   : > { %7930 = vmatpush3.bf16.msra.mxu0 %v8280_v48 }
  0x47   : > { %7931 = vmatprep.subr.bf16.mxu0 %v8281_v49 }
  0x4a   : > { %7932 = vmatpush3.bf16.msra.mxu0 %v8282_v50 }
  0x4b   : > { %7933 = vmatprep.subr.bf16.mxu0 %v8283_v51 }
  0x4e   : > { %7934 = vmatpush3.bf16.msra.mxu0 %v8284_v53 }
  0x4f   : > { %7935 = vmatprep.subr.bf16.mxu0 %v8285_v55 }
  0x52   : > { %7936 = vmatpush3.bf16.msra.mxu0 %v8286_v56 }
  0x53   : > { %7937 = vmatprep.subr.bf16.mxu0 %v8287_v57 }
  0x56   : > { %7938 = vmatpush3.bf16.msra.mxu0 %v8288_v58 }
  0x57   : > { %8061 = vmatprep.subr.bf16.mxu0 %v8491_v23 }
  0x59   : > { %1332 = vmatmul.mubr.bf16.vlgmr.msra.gmra.mrb[4].mxu0 %v928_v60 }
  0x5a   : > { %8065 = vmatprep.mubr.msk.bf16.mxu0 %vm8492_vm1, %v8491_v23 }
 0x10c   : > { %v7895_v61 = vpop.f32.mrb[0].mxu0 }
 0x10d   : > { %v7896_v63 = vpop.f32.mrb[1].mxu0 }
 0x10e   : > { %v7897_v0 = vadd.f32 %v7896_v63, %v7895_v61  ;;  %v7898_v1 = vpop.f32.mrb[2].mxu0  ;;  %v7917_v2 = vpop.f32.mrb[0].mxu1 }
 0x10f   : > { %v7899_v3 = vpop.f32.mrb[3].mxu0  ;;  %v7918_v5 = vpop.f32.mrb[1].mxu1 }
 0x110   : > { %v1254_v4 = vadd.f32 %v7897_v0, %v930_v62  ;;  %v7919_v6 = vadd.f32 %v7918_v5, %v7917_v2  ;;  %v7920_v7 = vpop.f32.mrb[2].mxu1 }
 0x111   : > { %v7921_v8 = vpop.f32.mrb[3].mxu1 }
 0x112   : > { %v1294_v9 = vadd.f32 %v7919_v6, %v1254_v4 }
 0x12c   : > { %v7939_v10 = vpop.f32.mrb[4].mxu0 }
 0x12d   : > { %v7940_v11 = vpop.f32.mrb[5].mxu0 }
 0x12e   : > { %v7941_v12 = vadd.f32 %v7940_v11, %v7939_v10  ;;  %v7942_v13 = vpop.f32.mrb[6].mxu0 }
 0x12f   : > { %v7943_v14 = vpop.f32.mrb[7].mxu0 }
 0x130   : > { %v8824_v15 = vadd.f32 %v7941_v12, %v1294_v9 }
 0x132   : > { %v1342_v16 = vsel %vm1341_vm0, %v8824_v15, 0.0 }
 0x133   : > { %1343 = vadd.xlane.f32.xlu0 %v1342_v16 }
 0x1c0   : > { %v1344_v17 = vpop.xlane.xlu0 %1343 }
 0x1c1   : > { %v1346_v18 = vmul.f32 0.03125, %v1344_v17 }
 0x1c3   : > { %v1347_v19 = vsub.f32 %v8824_v15, %v1346_v18 }
 0x1c5   : > { %v1348_v20 = vmul.f32 %v1347_v19, %v1347_v19 }
 0x1c7   : > { %v1349_v21 = vsel %vm1341_vm0, %v1348_v20, 0.0 }
 0x1c8   : > { %1350 = vadd.xlane.f32.xlu0 %v1349_v21 }
 0x255   : > { %v1351_v25 = vpop.xlane.xlu0 %1350 }
 0x256   : > { %v1352_v26 = vmul.f32 0.03125, %v1351_v25 }
 0x258   : > { %v1353_v27 = vadd.f32 1e-06, %v1352_v26 }
 0x25a   : > { %8437 = vrsqrt.f32 %v1353_v27 }
 0x264   : > { %v8438_v28 = vpop.eup %8437 }
 0x265   : > { %v1355_v30 = vmul.f32 %v8438_v28, %v1347_v19 }
 0x267   : > { %v1362_v32 = vmul.f32 %v7378_v29, %v1355_v30 }
 0x269   : > { %v1369_v33 = vadd.f32 %v7379_v31, %v1362_v32 }
 0x26b   : > { %v1370_v34 = vpack.c.bf16 %v1369_v33, %v1369_v33 }
 0x26d   : > { %8018 = vmatmul.mubr.msk.bf16.vlgmr.msra.gmra.mrb[4].mxu1 %vm1394_vm2, %v1370_v34 }
 0x26e   : > { %8023 = vmatprep.mubr.msk.f32.mxu1 %vm8492_vm1, %v8491_v23 }
 0x340   : > { %v1432_v36 = vpop.f32.mrb[4].mxu1 }
 0x341   : > { %v8856_v37 = vadd.f32 %v7380_v35, %v1432_v36  ;;  %v8019_v38 = vpop.f32.mrb[5].mxu1 }
 0x342   : > { %v1435_v39 = vpop.f32.mrb[6].mxu1 }
 0x343   : > { %1530 = vrot.lane.b32.xlu0 %v8856_v37, %s10702_s0  ;;  %1440 = vrot.lane.b32.xlu1 %v8856_v37, %s10701_s29  ;;  %v8020_v40 = vpop.f32.mrb[7].mxu1  ;;  %v8866_v42 = vmul.f32 0.35355338, %v8856_v37  ;;  %s10735_s29 = smov 96   ;;  %s10740_s0 = smov 112  }
 0x347   : > { %1611 = vrot.lane.b32.xlu0 %v8856_v37, %s10700_s1  ;;  %s10739_s1 = smov 80  }
 0x3b5   : > { %v1441_v41 = vpop.permute.xlu1 %1440  ;;  %v1531_v43 = vpop.permute.xlu0 %1530 }
 0x3b6   : > { %8022 = vmatpush3.xpose.msk.msra.mxu1 %vm1442_vm3, %v1441_v41 }
 0x3b7   : > { %8026 = vmatprep.subr.mxu1 %v8491_v23 }
 0x3b9   : > { %8024 = vmatmul.mubr.msk.f32.vlgmr.msra.gmra.mrb[8].mxu1 %vm1442_vm3, %v8866_v42  ;;  %v1612_v52 = vpop.permute.xlu0 %1611 }
 0x3ba   : > { %8027 = vmatpush3.msk.msra.mxu1 %vm1536_vm4, %v1531_v43  ;;  %8028 = vmatprep.mubr.msk.f32.mxu1 %vm8492_vm1, %v8491_v23 }
 0x3bb   : > { %8031 = vmatprep.subr.mxu1 %v8491_v23 }
 0x48c   : > { %v1514_v44 = vpop.f32.mrb[8].mxu1 }
 0x48d   : > { %v8025_v45 = vpop.f32.mrb[9].mxu1  ;;  %v1519_v46 = vsel %vm1518_vm5, %v1514_v44, -inf }
 0x48e   : > { %1520 = vmax.xlane.f32.xlu1 %v1519_v46 }
 0x51b   : > { %v1521_v47 = vpop.xlane.xlu1 %1520 }
 0x51c   : > { %v1522_v48 = vsub.f32 %v1514_v44, %v1521_v47 }
 0x51e   : > { %v1523_v49 = vmul.f32 1.442695, %v1522_v48 }
 0x520   : > { %8439 = vpow2.f32 %v1523_v49 }
 0x52a   : > { %v8440_v50 = vpop.eup %8439 }
 0x52b   : > { %v1525_v51 = vsel %vm1518_vm5, %v8440_v50, 0.0 }
 0x52c   : > { %1526 = vadd.xlane.f32.xlu0 %v1525_v51 }
 0x542   : > { %1609 = vrot.lane.b32.xlu0 %v8866_v42, %s10698_s6  ;;  %s10699_s6 = smov 24  }
 0x5b9   : > { %v1527_v53 = vpop.xlane.xlu0 %1526 }
 0x5ba   : > { %8441 = vrcp.f32 %v1527_v53 }
 0x5bd   : > { %v1610_v56 = vpop.permute.xlu0 %1609 }
 0x5c4   : > { %v8442_v54 = vpop.eup %8441 }
 0x5c5   : > { %v1529_v55 = vmul.f32 %v8442_v54, %v8440_v50 }
 0x5c7   : > { %8029 = vmatmul.mubr.msk.f32.vlgmr.msra.gmra.mrb[10].mxu1 %vm1532_vm6, %v1529_v55 }
 0x5c8   : > { %8032 = vmatpush3.xpose.msk.msra.mxu1 %vm1442_vm3, %v1612_v52  ;;  %8033 = vmatprep.mubr.msk.f32.mxu1 %vm8492_vm1, %v8491_v23 }
 0x5c9   : > { %8036 = vmatprep.subr.mxu1 %v8491_v23 }
 0x5cb   : > { %8034 = vmatmul.mubr.msk.f32.vlgmr.msra.gmra.mrb[12].mxu1 %vm1442_vm3, %v1610_v56 }
 0x5cc   : > { %8038 = vmatprep.mubr.msk.f32.mxu1 %vm8492_vm1, %v8491_v23 }
 0x69a   : > { %v8887_v57 = vpop.f32.mrb[10].mxu1 }
 0x69b   : > { %v8030_v58 = vpop.f32.mrb[11].mxu1 }
 0x69e   : > { %v1683_v59 = vpop.f32.mrb[12].mxu1 }
 0x69f   : > { %v8035_v60 = vpop.f32.mrb[13].mxu1  ;;  %v1687_v61 = vsel %vm1518_vm5, %v1683_v59, -inf }
 0x6a0   : > { %1688 = vmax.xlane.f32.xlu1 %v1687_v61 }
 0x6b1   : > { %1698 = vrot.lane.b32.xlu1 %v8856_v37, %s10697_s11  ;;  %s10733_s11 = sld [smem:[#allocation17_spill]] }
 0x6b5   : > { %1777 = vrot.lane.b32.xlu1 %v8856_v37, %s10696_s4  ;;  %s10731_s4 = sld [smem:[#allocation18_spill]] }
 0x6b9   : > { %1775 = vrot.lane.b32.xlu1 %v8866_v42, %s10692_s9  ;;  %s10693_s9 = smov 16  }
 0x72d   : > { %v1689_v62 = vpop.xlane.xlu1 %1688 }
 0x72e   : > { %v1690_v63 = vsub.f32 %v1683_v59, %v1689_v62 }
 0x730   : > { %v1691_v0 = vmul.f32 1.442695, %v1690_v63 }
 0x731   : > { %v1699_v1 = vpop.permute.xlu1 %1698 }
 0x732   : > { %8443 = vpow2.f32 %v1691_v0  ;;  %8037 = vmatpush3.msk.msra.mxu1 %vm1536_vm4, %v1699_v1  ;;  %v8293_v1 = vld [vmem:[%s10731_s4] sm:$0xff]  }
 0x733   : > { %8041 = vmatprep.subr.mxu1 %v8491_v23 }
 0x735   : > { %v1778_v6 = vpop.permute.xlu1 %1777 }
 0x739   : > { %v1776_v8 = vpop.permute.xlu1 %1775 }
 0x73c   : > { %v8444_v2 = vpop.eup %8443 }
 0x73d   : > { %v1693_v3 = vsel %vm1518_vm5, %v8444_v2, 0.0 }
 0x73e   : > { %1694 = vadd.xlane.f32.xlu0 %v1693_v3  ;;  %v8296_v3 = vld [vmem:[%s10664_s13 + $0x8] sm:$0xff]  }
 0x754   : > { %1864 = vrot.lane.b32.xlu0 %v8856_v37, %s10691_s26  ;;  %s10694_s26 = smov 8  }
 0x758   : > { %1943 = vrot.lane.b32.xlu0 %v8856_v37, %s10689_s7  ;;  %s10690_s7 = smov 104  }
 0x7cb   : > { %v1695_v4 = vpop.xlane.xlu0 %1694 }
 0x7cc   : > { %8445 = vrcp.f32 %v1695_v4  ;;  %v8297_v4 = vld [vmem:[%s10664_s13 + $0x10] sm:$0xff]  }
 0x7cf   : > { %v1865_v9 = vpop.permute.xlu0 %1864 }
 0x7d3   : > { %v1944_v21 = vpop.permute.xlu0 %1943 }
 0x7d6   : > { %v8446_v5 = vpop.eup %8445 }
 0x7d7   : > { %v1697_v7 = vmul.f32 %v8446_v5, %v8444_v2  ;;  %v8295_v2 = vld [vmem:[%s10664_s13] sm:$0xff]  }
 0x7d9   : > { %8039 = vmatmul.mubr.msk.f32.vlgmr.msra.gmra.mrb[14].mxu1 %vm1532_vm6, %v1697_v7 }
 0x7da   : > { %8042 = vmatpush3.xpose.msk.msra.mxu1 %vm1442_vm3, %v1778_v6  ;;  %8043 = vmatprep.mubr.msk.f32.mxu1 %vm8492_vm1, %v8491_v23 }
 0x7db   : > { %8046 = vmatprep.subr.mxu1 %v8491_v23 }
 0x7dd   : > { %8044 = vmatmul.mubr.msk.f32.vlgmr.msra.gmra.mrb[16].mxu1 %vm1442_vm3, %v1776_v8 }
 0x7de   : > { %8047 = vmatpush3.msk.msra.mxu1 %vm1536_vm4, %v1865_v9  ;;  %8048 = vmatprep.mubr.msk.f32.mxu1 %vm8492_vm1, %v8491_v23  ;;  %v7404_v9 = vld [vmem:[%s10732_s28] ss:$0 sm:$0xff] }
 0x7df   : > { %8051 = vmatprep.subr.mxu1 %v8491_v23 }
 0x8ac   : > { %v1771_v10 = vpop.f32.mrb[14].mxu1 }
 0x8ad   : > { %v8040_v11 = vpop.f32.mrb[15].mxu1 }
 0x8ae   : > { %v7405_v11 = vld [vmem:[%s10733_s11] ss:$0 sm:$0xff] }
 0x8b0   : > { %v1849_v12 = vpop.f32.mrb[16].mxu1 }
 0x8b1   : > { %v8045_v13 = vpop.f32.mrb[17].mxu1  ;;  %v1853_v14 = vsel %vm1518_vm5, %v1849_v12, -inf }
 0x8b2   : > { %1854 = vmax.xlane.f32.xlu1 %v1853_v14 }
 0x93f   : > { %v1855_v16 = vpop.xlane.xlu1 %1854 }
 0x940   : > { %v1856_v17 = vsub.f32 %v1849_v12, %v1855_v16  ;;  %v8298_v16 = vld [vmem:[%s10664_s13 + $0x18] sm:$0xff]  }
 0x942   : > { %v1857_v18 = vmul.f32 1.442695, %v1856_v17  ;;  %v8299_v17 = vld [vmem:[%s10664_s13 + $0x20] sm:$0xff]  }
 0x944   : > { %8447 = vpow2.f32 %v1857_v18  ;;  %v8300_v18 = vld [vmem:[%s10664_s13 + $0x28] sm:$0xff]  }
 0x94e   : > { %v8448_v19 = vpop.eup %8447 }
 0x94f   : > { %v1859_v20 = vsel %vm1518_vm5, %v8448_v19, 0.0 }
 0x950   : > { %1860 = vadd.xlane.f32.xlu0 %v1859_v20  ;;  %v8302_v20 = vld [vmem:[%s10664_s13 + $0x38] sm:$0xff]  }
 0x966   : > { %1941 = vrot.lane.b32.xlu0 %v8866_v42, %s10690_s7  ;;  %s10695_s7 = smov 40  }
 0x9dd   : > { %v1861_v22 = vpop.xlane.xlu0 %1860 }
 0x9de   : > { %8449 = vrcp.f32 %v1861_v22 }
 0x9e1   : > { %v1942_v26 = vpop.permute.xlu0 %1941 }
 0x9e8   : > { %v8450_v24 = vpop.eup %8449 }
 0x9e9   : > { %v1863_v25 = vmul.f32 %v8450_v24, %v8448_v19  ;;  %v8301_v19 = vld [vmem:[%s10664_s13 + $0x30] sm:$0xff]  }
 0x9eb   : > { %8049 = vmatmul.mubr.msk.f32.vlgmr.msra.gmra.mrb[18].mxu1 %vm1532_vm6, %v1863_v25 }
 0x9ec   : > { %8052 = vmatpush3.xpose.msk.msra.mxu1 %vm1442_vm3, %v1944_v21  ;;  %8053 = vmatprep.mubr.msk.f32.mxu1 %vm8492_vm1, %v8491_v23  ;;  %v7406_v21 = vld [vmem:[%s10663_s12] ss:$0 sm:$0xff] }
 0x9ed   : > { %8056 = vmatprep.subr.mxu1 %v8491_v23 }
 0x9ef   : > { %8054 = vmatmul.mubr.msk.f32.vlgmr.msra.gmra.mrb[20].mxu1 %vm1442_vm3, %v1942_v26 }
 0x9f0   : > { %8058 = vmatprep.mubr.msk.f32.mxu1 %vm8492_vm1, %v8491_v23 }
 0xabe   : > { %v1937_v27 = vpop.f32.mrb[18].mxu1 }
 0xabf   : > { %v8050_v28 = vpop.f32.mrb[19].mxu1 }
 0xac2   : > { %v2015_v29 = vpop.f32.mrb[20].mxu1 }
 0xac3   : > { %v8055_v30 = vpop.f32.mrb[21].mxu1  ;;  %v2019_v31 = vsel %vm1518_vm5, %v2015_v29, -inf }
 0xac4   : > { %2020 = vmax.xlane.f32.xlu1 %v2019_v31 }
 0xad5   : > { %2030 = vrot.lane.b32.xlu1 %v8856_v37, %s10695_s7  ;;  %s10729_s7 = sld [smem:[#allocation14_spill]] }
 0xad9   : > { %2108 = vrot.lane.b32.xlu1 %v1771_v10, %s10694_s26  ;;  %s10738_s26 = smov 56  }
 0xadb   : > { %v8291_v41 = vld [vmem:[%s10729_s7] sm:$0xff]   ;;  %v8292_v42 = vld [vmem:[%s10729_s7 + $0x8] sm:$0xff]  }
 0xadc   : > { %8062 = vmatpush3.bf16.msra.mxu0 %v8291_v41 }
 0xadd   : > { %2112 = vrot.lane.b32.xlu1 %v1937_v27, %s10693_s9  ;;  %8063 = vmatprep.subr.bf16.mxu0 %v8491_v23  ;;  %s10730_s9 = sld [smem:[#allocation15_spill]] }
 0xae0   : > { %8064 = vmatpush3.bf16.msra.mxu0 %v8292_v42 }
 0xae1   : > { %8077 = vmatprep.subr.bf16.mxu0 %v8491_v23 }
 0xae3   : > { %v7400_v52 = vld [vmem:[%s10730_s9] ss:$0 sm:$0xff] }
 0xb51   : > { %v2021_v32 = vpop.xlane.xlu1 %2020 }
 0xb52   : > { %v2022_v33 = vsub.f32 %v2015_v29, %v2021_v32 }
 0xb54   : > { %v2023_v34 = vmul.f32 1.442695, %v2022_v33 }
 0xb55   : > { %v2031_v35 = vpop.permute.xlu1 %2030 }
 0xb56   : > { %8451 = vpow2.f32 %v2023_v34  ;;  %8057 = vmatpush3.msk.msra.mxu1 %vm1536_vm4, %v2031_v35  ;;  %v7410_v34 = vld [vmem:[%s10665_s14] ss:$0 sm:$0xff] }
 0xb57   : > { %8069 = vmatprep.subr.bf16.mxu1 %v8491_v23 }
 0xb59   : > { %v2109_v45 = vpop.permute.xlu1 %2108 }
 0xb5a   : > { %v2119_v47 = vsel %vm1442_vm3, %v8887_v57, %v2109_v45 }
 0xb5d   : > { %v2113_v46 = vpop.permute.xlu1 %2112 }
 0xb5e   : > { %v2121_v48 = vsel %vm2120_vm7, %v2119_v47, %v2113_v46  ;;  %v8303_v47 = vld [vmem:[%s10725_s10 + $0x10] sm:$0xff]  }
 0xb60   : > { %v8452_v36 = vpop.eup %8451 }
 0xb61   : > { %v2025_v38 = vsel %vm1518_vm5, %v8452_v36, 0.0 }
 0xb62   : > { %2026 = vadd.xlane.f32.xlu0 %v2025_v38 }
 0xbef   : > { %v2027_v37 = vpop.xlane.xlu0 %2026 }
 0xbf0   : > { %8453 = vrcp.f32 %v2027_v37 }
 0xbfa   : > { %v8454_v39 = vpop.eup %8453 }
 0xbfb   : > { %v2029_v40 = vmul.f32 %v8454_v39, %v8452_v36 }
 0xbfd   : > { %8059 = vmatmul.mubr.msk.f32.vlgmr.msra.gmra.mrb[22].mxu1 %vm1532_vm6, %v2029_v40 }
 0xbfe   : > { %8073 = vmatprep.mubr.msk.bf16.mxu1 %vm8492_vm1, %v8491_v23  ;;  %8070 = vmatpush3.bf16.msra.mxu1 %v8293_v1 }
 0xbff   : > { %8071 = vmatprep.subr.bf16.mxu1 %v8491_v23 }
 0xcd0   : > { %v2103_v43 = vpop.f32.mrb[22].mxu1 }
 0xcd1   : > { %2116 = vrot.lane.b32.xlu1 %v2103_v43, %s10699_s6  ;;  %v8060_v44 = vpop.f32.mrb[23].mxu1  ;;  %s10737_s6 = smov 120  }
 0xd43   : > { %v2117_v49 = vpop.permute.xlu1 %2116 }
 0xd44   : > { %v2123_v50 = vsel %vm2122_vm8, %v2121_v48, %v2117_v49  ;;  %v8304_v48 = vld [vmem:[%s10725_s10 + $0x18] sm:$0xff]  }
 0xd45   : > { %v2124_v51 = vpack.c.bf16 %v2123_v50, %v2123_v50 }
 0xd47   : > { %8066 = vmatmul.mubr.msk.bf16.vlgmr.msra.gmra.mrb[8].mxu0 %vm1394_vm2, %v2124_v51 }
 0xd48   : > { %8093 = vmatprep.mubr.msk.bf16.mxu0 %vm8492_vm1, %v8491_v23  ;;  %8078 = vmatpush3.bf16.msra.mxu0 %v8295_v2 }
 0xd49   : > { %8079 = vmatprep.subr.bf16.mxu0 %v8491_v23 }
 0xd4c   : > { %8080 = vmatpush3.bf16.msra.mxu0 %v8296_v3 }
 0xd4d   : > { %8081 = vmatprep.subr.bf16.mxu0 %v8491_v23 }
 0xd50   : > { %8082 = vmatpush3.bf16.msra.mxu0 %v8297_v4 }
 0xd51   : > { %8083 = vmatprep.subr.bf16.mxu0 %v8491_v23 }
 0xd54   : > { %8084 = vmatpush3.bf16.msra.mxu0 %v8298_v16 }
 0xd55   : > { %8085 = vmatprep.subr.bf16.mxu0 %v8491_v23 }
 0xd58   : > { %8086 = vmatpush3.bf16.msra.mxu0 %v8299_v17 }
 0xd59   : > { %8087 = vmatprep.subr.bf16.mxu0 %v8491_v23 }
 0xd5c   : > { %8088 = vmatpush3.bf16.msra.mxu0 %v8300_v18 }
 0xd5d   : > { %8089 = vmatprep.subr.bf16.mxu0 %v8491_v23 }
 0xd60   : > { %8090 = vmatpush3.bf16.msra.mxu0 %v8301_v19 }
 0xd61   : > { %8091 = vmatprep.subr.bf16.mxu0 %v8491_v23 }
 0xd64   : > { %8092 = vmatpush3.bf16.msra.mxu0 %v8302_v20 }
 0xd65   : > { %8145 = vmatprep.subr.bf16.mxu0 %v8491_v23 }
 0xe1a   : > { %v2185_v53 = vpop.f32.mrb[8].mxu0 }
 0xe1b   : > { %v2186_v54 = vadd.f32 %v7400_v52, %v2185_v53  ;;  %v8067_v55 = vpop.f32.mrb[9].mxu0  ;;  %v7421_v53 = vld [vmem:[%s10726_s2 + $0x1] ss:$0 sm:$0xff] }
 0xe1c   : > { %v2188_v56 = vpop.f32.mrb[10].mxu0  ;;  %v7422_v55 = vld [vmem:[%s10727_s5 + $0x1] ss:$0 sm:$0xff] }
 0xe1d   : > { %v8956_v57 = vadd.f32 %v2186_v54, %v8824_v15  ;;  %v8068_v58 = vpop.f32.mrb[11].mxu0  ;;  %v8294_v15 = vld [vmem:[%s10731_s4 + $0x8] sm:$0xff]  }
 0xe1e   : > { %8072 = vmatpush3.bf16.msra.mxu1 %v8294_v15 }
 0xe1f   : > { %v2194_v59 = vsel %vm1341_vm0, %v8956_v57, 0.0  ;;  %8097 = vmatprep.subr.bf16.mxu1 %v8491_v23 }
 0xe20   : > { %2195 = vadd.xlane.f32.xlu0 %v2194_v59  ;;  %v7428_v59 = vld [vmem:[%s10728_s3 + $0x1] ss:$0 sm:$0xff] }
 0xead   : > { %v2196_v60 = vpop.xlane.xlu0 %2195 }
 0xeae   : > { %v2197_v61 = vmul.f32 0.03125, %v2196_v60 }
 0xeb0   : > { %v2198_v62 = vsub.f32 %v8956_v57, %v2197_v61 }
 0xeb2   : > { %v2199_v63 = vmul.f32 %v2198_v62, %v2198_v62 }
 0xeb4   : > { %v2200_v0 = vsel %vm1341_vm0, %v2199_v63, 0.0 }
 0xeb5   : > { %2201 = vadd.xlane.f32.xlu1 %v2200_v0 }
 0xf42   : > { %v2202_v5 = vpop.xlane.xlu1 %2201 }
 0xf43   : > { %v2203_v6 = vmul.f32 0.03125, %v2202_v5 }
 0xf45   : > { %v2204_v7 = vadd.f32 1e-06, %v2203_v6 }
 0xf47   : > { %8455 = vrsqrt.f32 %v2204_v7 }
 0xf51   : > { %v8456_v8 = vpop.eup %8455 }
 0xf52   : > { %v2206_v10 = vmul.f32 %v8456_v8, %v2198_v62 }
 0xf54   : > { %v2213_v12 = vmul.f32 %v7404_v9, %v2206_v10 }
 0xf56   : > { %v2220_v13 = vadd.f32 %v7405_v11, %v2213_v12 }
 0xf58   : > { %v2225_v14 = vpack.c.bf16 %v2220_v13, %v2220_v13 }
 0xf5a   : > { %8074 = vmatmul.mubr.msk.bf16.vlgmr.msra.gmra.mrb[24].mxu1 %vm1394_vm2, %v2225_v14 }
 0xf5b   : > { %8101 = vmatprep.mubr.msk.bf16.mxu1 %vm8492_vm1, %v8491_v23  ;;  %8098 = vmatpush3.bf16.msra.mxu1 %v8303_v47 }
 0xf5c   : > { %8099 = vmatprep.subr.bf16.mxu1 %v8491_v23 }
 0xf5f   : > { %8100 = vmatpush3.bf16.msra.mxu1 %v8304_v48 }
 0xf60   : > { %8105 = vmatprep.subr.mxu1 %v8491_v23 }
0x102d   : > { %v2282_v22 = vpop.f32.mrb[24].mxu1 }
0x102e   : > { %v2283_v24 = vadd.f32 %v7406_v21, %v2282_v22  ;;  %v8075_v25 = vpop.f32.mrb[25].mxu1 }
0x102f   : > { %v2285_v26 = vpop.f32.mrb[26].mxu1 }
0x1030   : > { %v2289_v27 = vmul.f32 0.70710677, %v2283_v24  ;;  %v8076_v28 = vpop.f32.mrb[27].mxu1  ;;  %v2288_v30 = vmul.f32 0.5, %v2283_v24 }
0x1032   : > { %8457 = verf.f32 %v2289_v27 }
0x103c   : > { %v8458_v29 = vpop.eup %8457 }
0x103d   : > { %v2291_v31 = vadd.f32 1.0, %v8458_v29 }
0x103f   : > { %v2292_v32 = vmul.f32 %v2291_v31, %v2288_v30 }
0x1041   : > { %v2309_v33 = vpack.c.bf16 %v2292_v32, %v2292_v32 }
0x1043   : > { %8094 = vmatmul.mubr.bf16.vlgmr.msra.gmra.mrb[12].mxu0 %v2309_v33 }
0x1044   : > { %8149 = vmatprep.mubr.msk.bf16.mxu0 %vm8492_vm1, %v8491_v23 }
0x1116   : > { %v2399_v35 = vpop.f32.mrb[12].mxu0 }
0x1117   : > { %v2400_v36 = vadd.f32 %v7410_v34, %v2399_v35  ;;  %v8095_v38 = vpop.f32.mrb[13].mxu0 }
0x1118   : > { %v2402_v37 = vpop.f32.mrb[14].mxu0 }
0x1119   : > { %v9020_v39 = vadd.f32 %v2400_v36, %v8956_v57  ;;  %v8096_v40 = vpop.f32.mrb[15].mxu0 }
0x111b   : > { %v2410_v41 = vsel %vm1341_vm0, %v9020_v39, 0.0 }
0x111c   : > { %2411 = vadd.xlane.f32.xlu0 %v2410_v41 }
0x11a9   : > { %v2412_v42 = vpop.xlane.xlu0 %2411 }
0x11aa   : > { %v2413_v43 = vmul.f32 0.03125, %v2412_v42 }
0x11ac   : > { %v2414_v44 = vsub.f32 %v9020_v39, %v2413_v43 }
0x11ae   : > { %v2415_v45 = vmul.f32 %v2414_v44, %v2414_v44 }
0x11b0   : > { %v2416_v46 = vsel %vm1341_vm0, %v2415_v45, 0.0 }
0x11b1   : > { %2417 = vadd.xlane.f32.xlu0 %v2416_v46 }
0x123e   : > { %v2418_v49 = vpop.xlane.xlu0 %2417 }
0x123f   : > { %v2419_v50 = vmul.f32 0.03125, %v2418_v49 }
0x1241   : > { %v2420_v51 = vadd.f32 1e-06, %v2419_v50 }
0x1243   : > { %8459 = vrsqrt.f32 %v2420_v51 }
0x124d   : > { %v8460_v52 = vpop.eup %8459 }
0x124e   : > { %v2422_v54 = vmul.f32 %v8460_v52, %v2414_v44 }
0x1250   : > { %v2429_v56 = vmul.f32 %v7421_v53, %v2422_v54 }
0x1252   : > { %v2436_v57 = vadd.f32 %v7422_v55, %v2429_v56 }
0x1254   : > { %v2437_v58 = vpack.c.bf16 %v2436_v57, %v2436_v57 }
0x1256   : > { %8102 = vmatmul.mubr.msk.bf16.vlgmr.msra.gmra.mrb[28].mxu1 %vm1394_vm2, %v2437_v58 }
0x1257   : > { %8107 = vmatprep.mubr.msk.f32.mxu1 %vm8492_vm1, %v8491_v23 }
0x1329   : > { %v2500_v60 = vpop.f32.mrb[28].mxu1 }
0x132a   : > { %v9046_v61 = vadd.f32 %v7428_v59, %v2500_v60  ;;  %v8103_v62 = vpop.f32.mrb[29].mxu1 }
0x132b   : > { %v2503_v63 = vpop.f32.mrb[30].mxu1 }
0x132c   : > { %2596 = vrot.lane.b32.xlu1 %v9046_v61, %s10734_s8  ;;  %2508 = vrot.lane.b32.xlu0 %v9046_v61, %s10735_s29  ;;  %v8104_v0 = vpop.f32.mrb[31].mxu1  ;;  %v9056_v15 = vmul.f32 0.35355338, %v9046_v61  ;;  %s10741_s8 = smov 48   ;;  %s10742_s29 = smov 72  }
0x1330   : > { %2675 = vrot.lane.b32.xlu1 %v9046_v61, %s10736_s27  ;;  %s10743_s27 = smov 104  }
0x139e   : > { %v2509_v1 = vpop.permute.xlu0 %2508  ;;  %v2597_v2 = vpop.permute.xlu1 %2596 }
0x139f   : > { %8106 = vmatpush3.xpose.msk.msra.mxu1 %vm1442_vm3, %v2509_v1  ;;  %v8305_v1 = vld [vmem:[%s10729_s7 + $0x10] sm:$0xff]  }
0x13a0   : > { %8110 = vmatprep.subr.mxu1 %v8491_v23  ;;  %8146 = vmatpush3.bf16.msra.mxu0 %v8305_v1 }
0x13a1   : > { %8147 = vmatprep.subr.bf16.mxu0 %v8491_v23 }
0x13a2   : > { %8108 = vmatmul.mubr.msk.f32.vlgmr.msra.gmra.mrb[32].mxu1 %vm1442_vm3, %v9056_v15  ;;  %v2676_v11 = vpop.permute.xlu1 %2675 }
0x13a3   : > { %8111 = vmatpush3.msk.msra.mxu1 %vm1536_vm4, %v2597_v2  ;;  %8112 = vmatprep.mubr.msk.f32.mxu1 %vm8492_vm1, %v8491_v23 }
0x13a4   : > { %8115 = vmatprep.subr.mxu1 %v8491_v23 }
0x1475   : > { %v2581_v3 = vpop.f32.mrb[32].mxu1 }
0x1476   : > { %v8109_v4 = vpop.f32.mrb[33].mxu1  ;;  %v2585_v5 = vsel %vm1518_vm5, %v2581_v3, -inf }
0x1477   : > { %2586 = vmax.xlane.f32.xlu0 %v2585_v5 }
0x1504   : > { %v2587_v6 = vpop.xlane.xlu0 %2586 }
0x1505   : > { %v2588_v7 = vsub.f32 %v2581_v3, %v2587_v6 }
0x1507   : > { %v2589_v8 = vmul.f32 1.442695, %v2588_v7 }
0x1509   : > { %8461 = vpow2.f32 %v2589_v8 }
0x1513   : > { %v8462_v9 = vpop.eup %8461 }
0x1514   : > { %v2591_v10 = vsel %vm1518_vm5, %v8462_v9, 0.0 }
0x1515   : > { %2592 = vadd.xlane.f32.xlu1 %v2591_v10 }
0x1526   : > { %2673 = vrot.lane.b32.xlu1 %v9056_v15, %s10737_s6  ;;  %s10744_s6 = smov 40  }
0x15a2   : > { %v2593_v12 = vpop.xlane.xlu1 %2592 }
0x15a3   : > { %8463 = vrcp.f32 %v2593_v12 }
0x15a6   : > { %v2674_v16 = vpop.permute.xlu1 %2673 }
0x15ad   : > { %v8464_v13 = vpop.eup %8463 }
0x15ae   : > { %v2595_v14 = vmul.f32 %v8464_v13, %v8462_v9 }
0x15b0   : > { %8113 = vmatmul.mubr.msk.f32.vlgmr.msra.gmra.mrb[34].mxu1 %vm1532_vm6, %v2595_v14 }
0x15b1   : > { %8116 = vmatpush3.xpose.msk.msra.mxu1 %vm1442_vm3, %v2676_v11  ;;  %8117 = vmatprep.mubr.msk.f32.mxu1 %vm8492_vm1, %v8491_v23  ;;  %v7453_v11 = vld [vmem:[%s10730_s9 + $0x1] ss:$0 sm:$0xff] }
0x15b2   : > { %8120 = vmatprep.subr.mxu1 %v8491_v23 }
0x15b4   : > { %8118 = vmatmul.mubr.msk.f32.vlgmr.msra.gmra.mrb[36].mxu1 %vm1442_vm3, %v2674_v16 }
0x15b5   : > { %8122 = vmatprep.mubr.msk.f32.mxu1 %vm8492_vm1, %v8491_v23 }
0x1683   : > { %v9077_v17 = vpop.f32.mrb[34].mxu1 }
0x1684   : > { %v8114_v18 = vpop.f32.mrb[35].mxu1 }
0x1687   : > { %v2747_v19 = vpop.f32.mrb[36].mxu1 }
0x1688   : > { %v8119_v20 = vpop.f32.mrb[37].mxu1  ;;  %v2751_v21 = vsel %vm1518_vm5, %v2747_v19, -inf }
0x1689   : > { %2752 = vmax.xlane.f32.xlu0 %v2751_v21 }
0x169f   : > { %2762 = vrot.lane.b32.xlu0 %v9046_v61, %s10738_s26  ;;  %s10745_s26 = smov 8  }
0x16a3   : > { %2841 = vrot.lane.b32.xlu0 %v9046_v61, %s10739_s1  ;;  %s10746_s1 = smov 16  }
0x16a7   : > { %2839 = vrot.lane.b32.xlu0 %v9056_v15, %s10740_s0 }
0x1716   : > { %v2753_v22 = vpop.xlane.xlu0 %2752 }
0x1717   : > { %v2754_v24 = vsub.f32 %v2747_v19, %v2753_v22 }
0x1719   : > { %v2755_v25 = vmul.f32 1.442695, %v2754_v24 }
0x171a   : > { %v2763_v26 = vpop.permute.xlu0 %2762 }
0x171b   : > { %8465 = vpow2.f32 %v2755_v25  ;;  %8121 = vmatpush3.msk.msra.mxu1 %vm1536_vm4, %v2763_v26  ;;  %v8307_v26 = vld [vmem:[%s10731_s4 + $0x10] sm:$0xff]  }
0x171c   : > { %8125 = vmatprep.subr.mxu1 %v8491_v23 }
0x171e   : > { %v2842_v31 = vpop.permute.xlu0 %2841 }
0x1722   : > { %v2840_v33 = vpop.permute.xlu0 %2839 }
0x1725   : > { %v8466_v27 = vpop.eup %8465 }
0x1726   : > { %v2757_v28 = vsel %vm1518_vm5, %v8466_v27, 0.0 }
0x1727   : > { %2758 = vadd.xlane.f32.xlu1 %v2757_v28  ;;  %v8310_v28 = vld [vmem:[%s10664_s13 + $0x48] sm:$0xff]  }
0x1738   : > { %2928 = vrot.lane.b32.xlu1 %v9046_v61, %s10741_s8 }
0x173c   : > { %3007 = vrot.lane.b32.xlu1 %v9046_v61, %s10742_s29 }
0x17b4   : > { %v2759_v29 = vpop.xlane.xlu1 %2758 }
0x17b5   : > { %8467 = vrcp.f32 %v2759_v29  ;;  %v8311_v29 = vld [vmem:[%s10664_s13 + $0x50] sm:$0xff]  }
0x17b8   : > { %v2929_v34 = vpop.permute.xlu1 %2928 }
0x17bc   : > { %v3008_v46 = vpop.permute.xlu1 %3007 }
0x17bf   : > { %v8468_v30 = vpop.eup %8467 }
0x17c0   : > { %v2761_v32 = vmul.f32 %v8468_v30, %v8466_v27  ;;  %v8309_v27 = vld [vmem:[%s10664_s13 + $0x40] sm:$0xff]  }
0x17c2   : > { %8123 = vmatmul.mubr.msk.f32.vlgmr.msra.gmra.mrb[38].mxu1 %vm1532_vm6, %v2761_v32 }
0x17c3   : > { %8126 = vmatpush3.xpose.msk.msra.mxu1 %vm1442_vm3, %v2842_v31  ;;  %8127 = vmatprep.mubr.msk.f32.mxu1 %vm8492_vm1, %v8491_v23 }
0x17c4   : > { %8130 = vmatprep.subr.mxu1 %v8491_v23 }
0x17c6   : > { %8128 = vmatmul.mubr.msk.f32.vlgmr.msra.gmra.mrb[40].mxu1 %vm1442_vm3, %v2840_v33 }
0x17c7   : > { %8131 = vmatpush3.msk.msra.mxu1 %vm1536_vm4, %v2929_v34  ;;  %8132 = vmatprep.mubr.msk.f32.mxu1 %vm8492_vm1, %v8491_v23  ;;  %v7459_v34 = vld [vmem:[%s10732_s28 + $0x1] ss:$0 sm:$0xff] }
0x17c8   : > { %8135 = vmatprep.subr.mxu1 %v8491_v23 }
0x1895   : > { %v2835_v35 = vpop.f32.mrb[38].mxu1 }
0x1896   : > { %v8124_v36 = vpop.f32.mrb[39].mxu1 }
0x1897   : > { %v7460_v36 = vld [vmem:[%s10733_s11 + $0x1] ss:$0 sm:$0xff] }
0x1899   : > { %v2913_v38 = vpop.f32.mrb[40].mxu1 }
0x189a   : > { %v8129_v37 = vpop.f32.mrb[41].mxu1  ;;  %v2917_v40 = vsel %vm1518_vm5, %v2913_v38, -inf }
0x189b   : > { %2918 = vmax.xlane.f32.xlu0 %v2917_v40 }
0x1928   : > { %v2919_v41 = vpop.xlane.xlu0 %2918 }
0x1929   : > { %v2920_v42 = vsub.f32 %v2913_v38, %v2919_v41  ;;  %v8312_v41 = vld [vmem:[%s10664_s13 + $0x58] sm:$0xff]  }
0x192b   : > { %v2921_v43 = vmul.f32 1.442695, %v2920_v42  ;;  %v8313_v42 = vld [vmem:[%s10664_s13 + $0x60] sm:$0xff]  }
0x192d   : > { %8469 = vpow2.f32 %v2921_v43  ;;  %v8314_v43 = vld [vmem:[%s10664_s13 + $0x68] sm:$0xff]  }
0x1937   : > { %v8470_v44 = vpop.eup %8469 }
0x1938   : > { %v2923_v45 = vsel %vm1518_vm5, %v8470_v44, 0.0 }
0x1939   : > { %2924 = vadd.xlane.f32.xlu1 %v2923_v45  ;;  %v8316_v45 = vld [vmem:[%s10664_s13 + $0x78] sm:$0xff]  }
0x194a   : > { %3005 = vrot.lane.b32.xlu1 %v9056_v15, %s10743_s27  ;;  %v8306_v15 = vld [vmem:[%s10729_s7 + $0x18] sm:$0xff]  }
0x194b   : > { %8148 = vmatpush3.bf16.msra.mxu0 %v8306_v15 }
0x194c   : > { %8161 = vmatprep.subr.bf16.mxu0 %v8491_v23 }
0x19c6   : > { %v2925_v47 = vpop.xlane.xlu1 %2924 }
0x19c7   : > { %8471 = vrcp.f32 %v2925_v47 }
0x19ca   : > { %v3006_v50 = vpop.permute.xlu1 %3005 }
0x19d1   : > { %v8472_v48 = vpop.eup %8471 }
0x19d2   : > { %v2927_v49 = vmul.f32 %v8472_v48, %v8470_v44  ;;  %v8315_v44 = vld [vmem:[%s10664_s13 + $0x70] sm:$0xff]  }
0x19d4   : > { %8133 = vmatmul.mubr.msk.f32.vlgmr.msra.gmra.mrb[42].mxu1 %vm1532_vm6, %v2927_v49 }
0x19d5   : > { %8136 = vmatpush3.xpose.msk.msra.mxu1 %vm1442_vm3, %v3008_v46  ;;  %8137 = vmatprep.mubr.msk.f32.mxu1 %vm8492_vm1, %v8491_v23  ;;  %v7466_v46 = vld [vmem:[%s10663_s12 + $0x1] ss:$0 sm:$0xff] }
0x19d6   : > { %8140 = vmatprep.subr.mxu1 %v8491_v23 }
0x19d8   : > { %8138 = vmatmul.mubr.msk.f32.vlgmr.msra.gmra.mrb[44].mxu1 %vm1442_vm3, %v3006_v50 }
0x19d9   : > { %8142 = vmatprep.mubr.msk.f32.mxu1 %vm8492_vm1, %v8491_v23 }
0x1aa7   : > { %v3001_v51 = vpop.f32.mrb[42].mxu1 }
0x1aa8   : > { %v8134_v52 = vpop.f32.mrb[43].mxu1 }
0x1aab   : > { %v3079_v53 = vpop.f32.mrb[44].mxu1 }
0x1aac   : > { %v8139_v54 = vpop.f32.mrb[45].mxu1  ;;  %v3083_v55 = vsel %vm1518_vm5, %v3079_v53, -inf }
0x1aad   : > { %3084 = vmax.xlane.f32.xlu0 %v3083_v55 }
0x1ac3   : > { %3094 = vrot.lane.b32.xlu0 %v9046_v61, %s10744_s6  ;;  %s10747_s6 = smov 24  }
0x1ac7   : > { %3172 = vrot.lane.b32.xlu0 %v2835_v35, %s10745_s26 }
0x1acb   : > { %3176 = vrot.lane.b32.xlu0 %v3001_v51, %s10746_s1 }
0x1b3a   : > { %v3085_v56 = vpop.xlane.xlu0 %3084 }
0x1b3b   : > { %v3086_v57 = vsub.f32 %v3079_v53, %v3085_v56 }
0x1b3d   : > { %v3087_v58 = vmul.f32 1.442695, %v3086_v57  ;;  %v7487_v57 = vld [vmem:[%s10665_s14 + $0x1] ss:$0 sm:$0xff] }
0x1b3e   : > { %v3095_v59 = vpop.permute.xlu0 %3094 }
0x1b3f   : > { %8473 = vpow2.f32 %v3087_v58  ;;  %8141 = vmatpush3.msk.msra.mxu1 %vm1536_vm4, %v3095_v59 }
0x1b40   : > { %8153 = vmatprep.subr.bf16.mxu1 %v8491_v23 }
0x1b42   : > { %v3173_v4 = vpop.permute.xlu0 %3172 }
0x1b43   : > { %v3183_v6 = vsel %vm1442_vm3, %v9077_v17, %v3173_v4 }
0x1b46   : > { %v3177_v5 = vpop.permute.xlu0 %3176 }
0x1b47   : > { %v3184_v7 = vsel %vm2120_vm7, %v3183_v6, %v3177_v5  ;;  %v3506_v5 = vld [vmem:[%s10668_s17] sm:$0xff] }
0x1b48   : > { %v3514_v6 = vld [vmem:[%s10668_s17 + $0x40] sm:$0xff] }
0x1b49   : > { %v8474_v60 = vpop.eup %8473 }
0x1b4a   : > { %v3089_v62 = vsel %vm1518_vm5, %v8474_v60, 0.0 }
0x1b4b   : > { %3090 = vadd.xlane.f32.xlu1 %v3089_v62 }
0x1bd8   : > { %v3091_v63 = vpop.xlane.xlu1 %3090 }
0x1bd9   : > { %8475 = vrcp.f32 %v3091_v63 }
0x1be3   : > { %v8476_v61 = vpop.eup %8475 }
0x1be4   : > { %v3093_v0 = vmul.f32 %v8476_v61, %v8474_v60 }
0x1be6   : > { %8143 = vmatmul.mubr.msk.f32.vlgmr.msra.gmra.mrb[46].mxu1 %vm1532_vm6, %v3093_v0 }
0x1be7   : > { %8157 = vmatprep.mubr.msk.bf16.mxu1 %vm8492_vm1, %v8491_v23  ;;  %8154 = vmatpush3.bf16.msra.mxu1 %v8307_v26  ;;  %v8507_v26 = vmov 0  }
0x1be8   : > { %8155 = vmatprep.subr.bf16.mxu1 %v8491_v23  ;;  %8239 = vset.pattern.permute.xlu1 %v8507_v26 }
0x1be9   : > { %8240 = vset.pattern.permute.xlu0 %v8507_v26 }
0x1cb9   : > { %v3167_v2 = vpop.f32.mrb[46].mxu1 }
0x1cba   : > { %3180 = vrot.lane.b32.xlu0 %v3167_v2, %s10747_s6  ;;  %v8144_v3 = vpop.f32.mrb[47].mxu1  ;;  %s10748_s6 = sld [smem:[#allocation19_spill]] }
0x1d2c   : > { %v3181_v8 = vpop.permute.xlu0 %3180 }
0x1d2d   : > { %v3185_v9 = vsel %vm2122_vm8, %v3184_v7, %v3181_v8  ;;  %v3510_v7 = vld [vmem:[%s10668_s17 + $0x20] sm:$0xff]  ;;  %v7499_v8 = vcombine.high %v3506_v5, %v3514_v6 }
0x1d2e   : > { %v3186_v10 = vpack.c.bf16 %v3185_v9, %v3185_v9  ;;  %v3518_v9 = vld [vmem:[%s10668_s17 + $0x60] sm:$0xff] }
0x1d30   : > { %8150 = vmatmul.mubr.msk.bf16.vlgmr.msra.gmra.mrb[16].mxu0 %vm1394_vm2, %v3186_v10  ;;  %v7498_v10 = vcombine.low %v3506_v5, %v3514_v6  ;;  %v4228_v5 = vld [vmem:[%s10670_s19 + $0xa0] sm:$0xff] }
0x1d31   : > { %8177 = vmatprep.mubr.msk.bf16.mxu0 %vm8492_vm1, %v8491_v23  ;;  %8162 = vmatpush3.bf16.msra.mxu0 %v8309_v27  ;;  %v3520_v27 = vld [vmem:[%s10668_s17 + $0x70] sm:$0xff] }
0x1d32   : > { %8163 = vmatprep.subr.bf16.mxu0 %v8491_v23 }
0x1d35   : > { %8164 = vmatpush3.bf16.msra.mxu0 %v8310_v28 }
0x1d36   : > { %8165 = vmatprep.subr.bf16.mxu0 %v8491_v23 }
0x1d39   : > { %8166 = vmatpush3.bf16.msra.mxu0 %v8311_v29 }
0x1d3a   : > { %8167 = vmatprep.subr.bf16.mxu0 %v8491_v23 }
0x1d3d   : > { %8168 = vmatpush3.bf16.msra.mxu0 %v8312_v41 }
0x1d3e   : > { %8169 = vmatprep.subr.bf16.mxu0 %v8491_v23 }
0x1d41   : > { %8170 = vmatpush3.bf16.msra.mxu0 %v8313_v42 }
0x1d42   : > { %8171 = vmatprep.subr.bf16.mxu0 %v8491_v23 }
0x1d45   : > { %8172 = vmatpush3.bf16.msra.mxu0 %v8314_v43  ;;  %v3523_v43 = vld [vmem:[%s10668_s17 + $0x88] sm:$0xff] }
0x1d46   : > { %8173 = vmatprep.subr.bf16.mxu0 %v8491_v23 }
0x1d49   : > { %8174 = vmatpush3.bf16.msra.mxu0 %v8315_v44  ;;  %v3531_v44 = vld [vmem:[%s10668_s17 + $0xc8] sm:$0xff] }
0x1d4a   : > { %8175 = vmatprep.subr.bf16.mxu0 %v8491_v23 }
0x1d4d   : > { %8176 = vmatpush3.bf16.msra.mxu0 %v8316_v45  ;;  %v3528_v45 = vld [vmem:[%s10668_s17 + $0xb0] sm:$0xff] }
0x1e03   : > { %v3249_v12 = vpop.f32.mrb[16].mxu0 }
0x1e04   : > { %v3250_v13 = vadd.f32 %v7453_v11, %v3249_v12  ;;  %v8151_v14 = vpop.f32.mrb[17].mxu0  ;;  %v7506_v11 = vcombine.low %v3510_v7, %v3518_v9  ;;  %v7507_v12 = vcombine.high %v3510_v7, %v3518_v9  ;;  %v3525_v9 = vld [vmem:[%s10668_s17 + $0x98] sm:$0xff] }
0x1e05   : > { %v3252_v16 = vpop.f32.mrb[18].mxu0  ;;  %v3530_v14 = vld [vmem:[%s10668_s17 + $0xc0] sm:$0xff] }
0x1e06   : > { %v9146_v17 = vadd.f32 %v3250_v13, %v9020_v39  ;;  %v8152_v18 = vpop.f32.mrb[19].mxu0  ;;  %v8308_v39 = vld [vmem:[%s10731_s4 + $0x18] sm:$0xff]   ;;  %3956 = vmatprep.subr.bf16.mxu0 %v7507_v12  ;;  %v3522_v13 = vld [vmem:[%s10668_s17 + $0x80] sm:$0xff]  ;;  %s7878_s4 = sshll.u32 %s10751_s30, 3 }
0x1e07   : > { %8156 = vmatpush3.bf16.msra.mxu1 %v8308_v39  ;;  %v3526_v16 = vld [vmem:[%s10668_s17 + $0xa0] sm:$0xff]  ;;  %s820_s26 = scalar_lea.vmem %s10748_s6, %s7878_s4 }
0x1e08   : > { %v3260_v19 = vsel %vm1341_vm0, %v9146_v17, 0.0  ;;  %3792 = vmatprep.subr.bf16.mxu1 %v7499_v8  ;;  %v3534_v18 = vld [vmem:[%s10668_s17 + $0xe0] sm:$0xff] }
0x1e09   : > { %3261 = vadd.xlane.f32.xlu1 %v3260_v19  ;;  %v7514_v19 = vcombine.low %v3522_v13, %v3530_v14  ;;  %v4232_v12 = vld [vmem:[%s10670_s19 + $0xc0] sm:$0xff] }
0x1e96   : > { %v3262_v20 = vpop.xlane.xlu1 %3261 }
0x1e97   : > { %v3263_v21 = vmul.f32 0.03125, %v3262_v20  ;;  %v7522_v20 = vcombine.low %v3526_v16, %v3534_v18 }
0x1e99   : > { %v3264_v22 = vsub.f32 %v9146_v17, %v3263_v21  ;;  %v7523_v21 = vcombine.high %v3526_v16, %v3534_v18  ;;  %v3511_v18 = vld [vmem:[%s10668_s17 + $0x28] sm:$0xff] }
0x1e9b   : > { %v3265_v24 = vmul.f32 %v3264_v22, %v3264_v22 }
0x1e9d   : > { %v3266_v25 = vsel %vm1341_vm0, %v3265_v24, 0.0  ;;  %v3515_v24 = vld [vmem:[%s10668_s17 + $0x48] sm:$0xff] }
0x1e9e   : > { %3267 = vadd.xlane.f32.xlu0 %v3266_v25  ;;  %v3512_v25 = vld [vmem:[%s10668_s17 + $0x30] sm:$0xff] }
0x1e9f   : > { %v7510_v29 = vcombine.low %v3512_v25, %v3520_v27 }
0x1f2b   : > { %v3268_v30 = vpop.xlane.xlu0 %3267 }
0x1f2c   : > { %v3269_v31 = vmul.f32 0.03125, %v3268_v30  ;;  %v7511_v30 = vcombine.high %v3512_v25, %v3520_v27  ;;  %v3527_v27 = vld [vmem:[%s10668_s17 + $0xa8] sm:$0xff] }
0x1f2e   : > { %v3270_v32 = vadd.f32 1e-06, %v3269_v31 }
0x1f30   : > { %8477 = vrsqrt.f32 %v3270_v32 }
0x1f3a   : > { %v8478_v33 = vpop.eup %8477 }
0x1f3b   : > { %v3272_v35 = vmul.f32 %v8478_v33, %v3264_v22  ;;  %v3507_v22 = vld [vmem:[%s10668_s17 + $0x8] sm:$0xff] }
0x1f3c   : > { %v7501_v39 = vcombine.high %v3507_v22, %v3515_v24  ;;  %v7500_v28 = vcombine.low %v3507_v22, %v3515_v24  ;;  %v4244_v22 = vld [vmem:[%s10670_s19 + $0x120] sm:$0xff] }
0x1f3d   : > { %v3279_v38 = vmul.f32 %v7459_v34, %v3272_v35  ;;  %v7496_v35 = vld [vmem:[%s10666_s15] ss:$0 sm:$0xff] }
0x1f3f   : > { %v3286_v37 = vadd.f32 %v7460_v36, %v3279_v38  ;;  %v7497_v38 = vld [vmem:[%s10667_s16] ss:$0 sm:$0xff] }
0x1f41   : > { %v3292_v40 = vpack.c.bf16 %v3286_v37, %v3286_v37 }
0x1f43   : > { %8158 = vmatmul.mubr.msk.bf16.vlgmr.msra.gmra.mrb[48].mxu1 %vm1394_vm2, %v3292_v40 }
0x1f44   : > { %3793 = vmatpush1.bf16.msra.mxu1 %v7498_v10  ;;  %3824 = vmatprep.mubr.bf16.mxu1 %v8507_v26  ;;  %v3533_v10 = vld [vmem:[%s10668_s17 + $0xd8] sm:$0xff] }
0x1f45   : > { %v7521_v16 = vcombine.high %v3525_v9, %v3533_v10  ;;  %v7520_v24 = vcombine.low %v3525_v9, %v3533_v10  ;;  %v4253_v9 = vld [vmem:[%s10670_s19 + $0x168] sm:$0xff] }
0x2016   : > { %v3350_v47 = vpop.f32.mrb[48].mxu1 }
0x2017   : > { %v3351_v48 = vadd.f32 %v7466_v46, %v3350_v47  ;;  %v8159_v49 = vpop.f32.mrb[49].mxu1  ;;  %v3536_v46 = vld [vmem:[%s10668_s17 + $0xf0] sm:$0xff] }
0x2018   : > { %v3353_v50 = vpop.f32.mrb[50].mxu1 }
0x2019   : > { %v3357_v51 = vmul.f32 0.70710677, %v3351_v48  ;;  %v8160_v52 = vpop.f32.mrb[51].mxu1  ;;  %v3356_v54 = vmul.f32 0.5, %v3351_v48  ;;  %v7517_v50 = vcombine.high %v3523_v43, %v3531_v44 }
0x201a   : > { %v3508_v52 = vld [vmem:[%s10668_s17 + $0x10] sm:$0xff] }
0x201b   : > { %8479 = verf.f32 %v3357_v51  ;;  %v7527_v51 = vcombine.high %v3528_v45, %v3536_v46 }
0x2025   : > { %v8480_v53 = vpop.eup %8479 }
0x2026   : > { %v3359_v55 = vadd.f32 1.0, %v8480_v53  ;;  %v3516_v53 = vld [vmem:[%s10668_s17 + $0x50] sm:$0xff] }
0x2028   : > { %v3360_v23 = vmul.f32 %v3359_v55, %v3356_v54  ;;  %v4208_v54 = vld [vmem:[%s10670_s19] sm:$0xff] }
0x2029   : > { %v4212_v55 = vld [vmem:[%s10670_s19 + $0x20] sm:$0xff] }
0x202a   : > { %v3378_v56 = vpack.c.bf16 %v3360_v23, %v3360_v23  ;;  %v7516_v23 = vcombine.low %v3523_v43, %v3531_v44  ;;  %v3529_v44 = vld [vmem:[%s10668_s17 + $0xb8] sm:$0xff] }
0x202c   : > { %8178 = vmatmul.mubr.bf16.vlgmr.msra.gmra.mrb[20].mxu0 %v3378_v56  ;;  %v7526_v56 = vcombine.low %v3528_v45, %v3536_v46  ;;  %v3537_v45 = vld [vmem:[%s10668_s17 + $0xf8] sm:$0xff] }
0x202d   : > { %3957 = vmatpush1.bf16.msra.mxu0 %v7506_v11  ;;  %3988 = vmatprep.mubr.bf16.mxu0 %v8507_v26 }
0x202e   : > { %3958 = vmatprep.subr.bf16.mxu0 %v7523_v21  ;;  %v4240_v21 = vld [vmem:[%s10670_s19 + $0x100] sm:$0xff] }
0x2031   : > { %3959 = vmatpush1.bf16.msra.mxu0 %v7522_v20 }
0x2032   : > { %4038 = vmatprep.subr.bf16.mxu0 %v7511_v30  ;;  %v4248_v30 = vld [vmem:[%s10670_s19 + $0x140] sm:$0xff] }
0x20ff   : > { %v3469_v58 = vpop.f32.mrb[20].mxu0 }
0x2100   : > { %v3470_v59 = vadd.f32 %v7487_v57, %v3469_v58  ;;  %v8179_v60 = vpop.f32.mrb[21].mxu0  ;;  %v7503_v57 = vcombine.high %v3508_v52, %v3516_v53  ;;  %v7539_v58 = vcombine.high %v4208_v54, %v4212_v55 }
0x2101   : > { %v3472_v62 = vpop.f32.mrb[22].mxu0  ;;  %v3532_v60 = vld [vmem:[%s10668_s17 + $0xd0] sm:$0xff] }
0x2102   : > { %v8180_v63 = vpop.f32.mrb[23].mxu0  ;;  %v3475_v61 = vadd.f32 %v3470_v59, %v9146_v17  ;;  %v7515_v17 = vcombine.high %v3522_v13, %v3530_v14  ;;  %v3524_v59 = vld [vmem:[%s10668_s17 + $0x90] sm:$0xff]  ;;  %v4216_v62 = vld [vmem:[%s10670_s19 + $0x40] sm:$0xff] }
0x2103   : > { %v4220_v63 = vld [vmem:[%s10670_s19 + $0x60] sm:$0xff]  ;;  %v7518_v6 = vcombine.low %v3524_v59, %v3532_v60 }
0x2104   : > { %v3478_v0 = vsel %vm1341_vm0, %v3475_v61, 0.0  ;;  %3794 = vmatprep.subr.bf16.mxu1 %v7515_v17  ;;  %v7546_v8 = vcombine.low %v4216_v62, %v4220_v63  ;;  %v4236_v13 = vld [vmem:[%s10670_s19 + $0xe0] sm:$0xff] }
0x2105   : > { %3479 = vadd.xlane.f32.xlu1 %v3478_v0  ;;  %3795 = vmatpush1.bf16.msra.mxu1 %v7514_v19  ;;  %v7519_v0 = vcombine.high %v3524_v59, %v3532_v60  ;;  %v3519_v19 = vld [vmem:[%s10668_s17 + $0x68] sm:$0xff]  ;;  %v7563_v20 = vcombine.high %v4232_v12, %v4236_v13 }
0x2106   : > { %3833 = vmatprep.subr.bf16.mxu1 %v7501_v39  ;;  %v7509_v25 = vcombine.high %v3511_v18, %v3519_v19  ;;  %v7562_v39 = vcombine.low %v4232_v12, %v4236_v13  ;;  %v4221_v59 = vld [vmem:[%s10670_s19 + $0x68] sm:$0xff] }
0x2107   : > { %v4257_v12 = vld [vmem:[%s10670_s19 + $0x188] sm:$0xff] }
0x2108   : > { %v4261_v13 = vld [vmem:[%s10670_s19 + $0x1a8] sm:$0xff] }
0x2192   : > { %v3480_v1 = vpop.xlane.xlu1 %3479 }
0x2193   : > { %v3481_v15 = vmul.f32 0.03125, %v3480_v1  ;;  %v7538_v1 = vcombine.low %v4208_v54, %v4212_v55  ;;  %v4213_v54 = vld [vmem:[%s10670_s19 + $0x28] sm:$0xff] }
0x2195   : > { %v3482_v2 = vsub.f32 %v3475_v61, %v3481_v15  ;;  %v7502_v61 = vcombine.low %v3508_v52, %v3516_v53  ;;  %v3509_v15 = vld [vmem:[%s10668_s17 + $0x18] sm:$0xff]  ;;  %v4209_v53 = vld [vmem:[%s10670_s19 + $0x8] sm:$0xff] }
0x2196   : > { %v7540_v60 = vcombine.low %v4209_v53, %v4213_v54 }
0x2197   : > { %v3483_v3 = vmul.f32 %v3482_v2, %v3482_v2 }
0x2199   : > { %v3484_v4 = vsel %vm1341_vm0, %v3483_v3, 0.0  ;;  %v7547_v3 = vcombine.high %v4216_v62, %v4220_v63  ;;  %v4225_v63 = vld [vmem:[%s10670_s19 + $0x88] sm:$0xff] }
0x219a   : > { %3485 = vadd.xlane.f32.xlu1 %v3484_v4  ;;  %v4224_v4 = vld [vmem:[%s10670_s19 + $0x80] sm:$0xff] }
0x219b   : > { %v7555_v11 = vcombine.high %v4224_v4, %v4228_v5  ;;  %v7554_v17 = vcombine.low %v4224_v4, %v4228_v5  ;;  %v4245_v5 = vld [vmem:[%s10670_s19 + $0x128] sm:$0xff] }
0x2227   : > { %v3486_v31 = vpop.xlane.xlu1 %3485 }
0x2228   : > { %v3487_v32 = vmul.f32 0.03125, %v3486_v31  ;;  %v4252_v31 = vld [vmem:[%s10670_s19 + $0x160] sm:$0xff] }
0x2229   : > { %v7578_v43 = vcombine.low %v4248_v30, %v4252_v31 }
0x222a   : > { %v3488_v33 = vadd.f32 1e-06, %v3487_v32  ;;  %v7508_v32 = vcombine.low %v3511_v18, %v3519_v19  ;;  %v4269_v18 = vld [vmem:[%s10670_s19 + $0x1e8] sm:$0xff]  ;;  %v7588_v19 = vcombine.low %v4257_v12, %v4261_v13 }
0x222c   : > { %8481 = vrsqrt.f32 %v3488_v33 }
0x2236   : > { %v8482_v34 = vpop.eup %8481 }
0x2237   : > { %v3490_v36 = vmul.f32 %v8482_v34, %v3482_v2  ;;  %v3517_v2 = vld [vmem:[%s10668_s17 + $0x58] sm:$0xff]  ;;  %v7570_v34 = vcombine.low %v4240_v21, %v4244_v22 }
0x2238   : > { %v7505_v7 = vcombine.high %v3509_v15, %v3517_v2  ;;  %v7504_v14 = vcombine.low %v3509_v15, %v3517_v2  ;;  %v4233_v15 = vld [vmem:[%s10670_s19 + $0xc8] sm:$0xff] }
0x2239   : > { %v3497_v37 = vmul.f32 %v7496_v35, %v3490_v36  ;;  %v3513_v35 = vld [vmem:[%s10668_s17 + $0x38] sm:$0xff]  ;;  %v4237_v2 = vld [vmem:[%s10670_s19 + $0xe8] sm:$0xff] }
0x223a   : > { %v3521_v36 = vld [vmem:[%s10668_s17 + $0x78] sm:$0xff]  ;;  %v7565_v4 = vcombine.high %v4233_v15, %v4237_v2 }
0x223b   : > { %v3504_v40 = vadd.f32 %v7497_v38, %v3497_v37  ;;  %v7579_v38 = vcombine.high %v4248_v30, %v4252_v31  ;;  %v4256_v37 = vld [vmem:[%s10670_s19 + $0x180] sm:$0xff] }
0x223c   : > { %v4280_v31 = vld [vmem:[%s10670_s19 + $0x240] sm:$0xff] }
0x223d   : > { %v3505_v41 = vpack.c.bf16 %v3504_v40, %v3504_v40  ;;  %v4260_v40 = vld [vmem:[%s10670_s19 + $0x1a0] sm:$0xff] }
0x223e   : > { %v7587_v46 = vcombine.high %v4256_v37, %v4260_v40  ;;  %v7586_v52 = vcombine.low %v4256_v37, %v4260_v40  ;;  %v4288_v40 = vld [vmem:[%s10670_s19 + $0x280] sm:$0xff] }
0x223f   : > { %v3625_v42 = vshll.u32 %v3505_v41, 16  ;;  %v3623_v47 = vshrl.u32 %v3505_v41, 16 }
0x2241   : > { %v3627_v48 = vrot.slane %v3625_v42, 1  ;;  %v7513_v42 = vcombine.high %v3513_v35, %v3521_v36 }
0x2243   : > { %v9264_v49 = vor.u32 %v3627_v48, %v3623_v47  ;;  %v4264_v47 = vld [vmem:[%s10670_s19 + $0x1c0] sm:$0xff] }
0x2244   : > { %v4268_v48 = vld [vmem:[%s10670_s19 + $0x1e0] sm:$0xff] }
0x2245   : > { %7530 = vmatmul.mubr.msk.bf16.vlgmr.msra.gmra.mrb[52].mxu1 %vm1394_vm2, %v9264_v49  ;;  %7534 = vmatmul.mubr.msk.bf16.vlgmr.msra.gmra.mrb[24].mxu0 %vm1394_vm2, %v9264_v49  ;;  %v7595_v55 = vcombine.high %v4264_v47, %v4268_v48 }
0x2246   : > { %3834 = vmatpush1.bf16.msra.mxu1 %v7500_v28  ;;  %4039 = vmatpush1.bf16.msra.mxu0 %v7510_v29  ;;  %v3535_v28 = vld [vmem:[%s10668_s17 + $0xe8] sm:$0xff]  ;;  %v7571_v29 = vcombine.high %v4240_v21, %v4244_v22  ;;  %v4272_v22 = vld [vmem:[%s10670_s19 + $0x200] sm:$0xff] }
0x2247   : > { %3835 = vmatprep.subr.bf16.mxu1 %v7517_v50  ;;  %4040 = vmatprep.subr.bf16.mxu0 %v7527_v51  ;;  %v7525_v33 = vcombine.high %v3527_v27, %v3535_v28  ;;  %v7524_v41 = vcombine.low %v3527_v27, %v3535_v28  ;;  %v7512_v50 = vcombine.low %v3513_v35, %v3521_v36  ;;  %v4277_v27 = vld [vmem:[%s10670_s19 + $0x228] sm:$0xff] }
0x2248   : > { %3865 = vmatprep.mubr.bf16.mxu1 %v8507_v26  ;;  %4070 = vmatprep.mubr.bf16.mxu0 %v8507_v26  ;;  %v7529_v51 = vcombine.high %v3529_v44, %v3537_v45  ;;  %v4285_v35 = vld [vmem:[%s10670_s19 + $0x268] sm:$0xff] }
0x224a   : > { %3836 = vmatpush1.bf16.msra.mxu1 %v7516_v23  ;;  %4041 = vmatpush1.bf16.msra.mxu0 %v7526_v56  ;;  %v7528_v23 = vcombine.low %v3529_v44, %v3537_v45  ;;  %v7541_v56 = vcombine.high %v4209_v53, %v4213_v54  ;;  %v4301_v53 = vld [vmem:[%s10670_s19 + $0x2e8] sm:$0xff] }
0x224b   : > { %3874 = vmatprep.subr.bf16.mxu1 %v7503_v57  ;;  %5786 = vmatprep.subr.bf16.mxu0 %v7539_v58  ;;  %v7594_v57 = vcombine.low %v4264_v47, %v4268_v48  ;;  %v4217_v58 = vld [vmem:[%s10670_s19 + $0x48] sm:$0xff]  ;;  %v4296_v48 = vld [vmem:[%s10670_s19 + $0x2c0] sm:$0xff] }
0x224c   : > { %v7549_v62 = vcombine.high %v4217_v58, %v4221_v59 }
0x224d   : > { %7531 = vmatmul.mubr.msk.bf16.vlgmr.msra.gmra.mrb[56].mxu1 %vm1394_vm2, %v9264_v49  ;;  %7536 = vmatmul.mubr.msk.bf16.vlgmr.msra.gmra.mrb[28].mxu0 %vm1394_vm2, %v9264_v49 }
0x224e   : > { %3875 = vmatpush1.bf16.msra.mxu1 %v7502_v61  ;;  %3906 = vmatprep.mubr.bf16.mxu1 %v8507_v26  ;;  %v4229_v61 = vld [vmem:[%s10670_s19 + $0xa8] sm:$0xff] }
0x224f   : > { %3876 = vmatprep.subr.bf16.mxu1 %v7519_v0  ;;  %5787 = vmatpush1.bf16.msra.mxu0 %v7538_v1  ;;  %v7548_v0 = vcombine.low %v4217_v58, %v4221_v59  ;;  %v7557_v1 = vcombine.high %v4225_v63, %v4229_v61  ;;  %v4305_v58 = vld [vmem:[%s10670_s19 + $0x308] sm:$0xff] }
0x2250   : > { %5788 = vmatprep.subr.bf16.mxu0 %v7547_v3  ;;  %v7556_v3 = vcombine.low %v4225_v63, %v4229_v61 }
0x2252   : > { %3877 = vmatpush1.bf16.msra.mxu1 %v7518_v6  ;;  %v7564_v6 = vcombine.low %v4233_v15, %v4237_v2  ;;  %v4313_v15 = vld [vmem:[%s10670_s19 + $0x348] sm:$0xff] }
0x2253   : > { %3915 = vmatprep.subr.bf16.mxu1 %v7505_v7  ;;  %5789 = vmatpush1.bf16.msra.mxu0 %v7546_v8  ;;  %v4249_v8 = vld [vmem:[%s10670_s19 + $0x148] sm:$0xff] }
0x2254   : > { %5790 = vmatprep.subr.bf16.mxu0 %v7555_v11  ;;  %v7581_v11 = vcombine.high %v4249_v8, %v4253_v9 }
0x2255   : > { %7532 = vmatmul.mubr.msk.bf16.vlgmr.msra.gmra.mrb[60].mxu1 %vm1394_vm2, %v9264_v49 }
0x2256   : > { %3916 = vmatpush1.bf16.msra.mxu1 %v7504_v14  ;;  %3947 = vmatprep.mubr.bf16.mxu1 %v8507_v26  ;;  %v7580_v14 = vcombine.low %v4249_v8, %v4253_v9  ;;  %v4321_v8 = vld [vmem:[%s10670_s19 + $0x388] sm:$0xff] }
0x2257   : > { %3917 = vmatprep.subr.bf16.mxu1 %v7521_v16  ;;  %5791 = vmatpush1.bf16.msra.mxu0 %v7554_v17  ;;  %v7589_v16 = vcombine.high %v4257_v12, %v4261_v13  ;;  %v4265_v17 = vld [vmem:[%s10670_s19 + $0x1c8] sm:$0xff] }
0x2258   : > { %5792 = vmatprep.subr.bf16.mxu0 %v7563_v20  ;;  %v7597_v20 = vcombine.high %v4265_v17, %v4269_v18  ;;  %v7596_v21 = vcombine.low %v4265_v17, %v4269_v18  ;;  %v4329_v17 = vld [vmem:[%s10670_s19 + $0x3c8] sm:$0xff] }
0x225a   : > { %3918 = vmatpush1.bf16.msra.mxu1 %v7520_v24  ;;  %v4276_v24 = vld [vmem:[%s10670_s19 + $0x220] sm:$0xff] }
0x225b   : > { %3997 = vmatprep.subr.bf16.mxu1 %v7509_v25  ;;  %5793 = vmatpush1.bf16.msra.mxu0 %v7562_v39  ;;  %v4273_v25 = vld [vmem:[%s10670_s19 + $0x208] sm:$0xff]  ;;  %v7603_v39 = vcombine.high %v4272_v22, %v4276_v24  ;;  %v7602_v28 = vcombine.low %v4272_v22, %v4276_v24  ;;  %v9531_v24 = vld [vmem:[%s10670_s19 + $0x400] sm:$0xff] }
0x225c   : > { %5794 = vmatprep.subr.bf16.mxu0 %v7571_v29  ;;  %v7604_v29 = vcombine.low %v4273_v25, %v4277_v27  ;;  %v7605_v30 = vcombine.high %v4273_v25, %v4277_v27  ;;  %v9536_v25 = vld [vmem:[%s10670_s19 + $0x420] sm:$0xff] }
0x225d   : > { %7533 = vmatmul.mubr.msk.bf16.vlgmr.msra.gmra.mrb[64].mxu1 %vm1394_vm2, %v9264_v49  ;;  %v7667_v27 = vcombine.high %v9531_v24, %v9536_v25 }
0x225e   : > { %3998 = vmatpush1.bf16.msra.mxu1 %v7508_v32  ;;  %4029 = vmatprep.mubr.bf16.mxu1 %v8507_v26  ;;  %v4284_v32 = vld [vmem:[%s10670_s19 + $0x260] sm:$0xff] }
0x225f   : > { %3999 = vmatprep.subr.bf16.mxu1 %v7525_v33  ;;  %5795 = vmatpush1.bf16.msra.mxu0 %v7570_v34  ;;  %v4281_v33 = vld [vmem:[%s10670_s19 + $0x248] sm:$0xff]  ;;  %v7611_v34 = vcombine.high %v4280_v31, %v4284_v32  ;;  %v7610_v36 = vcombine.low %v4280_v31, %v4284_v32  ;;  %v3542_v32 = vlaneseq }
0x2260   : > { %5796 = vmatprep.subr.bf16.mxu0 %v7579_v38  ;;  %v7612_v38 = vcombine.low %v4281_v33, %v4285_v35  ;;  %v7613_v37 = vcombine.high %v4281_v33, %v4285_v35  ;;  %v9564_v35 = vld [vmem:[%s10669_s18] sm:$0xff] }
0x2261   : > { %v9556_v33 = vshrl.u32 %v3542_v32, 7 }
0x2262   : > { %4000 = vmatpush1.bf16.msra.mxu1 %v7524_v41  ;;  %v4292_v41 = vld [vmem:[%s10670_s19 + $0x2a0] sm:$0xff] }
0x2263   : > { %4079 = vmatprep.subr.bf16.mxu1 %v7513_v42  ;;  %5797 = vmatpush1.bf16.msra.mxu0 %v7578_v43  ;;  %v4289_v42 = vld [vmem:[%s10670_s19 + $0x288] sm:$0xff]  ;;  %v7618_v44 = vcombine.low %v4288_v40, %v4292_v41  ;;  %v7619_v45 = vcombine.high %v4288_v40, %v4292_v41 }
0x2264   : > { %5798 = vmatprep.subr.bf16.mxu0 %v7587_v46  ;;  %v4293_v43 = vld [vmem:[%s10670_s19 + $0x2a8] sm:$0xff] }
0x2265   : > { %7535 = vmatmul.mubr.msk.bf16.vlgmr.msra.gmra.mrb[68].mxu1 %vm1394_vm2, %v9264_v49  ;;  %v7620_v46 = vcombine.low %v4289_v42, %v4293_v43  ;;  %v7621_v47 = vcombine.high %v4289_v42, %v4293_v43 }
0x2266   : > { %4080 = vmatpush1.bf16.msra.mxu1 %v7512_v50  ;;  %4111 = vmatprep.mubr.bf16.mxu1 %v8507_v26  ;;  %v4300_v50 = vld [vmem:[%s10670_s19 + $0x2e0] sm:$0xff] }
0x2267   : > { %4081 = vmatprep.subr.bf16.mxu1 %v7529_v51  ;;  %5799 = vmatpush1.bf16.msra.mxu0 %v7586_v52  ;;  %v4297_v51 = vld [vmem:[%s10670_s19 + $0x2c8] sm:$0xff]  ;;  %v7627_v52 = vcombine.high %v4296_v48, %v4300_v50  ;;  %v7626_v54 = vcombine.low %v4296_v48, %v4300_v50  ;;  %v9583_v50 = vsub.s32 2, %v9556_v33 }
0x2268   : > { %5800 = vmatprep.subr.bf16.mxu0 %v7595_v55  ;;  %v7628_v55 = vcombine.low %v4297_v51, %v4301_v53 }
0x226a   : > { %4082 = vmatpush1.bf16.msra.mxu1 %v7528_v23  ;;  %v7629_v23 = vcombine.high %v4297_v51, %v4301_v53  ;;  %v9586_v51 = vsub.s32 4, %v9556_v33 }
0x226b   : > { %5872 = vmatprep.subr.bf16.mxu1 %v7541_v56  ;;  %5801 = vmatpush1.bf16.msra.mxu0 %v7594_v57  ;;  %v4304_v56 = vld [vmem:[%s10670_s19 + $0x300] sm:$0xff] }
0x226c   : > { %5802 = vmatprep.subr.bf16.mxu0 %v7603_v39  ;;  %v4308_v57 = vld [vmem:[%s10670_s19 + $0x320] sm:$0xff]  ;;  %v9541_v39 = vld [vmem:[%s10670_s19 + $0x408] sm:$0xff] }
0x226d   : > { %7537 = vmatmul.mubr.msk.bf16.vlgmr.msra.gmra.mrb[72].mxu1 %vm1394_vm2, %v9264_v49  ;;  %v4241_v49 = vld [vmem:[%s10670_s19 + $0x108] sm:$0xff]  ;;  %v7635_v59 = vcombine.high %v4304_v56, %v4308_v57 }
0x226e   : > { %5873 = vmatpush1.bf16.msra.mxu1 %v7540_v60  ;;  %v7573_v7 = vcombine.high %v4241_v49, %v4245_v5  ;;  %v7572_v10 = vcombine.low %v4241_v49, %v4245_v5  ;;  %v4309_v60 = vld [vmem:[%s10670_s19 + $0x328] sm:$0xff] }
0x226f   : > { %5874 = vmatprep.subr.bf16.mxu1 %v7549_v62  ;;  %5803 = vmatpush1.bf16.msra.mxu0 %v7602_v28  ;;  %v7634_v62 = vcombine.low %v4304_v56, %v4308_v57  ;;  %v7636_v63 = vcombine.low %v4305_v58, %v4309_v60  ;;  %v7637_v61 = vcombine.high %v4305_v58, %v4309_v60  ;;  %v9548_v28 = vld [vmem:[%s10670_s19 + $0x428] sm:$0xff]  ;;  %v9592_v56 = vsub.s32 5, %v9556_v33 }
0x2270   : > { %5804 = vmatprep.subr.bf16.mxu0 %v7611_v34  ;;  %v7669_v31 = vcombine.high %v9541_v39, %v9548_v28  ;;  %v9559_v34 = vsub.s32 0, %v9556_v33 }
0x2272   : > { %5875 = vmatpush1.bf16.msra.mxu1 %v7548_v0  ;;  %v4312_v0 = vld [vmem:[%s10670_s19 + $0x340] sm:$0xff] }
0x2273   : > { %5876 = vmatprep.subr.bf16.mxu1 %v7557_v1  ;;  %5805 = vmatpush1.bf16.msra.mxu0 %v7610_v36  ;;  %v4316_v1 = vld [vmem:[%s10670_s19 + $0x360] sm:$0xff]  ;;  %v9569_v36 = vld [vmem:[%s10669_s18 + $0x8] sm:$0xff] }
0x2274   : > { %5806 = vmatprep.subr.bf16.mxu0 %v7619_v45  ;;  %v7643_v2 = vcombine.high %v4312_v0, %v4316_v1  ;;  %v3577_v40 = vrot.slane %v9569_v36, %v9559_v34 }
0x2276   : > { %5877 = vmatpush1.bf16.msra.mxu1 %v7556_v3  ;;  %v4317_v3 = vld [vmem:[%s10670_s19 + $0x368] sm:$0xff] }
0x2277   : > { %5878 = vmatprep.subr.bf16.mxu1 %v7565_v4  ;;  %5807 = vmatpush1.bf16.msra.mxu0 %v7618_v44  ;;  %v7642_v4 = vcombine.low %v4312_v0, %v4316_v1  ;;  %v7644_v49 = vcombine.low %v4313_v15, %v4317_v3  ;;  %v7645_v5 = vcombine.high %v4313_v15, %v4317_v3 }
0x2278   : > { %5808 = vmatprep.subr.bf16.mxu0 %v7627_v52  ;;  %v3553_v1 = vrot.slane %v9564_v35, %v9583_v50  ;;  %v3593_v15 = vrot.slane %v9569_v36, %v9586_v51 }
0x227a   : > { %5879 = vmatpush1.bf16.msra.mxu1 %v7564_v6  ;;  %v4320_v6 = vld [vmem:[%s10670_s19 + $0x380] sm:$0xff] }
0x227b   : > { %5880 = vmatprep.subr.bf16.mxu1 %v7573_v7  ;;  %5809 = vmatpush1.bf16.msra.mxu0 %v7626_v54  ;;  %v4324_v7 = vld [vmem:[%s10670_s19 + $0x3a0] sm:$0xff] }
0x227c   : > { %5810 = vmatprep.subr.bf16.mxu0 %v7635_v59  ;;  %v7651_v9 = vcombine.high %v4320_v6, %v4324_v7 }
0x227e   : > { %5881 = vmatpush1.bf16.msra.mxu1 %v7572_v10  ;;  %v4325_v10 = vld [vmem:[%s10670_s19 + $0x3a8] sm:$0xff] }
0x227f   : > { %5882 = vmatprep.subr.bf16.mxu1 %v7581_v11  ;;  %5811 = vmatpush1.bf16.msra.mxu0 %v7634_v62  ;;  %v7650_v11 = vcombine.low %v4320_v6, %v4324_v7  ;;  %v7652_v12 = vcombine.low %v4321_v8, %v4325_v10  ;;  %v7653_v13 = vcombine.high %v4321_v8, %v4325_v10 }
0x2280   : > { %5812 = vmatprep.subr.bf16.mxu0 %v7643_v2 }
0x2282   : > { %5883 = vmatpush1.bf16.msra.mxu1 %v7580_v14  ;;  %v4328_v14 = vld [vmem:[%s10670_s19 + $0x3c0] sm:$0xff] }
0x2283   : > { %5884 = vmatprep.subr.bf16.mxu1 %v7589_v16  ;;  %5813 = vmatpush1.bf16.msra.mxu0 %v7642_v4  ;;  %v4332_v16 = vld [vmem:[%s10670_s19 + $0x3e0] sm:$0xff] }
0x2284   : > { %5814 = vmatprep.subr.bf16.mxu0 %v7651_v9  ;;  %v7659_v18 = vcombine.high %v4328_v14, %v4332_v16 }
0x2286   : > { %5885 = vmatpush1.bf16.msra.mxu1 %v7588_v19  ;;  %v4333_v19 = vld [vmem:[%s10670_s19 + $0x3e8] sm:$0xff] }
0x2287   : > { %5886 = vmatprep.subr.bf16.mxu1 %v7597_v20  ;;  %5815 = vmatpush1.bf16.msra.mxu0 %v7650_v11  ;;  %v7658_v20 = vcombine.low %v4328_v14, %v4332_v16  ;;  %v7661_v22 = vcombine.high %v4329_v17, %v4333_v19 }
0x2288   : > { %5816 = vmatprep.subr.bf16.mxu0 %v7659_v18 }
0x228a   : > { %5887 = vmatpush1.bf16.msra.mxu1 %v7596_v21  ;;  %v7660_v21 = vcombine.low %v4329_v17, %v4333_v19 }
0x228b   : > { %5888 = vmatprep.subr.bf16.mxu1 %v7605_v30  ;;  %5817 = vmatpush1.bf16.msra.mxu0 %v7658_v20  ;;  %v7668_v30 = vcombine.low %v9541_v39, %v9548_v28  ;;  %v4364_v39 = vld [vmem:[%s10670_s19 + $0x4e0] sm:$0xff]  ;;  %v4361_v28 = vld [vmem:[%s10670_s19 + $0x4c8] sm:$0xff] }
0x228c   : > { %5829 = vmatprep.subr.bf16.mxu0 %v7667_v27 }
0x228e   : > { %5889 = vmatpush1.bf16.msra.mxu1 %v7604_v29  ;;  %v7666_v29 = vcombine.low %v9531_v24, %v9536_v25 }
0x228f   : > { %5890 = vmatprep.subr.bf16.mxu1 %v7613_v37  ;;  %v3545_v37 = vrot.slane %v9564_v35, %v9559_v34 }
0x2292   : > { %5891 = vmatpush1.bf16.msra.mxu1 %v7612_v38  ;;  %v9572_v38 = vsub.s32 1, %v9556_v33 }
0x2293   : > { %5892 = vmatprep.subr.bf16.mxu1 %v7621_v47 }
0x2294   : > { %v3549_v41 = vrot.slane %v9564_v35, %v9572_v38  ;;  %v3581_v42 = vrot.slane %v9569_v36, %v9572_v38 }
0x2296   : > { %5893 = vmatpush1.bf16.msra.mxu1 %v7620_v46 }
0x2297   : > { %5894 = vmatprep.subr.bf16.mxu1 %v7629_v23  ;;  %v9589_v23 = vsub.s32 3, %v9556_v33 }
0x2299   : > { %v3557_v4 = vrot.slane %v9564_v35, %v9589_v23 }
0x229a   : > { %5895 = vmatpush1.bf16.msra.mxu1 %v7628_v55 }
0x229b   : > { %5896 = vmatprep.subr.bf16.mxu1 %v7637_v61 }
0x229e   : > { %5897 = vmatpush1.bf16.msra.mxu1 %v7636_v63 }
0x229f   : > { %5898 = vmatprep.subr.bf16.mxu1 %v7645_v5 }
0x22a2   : > { %5899 = vmatpush1.bf16.msra.mxu1 %v7644_v49  ;;  %v3597_v49 = vrot.slane %v9569_v36, %v9592_v56 }
0x22a3   : > { %5900 = vmatprep.subr.bf16.mxu1 %v7653_v13 }
0x22a6   : > { %5901 = vmatpush1.bf16.msra.mxu1 %v7652_v12 }
0x22a7   : > { %5902 = vmatprep.subr.bf16.mxu1 %v7661_v22 }
0x22aa   : > { %5903 = vmatpush1.bf16.msra.mxu1 %v7660_v21 }
0x22ab   : > { %5915 = vmatprep.subr.bf16.mxu1 %v7669_v31 }
0x2318   : > { %v3826_v43 = vpop.f32.mrb[52].mxu1  ;;  %v3990_v44 = vpop.f32.mrb[24].mxu0 }
0x2319   : > { %v3827_v45 = vadd.f32 %v3826_v43, %v3545_v37  ;;  %v3991_v46 = vadd.f32 %v3990_v44, %v3577_v40  ;;  %v3828_v47 = vpop.f32.mrb[53].mxu1  ;;  %v3992_v48 = vpop.f32.mrb[25].mxu0  ;;  %v3561_v37 = vrot.slane %v9564_v35, %v9586_v51 }
0x231a   : > { %v3829_v52 = vadd.f32 %v3828_v47, %v3549_v41  ;;  %v3993_v53 = vadd.f32 %v3992_v48, %v3581_v42  ;;  %v3830_v54 = vpop.f32.mrb[54].mxu1  ;;  %v3994_v55 = vpop.f32.mrb[26].mxu0  ;;  %v3565_v42 = vrot.slane %v9564_v35, %v9592_v56  ;;  %v9607_v48 = vsub.s32 6, %v9556_v33 }
0x231b   : > { %v4120_v57 = vmax.f32 %v3827_v45, 0.0  ;;  %v4128_v58 = vmax.f32 %v3991_v46, 0.0  ;;  %v3831_v59 = vpop.f32.mrb[55].mxu1  ;;  %v3995_v60 = vpop.f32.mrb[27].mxu0  ;;  %v9610_v54 = vsub.s32 7, %v9556_v33 }
0x231c   : > { %v4121_v62 = vmax.f32 %v3829_v52, 0.0  ;;  %v4129_v63 = vmax.f32 %v3993_v53, 0.0  ;;  %v3569_v60 = vrot.slane %v9564_v35, %v9607_v48 }
0x231d   : > { %v4136_v61 = vpack.c.bf16 %v4120_v57, %v4120_v57  ;;  %v4144_v0 = vpack.c.bf16 %v4128_v58, %v4128_v58  ;;  %v3605_v25 = vrot.slane %v9569_v36, %v9610_v54 }
0x231e   : > { %v4137_v2 = vpack.c.bf16 %v4121_v62, %v4121_v62  ;;  %v4145_v3 = vpack.c.bf16 %v4129_v63, %v4129_v63  ;;  %v3573_v63 = vrot.slane %v9564_v35, %v9610_v54  ;;  %v4344_v35 = vld [vmem:[%s10670_s19 + $0x440] sm:$0xff] }
0x231f   : > { %4152 = vst [vmem:[#allocation2] sm:$0x3] %v4136_v61  ;;  %v4176_v5 = vrot.slane %v4144_v0, 4 }
0x2320   : > { %4153 = vst [vmem:[#allocation2 + $0x8] sm:$0x3] %v4137_v2  ;;  %v4177_v6 = vrot.slane %v4145_v3, 4  ;;  %v3867_v7 = vpop.f32.mrb[56].mxu1  ;;  %v4072_v8 = vpop.f32.mrb[28].mxu0 }
0x2321   : > { %4184 = vst [vmem:[#allocation2] sm:$0x30] %v4176_v5  ;;  %v3868_v9 = vadd.f32 %v3867_v7, %v3553_v1  ;;  %v4073_v10 = vadd.f32 %v4072_v8, %v3593_v15  ;;  %v3869_v11 = vpop.f32.mrb[57].mxu1  ;;  %v4074_v12 = vpop.f32.mrb[29].mxu0  ;;  %v3585_v7 = vrot.slane %v9569_v36, %v9583_v50 }
0x2322   : > { %4185 = vst [vmem:[#allocation2 + $0x8] sm:$0x30] %v4177_v6  ;;  %v3870_v13 = vadd.f32 %v3869_v11, %v3557_v4  ;;  %v4075_v14 = vadd.f32 %v4074_v12, %v3597_v49  ;;  %v3871_v16 = vpop.f32.mrb[58].mxu1  ;;  %v4076_v17 = vpop.f32.mrb[30].mxu0  ;;  %v4345_v11 = vld [vmem:[%s10670_s19 + $0x448] sm:$0xff] }
0x2323   : > { %v4122_v18 = vmax.f32 %v3868_v9, 0.0  ;;  %v4132_v19 = vmax.f32 %v4073_v10, 0.0  ;;  %v3872_v20 = vpop.f32.mrb[59].mxu1  ;;  %v4077_v21 = vpop.f32.mrb[31].mxu0  ;;  %v3589_v9 = vrot.slane %v9569_v36, %v9589_v23  ;;  %v4348_v10 = vld [vmem:[%s10670_s19 + $0x460] sm:$0xff]  ;;  %v4349_v12 = vld [vmem:[%s10670_s19 + $0x468] sm:$0xff] }
0x2324   : > { %v4123_v22 = vmax.f32 %v3870_v13, 0.0  ;;  %v4133_v27 = vmax.f32 %v4075_v14, 0.0  ;;  %v7675_v20 = vcombine.high %v4344_v35, %v4348_v10  ;;  %v7677_v21 = vcombine.high %v4345_v11, %v4349_v12 }
0x2325   : > { %v4138_v31 = vpack.c.bf16 %v4122_v18, %v4122_v18  ;;  %v4148_v32 = vpack.c.bf16 %v4132_v19, %v4132_v19 }
0x2326   : > { %v4139_v40 = vpack.c.bf16 %v4123_v22, %v4123_v22  ;;  %v4149_v41 = vpack.c.bf16 %v4133_v27, %v4133_v27  ;;  %v4352_v22 = vld [vmem:[%s10670_s19 + $0x480] sm:$0xff] }
0x2327   : > { %4154 = vst [vmem:[#allocation2 + $0x10] sm:$0x3] %v4138_v31  ;;  %v4192_v43 = vrot.slane %v4148_v32, 2  ;;  %v4356_v27 = vld [vmem:[%s10670_s19 + $0x4a0] sm:$0xff] }
0x2328   : > { %4155 = vst [vmem:[#allocation2 + $0x18] sm:$0x3] %v4139_v40  ;;  %v4193_v44 = vrot.slane %v4149_v41, 2  ;;  %v3908_v45 = vpop.f32.mrb[60].mxu1  ;;  %v4353_v40 = vld [vmem:[%s10670_s19 + $0x488] sm:$0xff] }
0x2329   : > { %4200 = vst [vmem:[#allocation2] sm:$0xc0] %v4192_v43  ;;  %v3909_v46 = vadd.f32 %v3908_v45, %v3561_v37  ;;  %v3910_v47 = vpop.f32.mrb[61].mxu1  ;;  %v4357_v41 = vld [vmem:[%s10670_s19 + $0x4a8] sm:$0xff]  ;;  %v7674_v45 = vcombine.low %v4344_v35, %v4348_v10 }
0x232a   : > { %4201 = vst [vmem:[#allocation2 + $0x8] sm:$0xc0] %v4193_v44  ;;  %v3911_v52 = vadd.f32 %v3910_v47, %v3565_v42  ;;  %v3912_v53 = vpop.f32.mrb[62].mxu1  ;;  %v3601_v47 = vrot.slane %v9569_v36, %v9607_v48 }
0x232b   : > { %v4124_v55 = vmax.f32 %v3909_v46, 0.0  ;;  %v3913_v57 = vpop.f32.mrb[63].mxu1  ;;  %v7676_v46 = vcombine.low %v4345_v11, %v4349_v12  ;;  %v7683_v53 = vcombine.high %v4352_v22, %v4356_v27  ;;  %v4376_v11 = vld [vmem:[%s10670_s19 + $0x540] sm:$0xff] }
0x232c   : > { %v4125_v58 = vmax.f32 %v3911_v52, 0.0  ;;  %v4360_v57 = vld [vmem:[%s10670_s19 + $0x4c0] sm:$0xff] }
0x232d   : > { %v4140_v59 = vpack.c.bf16 %v4124_v55, %v4124_v55  ;;  %v7685_v55 = vcombine.high %v4353_v40, %v4357_v41 }
0x232e   : > { %v4141_v62 = vpack.c.bf16 %v4125_v58, %v4125_v58 }
0x232f   : > { %v4160_v61 = vrot.slane %v4140_v59, 6 }
0x2330   : > { %v4161_v0 = vrot.slane %v4141_v62, 6  ;;  %v3949_v1 = vpop.f32.mrb[64].mxu1  ;;  %v7684_v62 = vcombine.low %v4353_v40, %v4357_v41  ;;  %v4385_v40 = vld [vmem:[%s10670_s19 + $0x588] sm:$0xff] }
0x2331   : > { %4168 = vst [vmem:[#allocation2] sm:$0xc] %v4160_v61  ;;  %v3950_v15 = vadd.f32 %v3949_v1, %v3569_v60  ;;  %v3951_v2 = vpop.f32.mrb[65].mxu1  ;;  %v7682_v60 = vcombine.low %v4352_v22, %v4356_v27  ;;  %v7691_v61 = vcombine.high %v4360_v57, %v4364_v39  ;;  %v4368_v1 = vld [vmem:[%s10670_s19 + $0x500] sm:$0xff]  ;;  %v4389_v41 = vld [vmem:[%s10670_s19 + $0x5a8] sm:$0xff] }
0x2332   : > { %4169 = vst [vmem:[#allocation2 + $0x8] sm:$0xc] %v4161_v0  ;;  %v3952_v33 = vadd.f32 %v3951_v2, %v3573_v63  ;;  %v3953_v3 = vpop.f32.mrb[66].mxu1 }
0x2333   : > { %v4126_v4 = vmax.f32 %v3950_v15, 0.0  ;;  %v3954_v49 = vpop.f32.mrb[67].mxu1  ;;  %v4369_v3 = vld [vmem:[%s10670_s19 + $0x508] sm:$0xff] }
0x2334   : > { %v4127_v5 = vmax.f32 %v3952_v33, 0.0  ;;  %v4372_v33 = vld [vmem:[%s10670_s19 + $0x520] sm:$0xff] }
0x2335   : > { %v4142_v6 = vpack.c.bf16 %v4126_v4, %v4126_v4  ;;  %v4373_v4 = vld [vmem:[%s10670_s19 + $0x528] sm:$0xff] }
0x2336   : > { %v4143_v8 = vpack.c.bf16 %v4127_v5, %v4127_v5  ;;  %v7701_v10 = vcombine.high %v4369_v3, %v4373_v4 }
0x2337   : > { %v4162_v13 = vrot.slane %v4142_v6, 6 }
0x2338   : > { %v4163_v14 = vrot.slane %v4143_v8, 6  ;;  %v4031_v16 = vpop.f32.mrb[68].mxu1  ;;  %v9642_v37 = vld [vmem:[#allocation2] sm:$0xff] }
0x2339   : > { %4170 = vst [vmem:[#allocation2 + $0x10] sm:$0xc] %v4162_v13  ;;  %v4032_v17 = vadd.f32 %v4031_v16, %v3585_v7  ;;  %v4033_v18 = vpop.f32.mrb[69].mxu1  ;;  %v9632_v19 = vld [vmem:[#allocation2 + $0x8] sm:$0xff]  ;;  %v7690_v7 = vcombine.low %v4360_v57, %v4364_v39  ;;  %v4380_v13 = vld [vmem:[%s10670_s19 + $0x560] sm:$0xff]  ;;  %v7716_v57 = vcombine.low %v4385_v40, %v4389_v41 }
0x233a   : > { %4171 = vst [vmem:[#allocation2 + $0x18] sm:$0xc] %v4163_v14  ;;  %v4034_v31 = vadd.f32 %v4033_v18, %v3589_v9  ;;  %v4035_v32 = vpop.f32.mrb[70].mxu1  ;;  %5818 = vmatprep.mubr.bf16.mxu0 %v9632_v19  ;;  %5904 = vmatprep.mubr.bf16.mxu1 %v9632_v19  ;;  %v7699_v9 = vcombine.high %v4368_v1, %v4372_v33  ;;  %v4377_v14 = vld [vmem:[%s10670_s19 + $0x548] sm:$0xff] }
0x233b   : > { %v4130_v42 = vmax.f32 %v4032_v17, 0.0  ;;  %v4036_v43 = vpop.f32.mrb[71].mxu1  ;;  %5819 = vmatmul.mubr.bf16.vlgmr.msra.gmra.mrb[32].mxu0 %v9642_v37  ;;  %5905 = vmatmul.mubr.bf16.vlgmr.msra.gmra.mrb[76].mxu1 %v9642_v37  ;;  %v4381_v16 = vld [vmem:[%s10670_s19 + $0x568] sm:$0xff]  ;;  %v7707_v22 = vcombine.high %v4376_v11, %v4380_v13  ;;  %v4388_v32 = vld [vmem:[%s10670_s19 + $0x5a0] sm:$0xff] }
0x233c   : > { %v4131_v44 = vmax.f32 %v4034_v31, 0.0  ;;  %5830 = vmatpush1.bf16.msra.mxu0 %v7666_v29  ;;  %5916 = vmatpush1.bf16.msra.mxu1 %v7668_v30  ;;  %v4365_v29 = vld [vmem:[%s10670_s19 + $0x4e8] sm:$0xff]  ;;  %v7709_v27 = vcombine.high %v4377_v14, %v4381_v16  ;;  %v4384_v31 = vld [vmem:[%s10670_s19 + $0x580] sm:$0xff]  ;;  %v7708_v43 = vcombine.low %v4377_v14, %v4381_v16 }
0x233d   : > { %v4146_v52 = vpack.c.bf16 %v4130_v42, %v4130_v42  ;;  %5831 = vmatprep.subr.bf16.mxu0 %v7675_v20  ;;  %5917 = vmatprep.subr.bf16.mxu1 %v7677_v21  ;;  %v7693_v0 = vcombine.high %v4361_v28, %v4365_v29  ;;  %v7692_v35 = vcombine.low %v4361_v28, %v4365_v29  ;;  %v4400_v28 = vld [vmem:[%s10670_s19 + $0x600] sm:$0xff] }
0x233e   : > { %v4147_v24 = vpack.c.bf16 %v4131_v44, %v4131_v44  ;;  %v7698_v20 = vcombine.low %v4368_v1, %v4372_v33  ;;  %v7700_v21 = vcombine.low %v4369_v3, %v4373_v4  ;;  %v7706_v42 = vcombine.low %v4376_v11, %v4380_v13  ;;  %v4404_v29 = vld [vmem:[%s10670_s19 + $0x620] sm:$0xff]  ;;  %v4413_v1 = vld [vmem:[%s10670_s19 + $0x668] sm:$0xff] }
0x233f   : > { %v4178_v30 = vrot.slane %v4146_v52, 4  ;;  %v7715_v44 = vcombine.high %v4384_v31, %v4388_v32  ;;  %v4393_v52 = vld [vmem:[%s10670_s19 + $0x5c8] sm:$0xff]  ;;  %v4416_v4 = vld [vmem:[%s10670_s19 + $0x680] sm:$0xff] }
0x2340   : > { %v4179_v58 = vrot.slane %v4147_v24, 4  ;;  %5832 = vmatpush1.bf16.msra.mxu0 %v7674_v45  ;;  %5918 = vmatpush1.bf16.msra.mxu1 %v7676_v46  ;;  %v4113_v59 = vpop.f32.mrb[72].mxu1  ;;  %v7717_v45 = vcombine.high %v4385_v40, %v4389_v41  ;;  %v4392_v46 = vld [vmem:[%s10670_s19 + $0x5c0] sm:$0xff]  ;;  %v4429_v13 = vld [vmem:[%s10670_s19 + $0x6e8] sm:$0xff] }
0x2341   : > { %4186 = vst [vmem:[#allocation2 + $0x10] sm:$0x30] %v4178_v30  ;;  %v4114_v36 = vadd.f32 %v4113_v59, %v3601_v47  ;;  %v4115_v63 = vpop.f32.mrb[73].mxu1  ;;  %5833 = vmatprep.subr.bf16.mxu0 %v7683_v53  ;;  %5919 = vmatprep.subr.bf16.mxu1 %v7685_v55  ;;  %v4396_v47 = vld [vmem:[%s10670_s19 + $0x5e0] sm:$0xff]  ;;  %v4397_v53 = vld [vmem:[%s10670_s19 + $0x5e8] sm:$0xff]  ;;  %v7714_v55 = vcombine.low %v4384_v31, %v4388_v32 }
0x2342   : > { %4187 = vst [vmem:[#allocation2 + $0x18] sm:$0x30] %v4179_v58  ;;  %v4116_v15 = vadd.f32 %v4115_v63, %v3605_v25  ;;  %v4117_v2 = vpop.f32.mrb[74].mxu1  ;;  %v7723_v25 = vcombine.high %v4392_v46, %v4396_v47  ;;  %v7725_v39 = vcombine.high %v4393_v52, %v4397_v53  ;;  %v4401_v30 = vld [vmem:[%s10670_s19 + $0x608] sm:$0xff]  ;;  %v7722_v59 = vcombine.low %v4392_v46, %v4396_v47  ;;  %v4408_v63 = vld [vmem:[%s10670_s19 + $0x640] sm:$0xff] }
0x2343   : > { %v4134_v49 = vmax.f32 %v4114_v36, 0.0  ;;  %v4118_v5 = vpop.f32.mrb[75].mxu1  ;;  %v4405_v58 = vld [vmem:[%s10670_s19 + $0x628] sm:$0xff]  ;;  %v4428_v11 = vld [vmem:[%s10670_s19 + $0x6e0] sm:$0xff] }
0x2344   : > { %v4135_v6 = vmax.f32 %v4116_v15, 0.0  ;;  %5834 = vmatpush1.bf16.msra.mxu0 %v7682_v60  ;;  %5920 = vmatpush1.bf16.msra.mxu1 %v7684_v62  ;;  %v7724_v60 = vcombine.low %v4393_v52, %v4397_v53  ;;  %v7731_v62 = vcombine.high %v4400_v28, %v4404_v29  ;;  %v7733_v36 = vcombine.high %v4401_v30, %v4405_v58  ;;  %v4417_v5 = vld [vmem:[%s10670_s19 + $0x688] sm:$0xff] }
0x2345   : > { %v4150_v8 = vpack.c.bf16 %v4134_v49, %v4134_v49  ;;  %5835 = vmatprep.subr.bf16.mxu0 %v7691_v61  ;;  %5921 = vmatprep.subr.bf16.mxu1 %v7693_v0  ;;  %v4412_v61 = vld [vmem:[%s10670_s19 + $0x660] sm:$0xff]  ;;  %v4409_v0 = vld [vmem:[%s10670_s19 + $0x648] sm:$0xff]  ;;  %v7730_v15 = vcombine.low %v4400_v28, %v4404_v29  ;;  %v7732_v2 = vcombine.low %v4401_v30, %v4405_v58 }
0x2346   : > { %v4151_v12 = vpack.c.bf16 %v4135_v6, %v4135_v6  ;;  %v7739_v33 = vcombine.high %v4408_v63, %v4412_v61  ;;  %v7741_v3 = vcombine.high %v4409_v0, %v4413_v1  ;;  %v4420_v49 = vld [vmem:[%s10670_s19 + $0x6a0] sm:$0xff]  ;;  %v4421_v6 = vld [vmem:[%s10670_s19 + $0x6a8] sm:$0xff] }
0x2347   : > { %v4194_v17 = vrot.slane %v4150_v8, 2  ;;  %v7747_v8 = vcombine.high %v4416_v4, %v4420_v49  ;;  %v7746_v14 = vcombine.low %v4416_v4, %v4420_v49  ;;  %v7748_v16 = vcombine.low %v4417_v5, %v4421_v6 }
0x2348   : > { %v4195_v18 = vrot.slane %v4151_v12, 2  ;;  %5836 = vmatpush1.bf16.msra.mxu0 %v7690_v7  ;;  %5922 = vmatpush1.bf16.msra.mxu1 %v7692_v35  ;;  %v7738_v7 = vcombine.low %v4408_v63, %v4412_v61  ;;  %v7740_v35 = vcombine.low %v4409_v0, %v4413_v1  ;;  %v4425_v12 = vld [vmem:[%s10670_s19 + $0x6c8] sm:$0xff] }
0x2349   : > { %4202 = vst [vmem:[#allocation2 + $0x10] sm:$0xc0] %v4194_v17  ;;  %5837 = vmatprep.subr.bf16.mxu0 %v7699_v9  ;;  %5923 = vmatprep.subr.bf16.mxu1 %v7701_v10  ;;  %v7749_v9 = vcombine.high %v4417_v5, %v4421_v6  ;;  %v4424_v10 = vld [vmem:[%s10670_s19 + $0x6c0] sm:$0xff]  ;;  %v7756_v32 = vcombine.low %v4425_v12, %v4429_v13 }
0x234a   : > { %4203 = vst [vmem:[#allocation2 + $0x18] sm:$0xc0] %v4195_v18  ;;  %v7755_v17 = vcombine.high %v4424_v10, %v4428_v11  ;;  %v7757_v18 = vcombine.high %v4425_v12, %v4429_v13  ;;  %v7754_v31 = vcombine.low %v4424_v10, %v4428_v11 }
0x234c   : > { %5838 = vmatpush1.bf16.msra.mxu0 %v7698_v20  ;;  %5924 = vmatpush1.bf16.msra.mxu1 %v7700_v21  ;;  %v4432_v20 = vld [vmem:[%s10670_s19 + $0x700] sm:$0xff] }
0x234d   : > { %5839 = vmatprep.subr.bf16.mxu0 %v7707_v22  ;;  %5925 = vmatprep.subr.bf16.mxu1 %v7709_v27  ;;  %v4436_v21 = vld [vmem:[%s10670_s19 + $0x720] sm:$0xff]  ;;  %v4433_v22 = vld [vmem:[%s10670_s19 + $0x708] sm:$0xff] }
0x234e   : > { %v4437_v27 = vld [vmem:[%s10670_s19 + $0x728] sm:$0xff]  ;;  %v7763_v40 = vcombine.high %v4432_v20, %v4436_v21  ;;  %v7762_v46 = vcombine.low %v4432_v20, %v4436_v21  ;;  %v4231_v20 = vld [vmem:[%s10670_s19 + $0xb8] sm:$0xff] }
0x234f   : > { %v7765_v41 = vcombine.high %v4433_v22, %v4437_v27  ;;  %v7764_v47 = vcombine.low %v4433_v22, %v4437_v27 }
0x2350   : > { %5840 = vmatpush1.bf16.msra.mxu0 %v7706_v42  ;;  %5926 = vmatpush1.bf16.msra.mxu1 %v7708_v43  ;;  %v4440_v42 = vld [vmem:[%s10670_s19 + $0x740] sm:$0xff]  ;;  %v9846_v12 = vld [vmem:[#allocation2 + $0x10] sm:$0xff] }
0x2351   : > { %5841 = vmatprep.subr.bf16.mxu0 %v7715_v44  ;;  %v9722_v24 = vld [vmem:[#allocation2 + $0x18] sm:$0xff]  ;;  %5927 = vmatprep.subr.bf16.mxu1 %v7717_v45  ;;  %v4444_v43 = vld [vmem:[%s10670_s19 + $0x760] sm:$0xff]  ;;  %v4441_v44 = vld [vmem:[%s10670_s19 + $0x748] sm:$0xff] }
0x2352   : > { %5861 = vmatprep.mubr.bf16.mxu0 %v9722_v24  ;;  %5947 = vmatprep.mubr.bf16.mxu1 %v9722_v24  ;;  %v4445_v45 = vld [vmem:[%s10670_s19 + $0x768] sm:$0xff]  ;;  %v7771_v52 = vcombine.high %v4440_v42, %v4444_v43  ;;  %v7770_v28 = vcombine.low %v4440_v42, %v4444_v43 }
0x2353   : > { %v7773_v53 = vcombine.high %v4441_v44, %v4445_v45  ;;  %v7772_v29 = vcombine.low %v4441_v44, %v4445_v45 }
0x2354   : > { %5842 = vmatpush1.bf16.msra.mxu0 %v7714_v55  ;;  %5928 = vmatpush1.bf16.msra.mxu1 %v7716_v57  ;;  %v4448_v55 = vld [vmem:[%s10670_s19 + $0x780] sm:$0xff] }
0x2355   : > { %5843 = vmatprep.subr.bf16.mxu0 %v7723_v25  ;;  %5929 = vmatprep.subr.bf16.mxu1 %v7725_v39  ;;  %v4452_v57 = vld [vmem:[%s10670_s19 + $0x7a0] sm:$0xff]  ;;  %v4449_v25 = vld [vmem:[%s10670_s19 + $0x788] sm:$0xff] }
0x2356   : > { %v4453_v39 = vld [vmem:[%s10670_s19 + $0x7a8] sm:$0xff]  ;;  %v7779_v30 = vcombine.high %v4448_v55, %v4452_v57  ;;  %v7778_v63 = vcombine.low %v4448_v55, %v4452_v57 }
0x2357   : > { %v7781_v58 = vcombine.high %v4449_v25, %v4453_v39  ;;  %v7780_v61 = vcombine.low %v4449_v25, %v4453_v39 }
0x2358   : > { %5844 = vmatpush1.bf16.msra.mxu0 %v7722_v59  ;;  %5930 = vmatpush1.bf16.msra.mxu1 %v7724_v60  ;;  %v4456_v59 = vld [vmem:[%s10670_s19 + $0x7c0] sm:$0xff] }
0x2359   : > { %5845 = vmatprep.subr.bf16.mxu0 %v7731_v62  ;;  %5931 = vmatprep.subr.bf16.mxu1 %v7733_v36  ;;  %v4460_v60 = vld [vmem:[%s10670_s19 + $0x7e0] sm:$0xff]  ;;  %v4457_v62 = vld [vmem:[%s10670_s19 + $0x7c8] sm:$0xff] }
0x235a   : > { %v4461_v36 = vld [vmem:[%s10670_s19 + $0x7e8] sm:$0xff]  ;;  %v7787_v0 = vcombine.high %v4456_v59, %v4460_v60  ;;  %v7786_v4 = vcombine.low %v4456_v59, %v4460_v60 }
0x235b   : > { %v7789_v1 = vcombine.high %v4457_v62, %v4461_v36  ;;  %v7788_v49 = vcombine.low %v4457_v62, %v4461_v36 }
0x235c   : > { %5846 = vmatpush1.bf16.msra.mxu0 %v7730_v15  ;;  %5932 = vmatpush1.bf16.msra.mxu1 %v7732_v2  ;;  %v4210_v15 = vld [vmem:[%s10670_s19 + $0x10] sm:$0xff] }
0x235d   : > { %5847 = vmatprep.subr.bf16.mxu0 %v7739_v33  ;;  %5933 = vmatprep.subr.bf16.mxu1 %v7741_v3  ;;  %v4214_v2 = vld [vmem:[%s10670_s19 + $0x30] sm:$0xff]  ;;  %v4211_v33 = vld [vmem:[%s10670_s19 + $0x18] sm:$0xff] }
0x235e   : > { %v4215_v3 = vld [vmem:[%s10670_s19 + $0x38] sm:$0xff]  ;;  %v7543_v5 = vcombine.high %v4210_v15, %v4214_v2  ;;  %v7542_v10 = vcombine.low %v4210_v15, %v4214_v2 }
0x235f   : > { %v7545_v6 = vcombine.high %v4211_v33, %v4215_v3  ;;  %v7544_v11 = vcombine.low %v4211_v33, %v4215_v3 }
0x2360   : > { %5848 = vmatpush1.bf16.msra.mxu0 %v7738_v7  ;;  %5934 = vmatpush1.bf16.msra.mxu1 %v7740_v35  ;;  %v4218_v7 = vld [vmem:[%s10670_s19 + $0x50] sm:$0xff] }
0x2361   : > { %5849 = vmatprep.subr.bf16.mxu0 %v7747_v8  ;;  %5935 = vmatprep.subr.bf16.mxu1 %v7749_v9  ;;  %v4222_v35 = vld [vmem:[%s10670_s19 + $0x70] sm:$0xff]  ;;  %v4219_v8 = vld [vmem:[%s10670_s19 + $0x58] sm:$0xff] }
0x2362   : > { %v4223_v9 = vld [vmem:[%s10670_s19 + $0x78] sm:$0xff]  ;;  %v7551_v13 = vcombine.high %v4218_v7, %v4222_v35  ;;  %v7550_v21 = vcombine.low %v4218_v7, %v4222_v35 }
0x2363   : > { %v7552_v22 = vcombine.low %v4219_v8, %v4223_v9 }
0x2364   : > { %5850 = vmatpush1.bf16.msra.mxu0 %v7746_v14  ;;  %5936 = vmatpush1.bf16.msra.mxu1 %v7748_v16  ;;  %v7553_v14 = vcombine.high %v4219_v8, %v4223_v9  ;;  %v4226_v16 = vld [vmem:[%s10670_s19 + $0x90] sm:$0xff] }
0x2365   : > { %5851 = vmatprep.subr.bf16.mxu0 %v7755_v17  ;;  %5937 = vmatprep.subr.bf16.mxu1 %v7757_v18  ;;  %v4230_v17 = vld [vmem:[%s10670_s19 + $0xb0] sm:$0xff]  ;;  %v4227_v18 = vld [vmem:[%s10670_s19 + $0x98] sm:$0xff] }
0x2366   : > { %v7559_v27 = vcombine.high %v4226_v16, %v4230_v17  ;;  %v7558_v42 = vcombine.low %v4226_v16, %v4230_v17  ;;  %v7560_v43 = vcombine.low %v4227_v18, %v4231_v20 }
0x2368   : > { %5852 = vmatpush1.bf16.msra.mxu0 %v7754_v31  ;;  %5938 = vmatpush1.bf16.msra.mxu1 %v7756_v32  ;;  %v7561_v31 = vcombine.high %v4227_v18, %v4231_v20  ;;  %v4234_v32 = vld [vmem:[%s10670_s19 + $0xd0] sm:$0xff] }
0x2369   : > { %5853 = vmatprep.subr.bf16.mxu0 %v7763_v40  ;;  %5939 = vmatprep.subr.bf16.mxu1 %v7765_v41  ;;  %v4238_v40 = vld [vmem:[%s10670_s19 + $0xf0] sm:$0xff]  ;;  %v4235_v41 = vld [vmem:[%s10670_s19 + $0xd8] sm:$0xff] }
0x236a   : > { %v7567_v44 = vcombine.high %v4234_v32, %v4238_v40  ;;  %v7566_v55 = vcombine.low %v4234_v32, %v4238_v40 }
0x236c   : > { %5854 = vmatpush1.bf16.msra.mxu0 %v7762_v46  ;;  %5940 = vmatpush1.bf16.msra.mxu1 %v7764_v47  ;;  %v4242_v46 = vld [vmem:[%s10670_s19 + $0x110] sm:$0xff] }
0x236d   : > { %5855 = vmatprep.subr.bf16.mxu0 %v7771_v52  ;;  %5941 = vmatprep.subr.bf16.mxu1 %v7773_v53  ;;  %v4246_v47 = vld [vmem:[%s10670_s19 + $0x130] sm:$0xff]  ;;  %v4243_v52 = vld [vmem:[%s10670_s19 + $0x118] sm:$0xff] }
0x236e   : > { %v4247_v53 = vld [vmem:[%s10670_s19 + $0x138] sm:$0xff]  ;;  %v7575_v25 = vcombine.high %v4242_v46, %v4246_v47  ;;  %v7574_v59 = vcombine.low %v4242_v46, %v4246_v47 }
0x236f   : > { %v7577_v39 = vcombine.high %v4243_v52, %v4247_v53  ;;  %v7576_v60 = vcombine.low %v4243_v52, %v4247_v53 }
0x2370   : > { %5856 = vmatpush1.bf16.msra.mxu0 %v7770_v28  ;;  %5942 = vmatpush1.bf16.msra.mxu1 %v7772_v29  ;;  %v4250_v28 = vld [vmem:[%s10670_s19 + $0x150] sm:$0xff] }
0x2371   : > { %5857 = vmatprep.subr.bf16.mxu0 %v7779_v30  ;;  %5943 = vmatprep.subr.bf16.mxu1 %v7781_v58  ;;  %v4254_v29 = vld [vmem:[%s10670_s19 + $0x170] sm:$0xff]  ;;  %v4251_v30 = vld [vmem:[%s10670_s19 + $0x158] sm:$0xff] }
0x2372   : > { %v4255_v58 = vld [vmem:[%s10670_s19 + $0x178] sm:$0xff]  ;;  %v7583_v62 = vcombine.high %v4250_v28, %v4254_v29  ;;  %v7582_v15 = vcombine.low %v4250_v28, %v4254_v29 }
0x2373   : > { %v7585_v36 = vcombine.high %v4251_v30, %v4255_v58  ;;  %v7584_v2 = vcombine.low %v4251_v30, %v4255_v58 }
0x2374   : > { %5858 = vmatpush1.bf16.msra.mxu0 %v7778_v63  ;;  %5944 = vmatpush1.bf16.msra.mxu1 %v7780_v61  ;;  %v4258_v63 = vld [vmem:[%s10670_s19 + $0x190] sm:$0xff] }
0x2375   : > { %5859 = vmatprep.subr.bf16.mxu0 %v7787_v0  ;;  %5945 = vmatprep.subr.bf16.mxu1 %v7789_v1  ;;  %v4262_v61 = vld [vmem:[%s10670_s19 + $0x1b0] sm:$0xff]  ;;  %v4259_v0 = vld [vmem:[%s10670_s19 + $0x198] sm:$0xff] }
0x2376   : > { %v4263_v1 = vld [vmem:[%s10670_s19 + $0x1b8] sm:$0xff]  ;;  %v7591_v33 = vcombine.high %v4258_v63, %v4262_v61  ;;  %v7590_v7 = vcombine.low %v4258_v63, %v4262_v61 }
0x2377   : > { %v7593_v3 = vcombine.high %v4259_v0, %v4263_v1  ;;  %v7592_v35 = vcombine.low %v4259_v0, %v4263_v1 }
0x2378   : > { %5860 = vmatpush1.bf16.msra.mxu0 %v7786_v4  ;;  %5946 = vmatpush1.bf16.msra.mxu1 %v7788_v49  ;;  %v4266_v4 = vld [vmem:[%s10670_s19 + $0x1d0] sm:$0xff] }
0x2379   : > { %5958 = vmatprep.subr.bf16.mxu0 %v7543_v5  ;;  %6044 = vmatprep.subr.bf16.mxu1 %v7545_v6  ;;  %v4270_v49 = vld [vmem:[%s10670_s19 + $0x1f0] sm:$0xff]  ;;  %v4267_v5 = vld [vmem:[%s10670_s19 + $0x1d8] sm:$0xff] }
0x237a   : > { %v4271_v6 = vld [vmem:[%s10670_s19 + $0x1f8] sm:$0xff]  ;;  %v7599_v8 = vcombine.high %v4266_v4, %v4270_v49  ;;  %v7598_v16 = vcombine.low %v4266_v4, %v4270_v49 }
0x237b   : > { %5862 = vmatmul.mubr.bf16.vlgmr.msra.gmra.mrb[32].mxu0 %v9846_v12  ;;  %5948 = vmatmul.mubr.bf16.vlgmr.msra.gmra.mrb[76].mxu1 %v9846_v12  ;;  %v7601_v9 = vcombine.high %v4267_v5, %v4271_v6  ;;  %v7600_v17 = vcombine.low %v4267_v5, %v4271_v6 }
0x237c   : > { %5959 = vmatpush1.bf16.msra.mxu0 %v7542_v10  ;;  %5990 = vmatprep.mubr.bf16.mxu0 %v9632_v19  ;;  %v4274_v10 = vld [vmem:[%s10670_s19 + $0x210] sm:$0xff] }
0x237d   : > { %6045 = vmatpush1.bf16.msra.mxu1 %v7544_v11  ;;  %6076 = vmatprep.mubr.bf16.mxu1 %v9632_v19  ;;  %v4239_v19 = vld [vmem:[%s10670_s19 + $0xf8] sm:$0xff]  ;;  %v4278_v11 = vld [vmem:[%s10670_s19 + $0x230] sm:$0xff] }
0x237e   : > { %5960 = vmatprep.subr.bf16.mxu0 %v7551_v13  ;;  %6046 = vmatprep.subr.bf16.mxu1 %v7553_v14  ;;  %v7569_v45 = vcombine.high %v4235_v41, %v4239_v19  ;;  %v7568_v57 = vcombine.low %v4235_v41, %v4239_v19  ;;  %v4275_v13 = vld [vmem:[%s10670_s19 + $0x218] sm:$0xff]  ;;  %v7607_v18 = vcombine.high %v4274_v10, %v4278_v11 }
0x237f   : > { %v4279_v14 = vld [vmem:[%s10670_s19 + $0x238] sm:$0xff]  ;;  %v7606_v32 = vcombine.low %v4274_v10, %v4278_v11 }
0x2380   : > { %5961 = vmatpush1.bf16.msra.mxu0 %v7550_v21  ;;  %v7609_v20 = vcombine.high %v4275_v13, %v4279_v14  ;;  %v4282_v21 = vld [vmem:[%s10670_s19 + $0x250] sm:$0xff]  ;;  %v7608_v40 = vcombine.low %v4275_v13, %v4279_v14 }
0x2381   : > { %6047 = vmatpush1.bf16.msra.mxu1 %v7552_v22  ;;  %5962 = vmatprep.subr.bf16.mxu0 %v7559_v27  ;;  %v4286_v22 = vld [vmem:[%s10670_s19 + $0x270] sm:$0xff]  ;;  %v4283_v27 = vld [vmem:[%s10670_s19 + $0x258] sm:$0xff] }
0x2382   : > { %6048 = vmatprep.subr.bf16.mxu1 %v7561_v31  ;;  %v4287_v31 = vld [vmem:[%s10670_s19 + $0x278] sm:$0xff]  ;;  %v7615_v41 = vcombine.high %v4282_v21, %v4286_v22  ;;  %v7614_v46 = vcombine.low %v4282_v21, %v4286_v22 }
0x2383   : > { %v7617_v19 = vcombine.high %v4283_v27, %v4287_v31  ;;  %v7616_v47 = vcombine.low %v4283_v27, %v4287_v31 }
0x2384   : > { %5963 = vmatpush1.bf16.msra.mxu0 %v7558_v42  ;;  %v4290_v42 = vld [vmem:[%s10670_s19 + $0x290] sm:$0xff] }
0x2385   : > { %6049 = vmatpush1.bf16.msra.mxu1 %v7560_v43  ;;  %5964 = vmatprep.subr.bf16.mxu0 %v7567_v44  ;;  %v4294_v43 = vld [vmem:[%s10670_s19 + $0x2b0] sm:$0xff]  ;;  %v4291_v44 = vld [vmem:[%s10670_s19 + $0x298] sm:$0xff] }
0x2386   : > { %6050 = vmatprep.subr.bf16.mxu1 %v7569_v45  ;;  %v4295_v45 = vld [vmem:[%s10670_s19 + $0x2b8] sm:$0xff]  ;;  %v7623_v52 = vcombine.high %v4290_v42, %v4294_v43  ;;  %v7622_v28 = vcombine.low %v4290_v42, %v4294_v43 }
0x2387   : > { %v7625_v53 = vcombine.high %v4291_v44, %v4295_v45  ;;  %v7624_v29 = vcombine.low %v4291_v44, %v4295_v45 }
0x2388   : > { %5965 = vmatpush1.bf16.msra.mxu0 %v7566_v55  ;;  %v4298_v55 = vld [vmem:[%s10670_s19 + $0x2d0] sm:$0xff] }
0x2389   : > { %6051 = vmatpush1.bf16.msra.mxu1 %v7568_v57  ;;  %5966 = vmatprep.subr.bf16.mxu0 %v7575_v25  ;;  %v4302_v57 = vld [vmem:[%s10670_s19 + $0x2f0] sm:$0xff]  ;;  %v4299_v25 = vld [vmem:[%s10670_s19 + $0x2d8] sm:$0xff] }
0x238a   : > { %6052 = vmatprep.subr.bf16.mxu1 %v7577_v39  ;;  %v4303_v39 = vld [vmem:[%s10670_s19 + $0x2f8] sm:$0xff]  ;;  %v7631_v30 = vcombine.high %v4298_v55, %v4302_v57  ;;  %v7630_v63 = vcombine.low %v4298_v55, %v4302_v57 }
0x238b   : > { %v7633_v58 = vcombine.high %v4299_v25, %v4303_v39  ;;  %v7632_v61 = vcombine.low %v4299_v25, %v4303_v39  ;;  %v4351_v55 = vld [vmem:[%s10670_s19 + $0x478] sm:$0xff]  ;;  %v4354_v39 = vld [vmem:[%s10670_s19 + $0x490] sm:$0xff] }
0x238c   : > { %5967 = vmatpush1.bf16.msra.mxu0 %v7574_v59  ;;  %v4306_v59 = vld [vmem:[%s10670_s19 + $0x310] sm:$0xff] }
0x238d   : > { %6053 = vmatpush1.bf16.msra.mxu1 %v7576_v60  ;;  %5968 = vmatprep.subr.bf16.mxu0 %v7583_v62  ;;  %v4310_v60 = vld [vmem:[%s10670_s19 + $0x330] sm:$0xff]  ;;  %v4307_v62 = vld [vmem:[%s10670_s19 + $0x318] sm:$0xff] }
0x238e   : > { %6054 = vmatprep.subr.bf16.mxu1 %v7585_v36  ;;  %v4311_v36 = vld [vmem:[%s10670_s19 + $0x338] sm:$0xff]  ;;  %v7639_v0 = vcombine.high %v4306_v59, %v4310_v60  ;;  %v7638_v4 = vcombine.low %v4306_v59, %v4310_v60 }
0x238f   : > { %v7641_v1 = vcombine.high %v4307_v62, %v4311_v36  ;;  %v7640_v49 = vcombine.low %v4307_v62, %v4311_v36 }
0x2390   : > { %5969 = vmatpush1.bf16.msra.mxu0 %v7582_v15  ;;  %v4314_v15 = vld [vmem:[%s10670_s19 + $0x350] sm:$0xff] }
0x2391   : > { %6055 = vmatpush1.bf16.msra.mxu1 %v7584_v2  ;;  %5970 = vmatprep.subr.bf16.mxu0 %v7591_v33  ;;  %v4318_v2 = vld [vmem:[%s10670_s19 + $0x370] sm:$0xff]  ;;  %v4315_v33 = vld [vmem:[%s10670_s19 + $0x358] sm:$0xff] }
0x2392   : > { %6056 = vmatprep.subr.bf16.mxu1 %v7593_v3  ;;  %v4319_v3 = vld [vmem:[%s10670_s19 + $0x378] sm:$0xff]  ;;  %v7647_v5 = vcombine.high %v4314_v15, %v4318_v2  ;;  %v7646_v10 = vcombine.low %v4314_v15, %v4318_v2 }
0x2393   : > { %v7649_v6 = vcombine.high %v4315_v33, %v4319_v3  ;;  %v7648_v11 = vcombine.low %v4315_v33, %v4319_v3  ;;  %v4370_v33 = vld [vmem:[%s10670_s19 + $0x510] sm:$0xff] }
0x2394   : > { %5971 = vmatpush1.bf16.msra.mxu0 %v7590_v7  ;;  %v4322_v7 = vld [vmem:[%s10670_s19 + $0x390] sm:$0xff] }
0x2395   : > { %6057 = vmatpush1.bf16.msra.mxu1 %v7592_v35  ;;  %5972 = vmatprep.subr.bf16.mxu0 %v7599_v8  ;;  %v4326_v35 = vld [vmem:[%s10670_s19 + $0x3b0] sm:$0xff]  ;;  %v4323_v8 = vld [vmem:[%s10670_s19 + $0x398] sm:$0xff] }
0x2396   : > { %6058 = vmatprep.subr.bf16.mxu1 %v7601_v9  ;;  %v4327_v9 = vld [vmem:[%s10670_s19 + $0x3b8] sm:$0xff]  ;;  %v7655_v13 = vcombine.high %v4322_v7, %v4326_v35  ;;  %v7654_v21 = vcombine.low %v4322_v7, %v4326_v35  ;;  %v4374_v3 = vld [vmem:[%s10670_s19 + $0x530] sm:$0xff] }
0x2397   : > { %v7657_v14 = vcombine.high %v4323_v8, %v4327_v9  ;;  %v7656_v22 = vcombine.low %v4323_v8, %v4327_v9  ;;  %v7703_v7 = vcombine.high %v4370_v33, %v4374_v3  ;;  %v4378_v8 = vld [vmem:[%s10670_s19 + $0x550] sm:$0xff] }
0x2398   : > { %5973 = vmatpush1.bf16.msra.mxu0 %v7598_v16  ;;  %v4330_v16 = vld [vmem:[%s10670_s19 + $0x3d0] sm:$0xff] }
0x2399   : > { %6059 = vmatpush1.bf16.msra.mxu1 %v7600_v17  ;;  %5974 = vmatprep.subr.bf16.mxu0 %v7607_v18  ;;  %v4334_v17 = vld [vmem:[%s10670_s19 + $0x3f0] sm:$0xff]  ;;  %v4331_v18 = vld [vmem:[%s10670_s19 + $0x3d8] sm:$0xff] }
0x239a   : > { %6060 = vmatprep.subr.bf16.mxu1 %v7609_v20  ;;  %v4335_v20 = vld [vmem:[%s10670_s19 + $0x3f8] sm:$0xff]  ;;  %v7663_v27 = vcombine.high %v4330_v16, %v4334_v17  ;;  %v7662_v42 = vcombine.low %v4330_v16, %v4334_v17  ;;  %v4382_v9 = vld [vmem:[%s10670_s19 + $0x570] sm:$0xff] }
0x239b   : > { %v7665_v31 = vcombine.high %v4331_v18, %v4335_v20  ;;  %v7664_v43 = vcombine.low %v4331_v18, %v4335_v20  ;;  %v7711_v16 = vcombine.high %v4378_v8, %v4382_v9  ;;  %v4386_v18 = vld [vmem:[%s10670_s19 + $0x590] sm:$0xff] }
0x239c   : > { %5975 = vmatpush1.bf16.msra.mxu0 %v7606_v32  ;;  %v4338_v32 = vld [vmem:[%s10670_s19 + $0x410] sm:$0xff] }
0x239d   : > { %6061 = vmatpush1.bf16.msra.mxu1 %v7608_v40  ;;  %5976 = vmatprep.subr.bf16.mxu0 %v7615_v41  ;;  %v4342_v40 = vld [vmem:[%s10670_s19 + $0x430] sm:$0xff]  ;;  %v4339_v41 = vld [vmem:[%s10670_s19 + $0x418] sm:$0xff] }
0x239e   : > { %6062 = vmatprep.subr.bf16.mxu1 %v7617_v19  ;;  %v4343_v19 = vld [vmem:[%s10670_s19 + $0x438] sm:$0xff]  ;;  %v7671_v44 = vcombine.high %v4338_v32, %v4342_v40  ;;  %v4390_v20 = vld [vmem:[%s10670_s19 + $0x5b0] sm:$0xff] }
0x239f   : > { %v7673_v45 = vcombine.high %v4339_v41, %v4343_v19  ;;  %v7672_v57 = vcombine.low %v4339_v41, %v4343_v19  ;;  %v4394_v41 = vld [vmem:[%s10670_s19 + $0x5d0] sm:$0xff] }
0x23a0   : > { %5977 = vmatpush1.bf16.msra.mxu0 %v7614_v46  ;;  %v4346_v46 = vld [vmem:[%s10670_s19 + $0x450] sm:$0xff] }
0x23a1   : > { %6063 = vmatpush1.bf16.msra.mxu1 %v7616_v47  ;;  %5978 = vmatprep.subr.bf16.mxu0 %v7623_v52  ;;  %v4350_v47 = vld [vmem:[%s10670_s19 + $0x470] sm:$0xff]  ;;  %v7670_v52 = vcombine.low %v4338_v32, %v4342_v40  ;;  %v7719_v32 = vcombine.high %v4386_v18, %v4390_v20 }
0x23a2   : > { %6064 = vmatprep.subr.bf16.mxu1 %v7625_v53  ;;  %v4347_v53 = vld [vmem:[%s10670_s19 + $0x458] sm:$0xff]  ;;  %v7679_v25 = vcombine.high %v4346_v46, %v4350_v47  ;;  %v7678_v59 = vcombine.low %v4346_v46, %v4350_v47  ;;  %v4398_v19 = vld [vmem:[%s10670_s19 + $0x5f0] sm:$0xff] }
0x23a3   : > { %v7680_v60 = vcombine.low %v4347_v53, %v4351_v55  ;;  %v7727_v46 = vcombine.high %v4394_v41, %v4398_v19 }
0x23a4   : > { %5979 = vmatpush1.bf16.msra.mxu0 %v7622_v28  ;;  %v4358_v28 = vld [vmem:[%s10670_s19 + $0x4b0] sm:$0xff] }
0x23a5   : > { %6065 = vmatpush1.bf16.msra.mxu1 %v7624_v29  ;;  %5980 = vmatprep.subr.bf16.mxu0 %v7631_v30  ;;  %v7681_v29 = vcombine.high %v4347_v53, %v4351_v55  ;;  %v4355_v30 = vld [vmem:[%s10670_s19 + $0x498] sm:$0xff]  ;;  %v7687_v62 = vcombine.high %v4354_v39, %v4358_v28  ;;  %v4406_v53 = vld [vmem:[%s10670_s19 + $0x630] sm:$0xff] }
0x23a6   : > { %6066 = vmatprep.subr.bf16.mxu1 %v7633_v58  ;;  %v4359_v58 = vld [vmem:[%s10670_s19 + $0x4b8] sm:$0xff] }
0x23a7   : > { %v7689_v36 = vcombine.high %v4355_v30, %v4359_v58  ;;  %v4403_v55 = vld [vmem:[%s10670_s19 + $0x618] sm:$0xff] }
0x23a8   : > { %5981 = vmatpush1.bf16.msra.mxu0 %v7630_v63  ;;  %v4362_v63 = vld [vmem:[%s10670_s19 + $0x4d0] sm:$0xff] }
0x23a9   : > { %6067 = vmatpush1.bf16.msra.mxu1 %v7632_v61  ;;  %5982 = vmatprep.subr.bf16.mxu0 %v7639_v0  ;;  %v4366_v61 = vld [vmem:[%s10670_s19 + $0x4f0] sm:$0xff]  ;;  %v4367_v0 = vld [vmem:[%s10670_s19 + $0x4f8] sm:$0xff] }
0x23aa   : > { %6068 = vmatprep.subr.bf16.mxu1 %v7641_v1  ;;  %v7688_v1 = vcombine.low %v4355_v30, %v4359_v58  ;;  %v7695_v15 = vcombine.high %v4362_v63, %v4366_v61  ;;  %v4410_v30 = vld [vmem:[%s10670_s19 + $0x650] sm:$0xff] }
0x23ab   : > { %v4414_v58 = vld [vmem:[%s10670_s19 + $0x670] sm:$0xff] }
0x23ac   : > { %5983 = vmatpush1.bf16.msra.mxu0 %v7638_v4  ;;  %v4371_v4 = vld [vmem:[%s10670_s19 + $0x518] sm:$0xff] }
0x23ad   : > { %6069 = vmatpush1.bf16.msra.mxu1 %v7640_v49  ;;  %5984 = vmatprep.subr.bf16.mxu0 %v7647_v5  ;;  %v4375_v49 = vld [vmem:[%s10670_s19 + $0x538] sm:$0xff]  ;;  %v7694_v5 = vcombine.low %v4362_v63, %v4366_v61  ;;  %v7743_v63 = vcombine.high %v4410_v30, %v4414_v58 }
0x23ae   : > { %6070 = vmatprep.subr.bf16.mxu1 %v7649_v6  ;;  %v7705_v35 = vcombine.high %v4371_v4, %v4375_v49 }
0x23b0   : > { %5985 = vmatpush1.bf16.msra.mxu0 %v7646_v10  ;;  %v4379_v10 = vld [vmem:[%s10670_s19 + $0x558] sm:$0xff] }
0x23b1   : > { %6071 = vmatpush1.bf16.msra.mxu1 %v7648_v11  ;;  %5986 = vmatprep.subr.bf16.mxu0 %v7655_v13  ;;  %v4383_v11 = vld [vmem:[%s10670_s19 + $0x578] sm:$0xff]  ;;  %v7702_v13 = vcombine.low %v4370_v33, %v4374_v3 }
0x23b2   : > { %6072 = vmatprep.subr.bf16.mxu1 %v7657_v14  ;;  %v7704_v14 = vcombine.low %v4371_v4, %v4375_v49  ;;  %v7713_v17 = vcombine.high %v4379_v10, %v4383_v11  ;;  %v4426_v4 = vld [vmem:[%s10670_s19 + $0x6d0] sm:$0xff] }
0x23b3   : > { %v4430_v49 = vld [vmem:[%s10670_s19 + $0x6f0] sm:$0xff] }
0x23b4   : > { %5987 = vmatpush1.bf16.msra.mxu0 %v7654_v21  ;;  %v4387_v21 = vld [vmem:[%s10670_s19 + $0x598] sm:$0xff] }
0x23b5   : > { %6073 = vmatpush1.bf16.msra.mxu1 %v7656_v22  ;;  %5988 = vmatprep.subr.bf16.mxu0 %v7663_v27  ;;  %v4391_v22 = vld [vmem:[%s10670_s19 + $0x5b8] sm:$0xff]  ;;  %v7710_v27 = vcombine.low %v4378_v8, %v4382_v9  ;;  %v7759_v8 = vcombine.high %v4426_v4, %v4430_v49 }
0x23b6   : > { %6074 = vmatprep.subr.bf16.mxu1 %v7665_v31  ;;  %v7712_v31 = vcombine.low %v4379_v10, %v4383_v11  ;;  %v7721_v40 = vcombine.high %v4387_v21, %v4391_v22  ;;  %v4434_v10 = vld [vmem:[%s10670_s19 + $0x710] sm:$0xff] }
0x23b7   : > { %v4438_v11 = vld [vmem:[%s10670_s19 + $0x730] sm:$0xff] }
0x23b8   : > { %5989 = vmatpush1.bf16.msra.mxu0 %v7662_v42  ;;  %v4395_v42 = vld [vmem:[%s10670_s19 + $0x5d8] sm:$0xff] }
0x23b9   : > { %6075 = vmatpush1.bf16.msra.mxu1 %v7664_v43  ;;  %6001 = vmatprep.subr.bf16.mxu0 %v7671_v44  ;;  %v4399_v43 = vld [vmem:[%s10670_s19 + $0x5f8] sm:$0xff]  ;;  %v7718_v44 = vcombine.low %v4386_v18, %v4390_v20  ;;  %v7767_v18 = vcombine.high %v4434_v10, %v4438_v11 }
0x23ba   : > { %6087 = vmatprep.subr.bf16.mxu1 %v7673_v45  ;;  %v7720_v45 = vcombine.low %v4387_v21, %v4391_v22  ;;  %v7729_v47 = vcombine.high %v4395_v42, %v4399_v43  ;;  %v4442_v21 = vld [vmem:[%s10670_s19 + $0x750] sm:$0xff] }
0x23bb   : > { %5991 = vmatmul.mubr.bf16.vlgmr.msra.gmra.mrb[36].mxu0 %v9642_v37  ;;  %v4446_v22 = vld [vmem:[%s10670_s19 + $0x770] sm:$0xff] }
0x23bc   : > { %6077 = vmatmul.mubr.bf16.vlgmr.msra.gmra.mrb[80].mxu1 %v9642_v37  ;;  %6002 = vmatpush1.bf16.msra.mxu0 %v7670_v52  ;;  %v4363_v37 = vld [vmem:[%s10670_s19 + $0x4d8] sm:$0xff]  ;;  %v4402_v52 = vld [vmem:[%s10670_s19 + $0x610] sm:$0xff] }
0x23bd   : > { %6033 = vmatprep.mubr.bf16.mxu0 %v9722_v24  ;;  %6088 = vmatpush1.bf16.msra.mxu1 %v7672_v57  ;;  %v7697_v2 = vcombine.high %v4363_v37, %v4367_v0  ;;  %v7696_v6 = vcombine.low %v4363_v37, %v4367_v0  ;;  %v4407_v57 = vld [vmem:[%s10670_s19 + $0x638] sm:$0xff]  ;;  %v4418_v37 = vld [vmem:[%s10670_s19 + $0x690] sm:$0xff] }
0x23be   : > { %6119 = vmatprep.mubr.bf16.mxu1 %v9722_v24  ;;  %6003 = vmatprep.subr.bf16.mxu0 %v7679_v25  ;;  %v7686_v24 = vcombine.low %v4354_v39, %v4358_v28  ;;  %v7726_v25 = vcombine.low %v4394_v41, %v4398_v19  ;;  %v7728_v39 = vcombine.low %v4395_v42, %v4399_v43  ;;  %v4422_v0 = vld [vmem:[%s10670_s19 + $0x6b0] sm:$0xff] }
0x23bf   : > { %6089 = vmatprep.subr.bf16.mxu1 %v7681_v29  ;;  %v7735_v28 = vcombine.high %v4402_v52, %v4406_v53  ;;  %v7737_v29 = vcombine.high %v4403_v55, %v4407_v57  ;;  %v7751_v33 = vcombine.high %v4418_v37, %v4422_v0  ;;  %v7775_v41 = vcombine.high %v4442_v21, %v4446_v22  ;;  %v4450_v42 = vld [vmem:[%s10670_s19 + $0x790] sm:$0xff] }
0x23c0   : > { %6004 = vmatpush1.bf16.msra.mxu0 %v7678_v59  ;;  %v4411_v59 = vld [vmem:[%s10670_s19 + $0x658] sm:$0xff]  ;;  %v4454_v43 = vld [vmem:[%s10670_s19 + $0x7b0] sm:$0xff] }
0x23c1   : > { %6090 = vmatpush1.bf16.msra.mxu1 %v7680_v60  ;;  %6005 = vmatprep.subr.bf16.mxu0 %v7687_v62  ;;  %v4415_v60 = vld [vmem:[%s10670_s19 + $0x678] sm:$0xff]  ;;  %v7734_v62 = vcombine.low %v4402_v52, %v4406_v53  ;;  %v7783_v52 = vcombine.high %v4450_v42, %v4454_v43 }
0x23c2   : > { %6091 = vmatprep.subr.bf16.mxu1 %v7689_v36  ;;  %v7736_v36 = vcombine.low %v4403_v55, %v4407_v57  ;;  %v7745_v61 = vcombine.high %v4411_v59, %v4415_v60  ;;  %v4458_v55 = vld [vmem:[%s10670_s19 + $0x7d0] sm:$0xff] }
0x23c3   : > { %v4462_v57 = vld [vmem:[%s10670_s19 + $0x7f0] sm:$0xff] }
0x23c4   : > { %6006 = vmatpush1.bf16.msra.mxu0 %v7686_v24  ;;  %v4419_v24 = vld [vmem:[%s10670_s19 + $0x698] sm:$0xff] }
0x23c5   : > { %6092 = vmatpush1.bf16.msra.mxu1 %v7688_v1  ;;  %6007 = vmatprep.subr.bf16.mxu0 %v7695_v15  ;;  %v4423_v1 = vld [vmem:[%s10670_s19 + $0x6b8] sm:$0xff]  ;;  %v7742_v15 = vcombine.low %v4410_v30, %v4414_v58  ;;  %v7791_v30 = vcombine.high %v4458_v55, %v4462_v57 }
0x23c6   : > { %6093 = vmatprep.subr.bf16.mxu1 %v7697_v2  ;;  %v7744_v2 = vcombine.low %v4411_v59, %v4415_v60  ;;  %v7753_v3 = vcombine.high %v4419_v24, %v4423_v1  ;;  %v7790_v59 = vcombine.low %v4458_v55, %v4462_v57  ;;  %v8388_v55 = vld [vmem:[%s10672_s21 + $0x16c] ss:$16 sps:$4 sm:$0xff]   ;;  %v8383_v57 = vld [vmem:[%s10672_s21 + $0x160] ss:$16 sps:$4 sm:$0xff]  }
0x23c8   : > { %6008 = vmatpush1.bf16.msra.mxu0 %v7694_v5  ;;  %v4427_v5 = vld [vmem:[%s10670_s19 + $0x6d8] sm:$0xff] }
0x23c9   : > { %6094 = vmatpush1.bf16.msra.mxu1 %v7696_v6  ;;  %6009 = vmatprep.subr.bf16.mxu0 %v7703_v7  ;;  %v4431_v6 = vld [vmem:[%s10670_s19 + $0x6f8] sm:$0xff]  ;;  %v7750_v7 = vcombine.low %v4418_v37, %v4422_v0  ;;  %v8325_v37 = vld [vmem:[%s10672_s21 + $0x24] ss:$16 sps:$4 sm:$0xff]  }
0x23ca   : > { %6095 = vmatprep.subr.bf16.mxu1 %v7705_v35  ;;  %v7752_v35 = vcombine.low %v4419_v24, %v4423_v1  ;;  %v7761_v9 = vcombine.high %v4427_v5, %v4431_v6  ;;  %v8328_v0 = vld [vmem:[%s10672_s21 + $0x2c] ss:$16 sps:$4 sm:$0xff]   ;;  %v8323_v24 = vld [vmem:[%s10672_s21 + $0x20] ss:$16 sps:$4 sm:$0xff]   ;;  %v8326_v1 = vld [vmem:[%s10672_s21 + $0x28] ss:$16 sps:$4 sm:$0xff]  }
0x23cc   : > { %6010 = vmatpush1.bf16.msra.mxu0 %v7702_v13  ;;  %v4435_v13 = vld [vmem:[%s10670_s19 + $0x718] sm:$0xff] }
0x23cd   : > { %6096 = vmatpush1.bf16.msra.mxu1 %v7704_v14  ;;  %6011 = vmatprep.subr.bf16.mxu0 %v7711_v16  ;;  %v4439_v14 = vld [vmem:[%s10670_s19 + $0x738] sm:$0xff]  ;;  %v7758_v16 = vcombine.low %v4426_v4, %v4430_v49  ;;  %v8335_v49 = vld [vmem:[%s10672_s21 + $0x60] ss:$16 sps:$4 sm:$0xff]  }
0x23ce   : > { %6097 = vmatprep.subr.bf16.mxu1 %v7713_v17  ;;  %v7760_v17 = vcombine.low %v4427_v5, %v4431_v6  ;;  %v7769_v20 = vcombine.high %v4435_v13, %v4439_v14  ;;  %v8340_v4 = vld [vmem:[%s10672_s21 + $0x6c] ss:$16 sps:$4 sm:$0xff]   ;;  %v8338_v5 = vld [vmem:[%s10672_s21 + $0x68] ss:$16 sps:$4 sm:$0xff]   ;;  %v8343_v6 = vld [vmem:[%s10672_s21 + $0x84] ss:$16 sps:$4 sm:$0xff]  }
0x23d0   : > { %6012 = vmatpush1.bf16.msra.mxu0 %v7710_v27  ;;  %v4443_v27 = vld [vmem:[%s10670_s19 + $0x758] sm:$0xff] }
0x23d1   : > { %6098 = vmatpush1.bf16.msra.mxu1 %v7712_v31  ;;  %6013 = vmatprep.subr.bf16.mxu0 %v7719_v32  ;;  %v4447_v31 = vld [vmem:[%s10670_s19 + $0x778] sm:$0xff]  ;;  %v7766_v32 = vcombine.low %v4434_v10, %v4438_v11  ;;  %v8347_v11 = vld [vmem:[%s10672_s21 + $0xa0] ss:$16 sps:$4 sm:$0xff]  }
0x23d2   : > { %6099 = vmatprep.subr.bf16.mxu1 %v7721_v40  ;;  %v7768_v40 = vcombine.low %v4435_v13, %v4439_v14  ;;  %v7777_v19 = vcombine.high %v4443_v27, %v4447_v31  ;;  %v8352_v10 = vld [vmem:[%s10672_s21 + $0xac] ss:$16 sps:$4 sm:$0xff]   ;;  %v8350_v13 = vld [vmem:[%s10672_s21 + $0xa8] ss:$16 sps:$4 sm:$0xff]   ;;  %v8355_v14 = vld [vmem:[%s10672_s21 + $0xc4] ss:$16 sps:$4 sm:$0xff]  }
0x23d4   : > { %6014 = vmatpush1.bf16.msra.mxu0 %v7718_v44  ;;  %v4451_v44 = vld [vmem:[%s10670_s19 + $0x798] sm:$0xff] }
0x23d5   : > { %6100 = vmatpush1.bf16.msra.mxu1 %v7720_v45  ;;  %6015 = vmatprep.subr.bf16.mxu0 %v7727_v46  ;;  %v4455_v45 = vld [vmem:[%s10670_s19 + $0x7b8] sm:$0xff]  ;;  %v7774_v46 = vcombine.low %v4442_v21, %v4446_v22  ;;  %v8359_v22 = vld [vmem:[%s10672_s21 + $0xe0] ss:$16 sps:$4 sm:$0xff]  }
0x23d6   : > { %6101 = vmatprep.subr.bf16.mxu1 %v7729_v47  ;;  %v7776_v47 = vcombine.low %v4443_v27, %v4447_v31  ;;  %v7785_v53 = vcombine.high %v4451_v44, %v4455_v45  ;;  %v8364_v21 = vld [vmem:[%s10672_s21 + $0xec] ss:$16 sps:$4 sm:$0xff]   ;;  %v8362_v27 = vld [vmem:[%s10672_s21 + $0xe8] ss:$16 sps:$4 sm:$0xff]   ;;  %v8367_v31 = vld [vmem:[%s10672_s21 + $0x104] ss:$16 sps:$4 sm:$0xff]  }
0x23d8   : > { %6016 = vmatpush1.bf16.msra.mxu0 %v7726_v25  ;;  %v4459_v25 = vld [vmem:[%s10670_s19 + $0x7d8] sm:$0xff] }
0x23d9   : > { %6102 = vmatpush1.bf16.msra.mxu1 %v7728_v39  ;;  %6017 = vmatprep.subr.bf16.mxu0 %v7735_v28  ;;  %v4463_v39 = vld [vmem:[%s10670_s19 + $0x7f8] sm:$0xff]  ;;  %v7782_v28 = vcombine.low %v4450_v42, %v4454_v43  ;;  %v8371_v43 = vld [vmem:[%s10672_s21 + $0x120] ss:$16 sps:$4 sm:$0xff]  }
0x23da   : > { %6103 = vmatprep.subr.bf16.mxu1 %v7737_v29  ;;  %v7784_v29 = vcombine.low %v4451_v44, %v4455_v45  ;;  %v7793_v58 = vcombine.high %v4459_v25, %v4463_v39  ;;  %v7792_v60 = vcombine.low %v4459_v25, %v4463_v39  ;;  %v8376_v42 = vld [vmem:[%s10672_s21 + $0x12c] ss:$16 sps:$4 sm:$0xff]   ;;  %v8374_v44 = vld [vmem:[%s10672_s21 + $0x128] ss:$16 sps:$4 sm:$0xff]   ;;  %v8379_v45 = vld [vmem:[%s10672_s21 + $0x144] ss:$16 sps:$4 sm:$0xff]  }
0x23db   : > { %v8386_v25 = vld [vmem:[%s10672_s21 + $0x168] ss:$16 sps:$4 sm:$0xff]   ;;  %v8391_v39 = vld [vmem:[%s10672_s21 + $0x184] ss:$16 sps:$4 sm:$0xff]  }
0x23dc   : > { %6018 = vmatpush1.bf16.msra.mxu0 %v7734_v62  ;;  %v8319_v62 = vld [vmem:[%s10672_s21 + $0x4] ss:$16 sps:$4 sm:$0xff]  }
0x23dd   : > { %6104 = vmatpush1.bf16.msra.mxu1 %v7736_v36  ;;  %6019 = vmatprep.subr.bf16.mxu0 %v7743_v63  ;;  %v8322_v36 = vld [vmem:[%s10672_s21 + $0xc] ss:$16 sps:$4 sm:$0xff]   ;;  %v8317_v63 = vld [vmem:[%s10672_s21] ss:$16 sps:$4 sm:$0xff]  }
0x23de   : > { %6105 = vmatprep.subr.bf16.mxu1 %v7745_v61  ;;  %v8320_v61 = vld [vmem:[%s10672_s21 + $0x8] ss:$16 sps:$4 sm:$0xff]  }
0x23e0   : > { %6020 = vmatpush1.bf16.msra.mxu0 %v7742_v15  ;;  %v8331_v15 = vld [vmem:[%s10672_s21 + $0x44] ss:$16 sps:$4 sm:$0xff]  }
0x23e1   : > { %6106 = vmatpush1.bf16.msra.mxu1 %v7744_v2  ;;  %6021 = vmatprep.subr.bf16.mxu0 %v7751_v33  ;;  %v8329_v2 = vld [vmem:[%s10672_s21 + $0x40] ss:$16 sps:$4 sm:$0xff]   ;;  %v8332_v33 = vld [vmem:[%s10672_s21 + $0x48] ss:$16 sps:$4 sm:$0xff]  }
0x23e2   : > { %6107 = vmatprep.subr.bf16.mxu1 %v7753_v3  ;;  %v8337_v3 = vld [vmem:[%s10672_s21 + $0x64] ss:$16 sps:$4 sm:$0xff]  }
0x23e4   : > { %6022 = vmatpush1.bf16.msra.mxu0 %v7750_v7  ;;  %v8346_v7 = vld [vmem:[%s10672_s21 + $0x8c] ss:$16 sps:$4 sm:$0xff]  }
0x23e5   : > { %6108 = vmatpush1.bf16.msra.mxu1 %v7752_v35  ;;  %6023 = vmatprep.subr.bf16.mxu0 %v7759_v8  ;;  %v8341_v35 = vld [vmem:[%s10672_s21 + $0x80] ss:$16 sps:$4 sm:$0xff]   ;;  %v8344_v8 = vld [vmem:[%s10672_s21 + $0x88] ss:$16 sps:$4 sm:$0xff]  }
0x23e6   : > { %6109 = vmatprep.subr.bf16.mxu1 %v7761_v9  ;;  %v8349_v9 = vld [vmem:[%s10672_s21 + $0xa4] ss:$16 sps:$4 sm:$0xff]  }
0x23e8   : > { %6024 = vmatpush1.bf16.msra.mxu0 %v7758_v16  ;;  %v8358_v16 = vld [vmem:[%s10672_s21 + $0xcc] ss:$16 sps:$4 sm:$0xff]  }
0x23e9   : > { %6110 = vmatpush1.bf16.msra.mxu1 %v7760_v17  ;;  %6025 = vmatprep.subr.bf16.mxu0 %v7767_v18  ;;  %v8353_v17 = vld [vmem:[%s10672_s21 + $0xc0] ss:$16 sps:$4 sm:$0xff]   ;;  %v8356_v18 = vld [vmem:[%s10672_s21 + $0xc8] ss:$16 sps:$4 sm:$0xff]  }
0x23ea   : > { %6111 = vmatprep.subr.bf16.mxu1 %v7769_v20  ;;  %v8361_v20 = vld [vmem:[%s10672_s21 + $0xe4] ss:$16 sps:$4 sm:$0xff]  }
0x23ec   : > { %6026 = vmatpush1.bf16.msra.mxu0 %v7766_v32  ;;  %v8370_v32 = vld [vmem:[%s10672_s21 + $0x10c] ss:$16 sps:$4 sm:$0xff]  }
0x23ed   : > { %6112 = vmatpush1.bf16.msra.mxu1 %v7768_v40  ;;  %6027 = vmatprep.subr.bf16.mxu0 %v7775_v41  ;;  %v8365_v40 = vld [vmem:[%s10672_s21 + $0x100] ss:$16 sps:$4 sm:$0xff]   ;;  %v8368_v41 = vld [vmem:[%s10672_s21 + $0x108] ss:$16 sps:$4 sm:$0xff]  }
0x23ee   : > { %6113 = vmatprep.subr.bf16.mxu1 %v7777_v19  ;;  %v8373_v19 = vld [vmem:[%s10672_s21 + $0x124] ss:$16 sps:$4 sm:$0xff]  }
0x23f0   : > { %6028 = vmatpush1.bf16.msra.mxu0 %v7774_v46  ;;  %v8382_v46 = vld [vmem:[%s10672_s21 + $0x14c] ss:$16 sps:$4 sm:$0xff]  }
0x23f1   : > { %6114 = vmatpush1.bf16.msra.mxu1 %v7776_v47  ;;  %6029 = vmatprep.subr.bf16.mxu0 %v7783_v52  ;;  %v8377_v47 = vld [vmem:[%s10672_s21 + $0x140] ss:$16 sps:$4 sm:$0xff]   ;;  %v8380_v52 = vld [vmem:[%s10672_s21 + $0x148] ss:$16 sps:$4 sm:$0xff]  }
0x23f2   : > { %6115 = vmatprep.subr.bf16.mxu1 %v7785_v53  ;;  %v8385_v53 = vld [vmem:[%s10672_s21 + $0x164] ss:$16 sps:$4 sm:$0xff]  }
0x23f4   : > { %6030 = vmatpush1.bf16.msra.mxu0 %v7782_v28  ;;  %v8394_v28 = vld [vmem:[%s10672_s21 + $0x18c] ss:$16 sps:$4 sm:$0xff]  }
0x23f5   : > { %6116 = vmatpush1.bf16.msra.mxu1 %v7784_v29  ;;  %6031 = vmatprep.subr.bf16.mxu0 %v7791_v30  ;;  %v8389_v29 = vld [vmem:[%s10672_s21 + $0x180] ss:$16 sps:$4 sm:$0xff]   ;;  %v8392_v30 = vld [vmem:[%s10672_s21 + $0x188] ss:$16 sps:$4 sm:$0xff]  }
0x23f6   : > { %6117 = vmatprep.subr.bf16.mxu1 %v7793_v58  ;;  %v8397_v58 = vld [vmem:[%s10672_s21 + $0x1a4] ss:$16 sps:$4 sm:$0xff]  }
0x23f8   : > { %6032 = vmatpush1.bf16.msra.mxu0 %v7790_v59  ;;  %v8400_v59 = vld [vmem:[%s10672_s21 + $0x1ac] ss:$16 sps:$4 sm:$0xff]  }
0x23f9   : > { %6118 = vmatpush1.bf16.msra.mxu1 %v7792_v60  ;;  %6576 = vmatprep.subr.bf16.mxu0 %v8319_v62  ;;  %v8395_v60 = vld [vmem:[%s10672_s21 + $0x1a0] ss:$16 sps:$4 sm:$0xff]   ;;  %v8398_v62 = vld [vmem:[%s10672_s21 + $0x1a8] ss:$16 sps:$4 sm:$0xff]  }
0x23fa   : > { %6649 = vmatprep.subr.bf16.mxu1 %v8322_v36  ;;  %v8403_v36 = vld [vmem:[%s10672_s21 + $0x1c4] ss:$16 sps:$4 sm:$0xff]  }
0x23fb   : > { %6034 = vmatmul.mubr.bf16.vlgmr.msra.gmra.mrb[36].mxu0 %v9846_v12 }
0x23fc   : > { %6120 = vmatmul.mubr.bf16.vlgmr.msra.gmra.mrb[80].mxu1 %v9846_v12  ;;  %6577 = vmatpush1.bf16.msra.mxu0 %v8317_v63  ;;  %v8334_v12 = vld [vmem:[%s10672_s21 + $0x4c] ss:$16 sps:$4 sm:$0xff]  }
0x23fd   : > { %6650 = vmatpush1.bf16.msra.mxu1 %v8320_v61  ;;  %6578 = vmatprep.subr.bf16.mxu0 %v8325_v37  ;;  %v8406_v63 = vld [vmem:[%s10672_s21 + $0x1cc] ss:$16 sps:$4 sm:$0xff]   ;;  %v8401_v61 = vld [vmem:[%s10672_s21 + $0x1c0] ss:$16 sps:$4 sm:$0xff]   ;;  %v8404_v37 = vld [vmem:[%s10672_s21 + $0x1c8] ss:$16 sps:$4 sm:$0xff]  }
0x23fe   : > { %6651 = vmatprep.subr.bf16.mxu1 %v8328_v0  ;;  %v8409_v0 = vld [vmem:[%s10672_s21 + $0x1e4] ss:$16 sps:$4 sm:$0xff]  }
0x2400   : > { %6579 = vmatpush1.bf16.msra.mxu0 %v8323_v24  ;;  %v8412_v24 = vld [vmem:[%s10672_s21 + $0x1ec] ss:$16 sps:$4 sm:$0xff]  }
0x2401   : > { %6652 = vmatpush1.bf16.msra.mxu1 %v8326_v1  ;;  %6580 = vmatprep.subr.bf16.mxu0 %v8331_v15  ;;  %v8407_v1 = vld [vmem:[%s10672_s21 + $0x1e0] ss:$16 sps:$4 sm:$0xff]   ;;  %v8410_v15 = vld [vmem:[%s10672_s21 + $0x1e8] ss:$16 sps:$4 sm:$0xff]  }
0x2402   : > { %6653 = vmatprep.subr.bf16.mxu1 %v8334_v12  ;;  %v10413_v12 = vld [vmem:[%s10671_s20] sm:$0xff] }
0x2404   : > { %6581 = vmatpush1.bf16.msra.mxu0 %v8329_v2  ;;  %v4469_v2 = vrot.slane %v10413_v12, %v9559_v34 }
0x2405   : > { %6654 = vmatpush1.bf16.msra.mxu1 %v8332_v33  ;;  %6582 = vmatprep.subr.bf16.mxu0 %v8337_v3  ;;  %v4477_v33 = vrot.slane %v10413_v12, %v9583_v50  ;;  %v4473_v3 = vrot.slane %v10413_v12, %v9572_v38 }
0x2406   : > { %6655 = vmatprep.subr.bf16.mxu1 %v8340_v4  ;;  %v4481_v4 = vrot.slane %v10413_v12, %v9589_v23 }
0x2408   : > { %6583 = vmatpush1.bf16.msra.mxu0 %v8335_v49 }
0x2409   : > { %6656 = vmatpush1.bf16.msra.mxu1 %v8338_v5  ;;  %6584 = vmatprep.subr.bf16.mxu0 %v8343_v6 }
0x240a   : > { %6657 = vmatprep.subr.bf16.mxu1 %v8346_v7 }
0x240c   : > { %6585 = vmatpush1.bf16.msra.mxu0 %v8341_v35 }
0x240d   : > { %6658 = vmatpush1.bf16.msra.mxu1 %v8344_v8  ;;  %6586 = vmatprep.subr.bf16.mxu0 %v8349_v9 }
0x240e   : > { %6659 = vmatprep.subr.bf16.mxu1 %v8352_v10 }
0x2410   : > { %6587 = vmatpush1.bf16.msra.mxu0 %v8347_v11 }
0x2411   : > { %6660 = vmatpush1.bf16.msra.mxu1 %v8350_v13  ;;  %6588 = vmatprep.subr.bf16.mxu0 %v8355_v14 }
0x2412   : > { %6661 = vmatprep.subr.bf16.mxu1 %v8358_v16 }
0x2414   : > { %6589 = vmatpush1.bf16.msra.mxu0 %v8353_v17 }
0x2415   : > { %6662 = vmatpush1.bf16.msra.mxu1 %v8356_v18  ;;  %6590 = vmatprep.subr.bf16.mxu0 %v8361_v20 }
0x2416   : > { %6663 = vmatprep.subr.bf16.mxu1 %v8364_v21 }
0x2418   : > { %6591 = vmatpush1.bf16.msra.mxu0 %v8359_v22 }
0x2419   : > { %6664 = vmatpush1.bf16.msra.mxu1 %v8362_v27  ;;  %6592 = vmatprep.subr.bf16.mxu0 %v8367_v31 }
0x241a   : > { %6665 = vmatprep.subr.bf16.mxu1 %v8370_v32 }
0x241c   : > { %6593 = vmatpush1.bf16.msra.mxu0 %v8365_v40 }
0x241d   : > { %6666 = vmatpush1.bf16.msra.mxu1 %v8368_v41  ;;  %6594 = vmatprep.subr.bf16.mxu0 %v8373_v19 }
0x241e   : > { %6667 = vmatprep.subr.bf16.mxu1 %v8376_v42 }
0x2420   : > { %6595 = vmatpush1.bf16.msra.mxu0 %v8371_v43 }
0x2421   : > { %6668 = vmatpush1.bf16.msra.mxu1 %v8374_v44  ;;  %6596 = vmatprep.subr.bf16.mxu0 %v8379_v45 }
0x2422   : > { %6669 = vmatprep.subr.bf16.mxu1 %v8382_v46 }
0x2424   : > { %6597 = vmatpush1.bf16.msra.mxu0 %v8377_v47  ;;  %v8413_v47 = vld [vmem:[%s10674_s23] ss:$8 sps:$4 sm:$0xff]  }
0x2425   : > { %6670 = vmatpush1.bf16.msra.mxu1 %v8380_v52  ;;  %6598 = vmatprep.subr.bf16.mxu0 %v8385_v53  ;;  %v8415_v52 = vld [vmem:[%s10674_s23 + $0x4] ss:$8 sps:$4 sm:$0xff]   ;;  %v8418_v53 = vld [vmem:[%s10674_s23 + $0x14] ss:$8 sps:$4 sm:$0xff]  }
0x2426   : > { %6671 = vmatprep.subr.bf16.mxu1 %v8388_v55  ;;  %v8416_v55 = vld [vmem:[%s10674_s23 + $0x10] ss:$8 sps:$4 sm:$0xff]  }
0x2428   : > { %6599 = vmatpush1.bf16.msra.mxu0 %v8383_v57  ;;  %v8421_v57 = vld [vmem:[%s10674_s23 + $0x24] ss:$8 sps:$4 sm:$0xff]  }
0x2429   : > { %6672 = vmatpush1.bf16.msra.mxu1 %v8386_v25  ;;  %6600 = vmatprep.subr.bf16.mxu0 %v8391_v39  ;;  %v8419_v25 = vld [vmem:[%s10674_s23 + $0x20] ss:$8 sps:$4 sm:$0xff]   ;;  %v8424_v39 = vld [vmem:[%s10674_s23 + $0x34] ss:$8 sps:$4 sm:$0xff]  }
0x242a   : > { %6673 = vmatprep.subr.bf16.mxu1 %v8394_v28  ;;  %v8422_v28 = vld [vmem:[%s10674_s23 + $0x30] ss:$8 sps:$4 sm:$0xff]  }
0x242c   : > { %6601 = vmatpush1.bf16.msra.mxu0 %v8389_v29  ;;  %v8427_v29 = vld [vmem:[%s10674_s23 + $0x44] ss:$8 sps:$4 sm:$0xff]  }
0x242d   : > { %6674 = vmatpush1.bf16.msra.mxu1 %v8392_v30  ;;  %6602 = vmatprep.subr.bf16.mxu0 %v8397_v58  ;;  %v8425_v30 = vld [vmem:[%s10674_s23 + $0x40] ss:$8 sps:$4 sm:$0xff]   ;;  %v8430_v58 = vld [vmem:[%s10674_s23 + $0x54] ss:$8 sps:$4 sm:$0xff]  }
0x242e   : > { %6675 = vmatprep.subr.bf16.mxu1 %v8400_v59  ;;  %v8428_v59 = vld [vmem:[%s10674_s23 + $0x50] ss:$8 sps:$4 sm:$0xff]  }
0x2430   : > { %6603 = vmatpush1.bf16.msra.mxu0 %v8395_v60  ;;  %v8433_v60 = vld [vmem:[%s10674_s23 + $0x64] ss:$8 sps:$4 sm:$0xff]  }
0x2431   : > { %6676 = vmatpush1.bf16.msra.mxu1 %v8398_v62  ;;  %6604 = vmatprep.subr.bf16.mxu0 %v8403_v36  ;;  %v8431_v62 = vld [vmem:[%s10674_s23 + $0x60] ss:$8 sps:$4 sm:$0xff]   ;;  %v8436_v36 = vld [vmem:[%s10674_s23 + $0x74] ss:$8 sps:$4 sm:$0xff]  }
0x2432   : > { %6677 = vmatprep.subr.bf16.mxu1 %v8406_v63  ;;  %v8434_v63 = vld [vmem:[%s10674_s23 + $0x70] ss:$8 sps:$4 sm:$0xff]  }
0x2434   : > { %6605 = vmatpush1.bf16.msra.mxu0 %v8401_v61  ;;  %v4485_v61 = vrot.slane %v10413_v12, %v9586_v51 }
0x2435   : > { %6678 = vmatpush1.bf16.msra.mxu1 %v8404_v37  ;;  %6606 = vmatprep.subr.bf16.mxu0 %v8409_v0  ;;  %v4493_v37 = vrot.slane %v10413_v12, %v9607_v48  ;;  %v4489_v0 = vrot.slane %v10413_v12, %v9592_v56 }
0x2436   : > { %6679 = vmatprep.subr.bf16.mxu1 %v8412_v24  ;;  %v4497_v24 = vrot.slane %v10413_v12, %v9610_v54 }
0x2438   : > { %6607 = vmatpush1.bf16.msra.mxu0 %v8407_v1 }
0x2439   : > { %6680 = vmatpush1.bf16.msra.mxu1 %v8410_v15  ;;  %6910 = vmatprep.subr.bf16.mxu0 %v8415_v52 }
0x244e   : > { %v5863_v49 = vpop.f32.mrb[32].mxu0  ;;  %v5949_v5 = vpop.f32.mrb[76].mxu1 }
0x244f   : > { %v8181_v6 = vadd.f32 %v5863_v49, %v4469_v2  ;;  %v8185_v7 = vadd.f32 %v5949_v5, %v4477_v33  ;;  %v5865_v35 = vpop.f32.mrb[33].mxu0  ;;  %v5951_v8 = vpop.f32.mrb[77].mxu1 }
0x2450   : > { %v8182_v9 = vadd.f32 %v5865_v35, %v4473_v3  ;;  %v8186_v10 = vadd.f32 %v5951_v8, %v4481_v4  ;;  %v5867_v11 = vpop.f32.mrb[34].mxu0  ;;  %v5953_v13 = vpop.f32.mrb[78].mxu1 }
0x2451   : > { %v8183_v14 = vadd.f32 %v5867_v11, %v4469_v2  ;;  %v8187_v16 = vadd.f32 %v5953_v13, %v4477_v33  ;;  %v5869_v17 = vpop.f32.mrb[35].mxu0  ;;  %v5955_v18 = vpop.f32.mrb[79].mxu1  ;;  %v6130_v22 = vmax.f32 %v8181_v6, 0.0  ;;  %v6132_v27 = vmax.f32 %v8185_v7, 0.0 }
0x2452   : > { %v8184_v20 = vadd.f32 %v5869_v17, %v4473_v3  ;;  %v8188_v21 = vadd.f32 %v5955_v18, %v4481_v4  ;;  %v6131_v40 = vmax.f32 %v8182_v9, 0.0  ;;  %v6133_v41 = vmax.f32 %v8186_v10, 0.0 }
0x2453   : > { %v6138_v31 = vmax.f32 %v8183_v14, 0.0  ;;  %v6140_v32 = vmax.f32 %v8187_v16, 0.0 }
0x2454   : > { %v6139_v19 = vmax.f32 %v8184_v20, 0.0  ;;  %v6141_v42 = vmax.f32 %v8188_v21, 0.0 }
0x2455   : > { %v6146_v43 = vpack.c.bf16 %v6138_v31, %v6130_v22  ;;  %v6148_v44 = vpack.c.bf16 %v6140_v32, %v6132_v27  ;;  %v6234_v27 = vld [vmem:[%s10673_s22] sm:$0xf] }
0x2456   : > { %v6147_v45 = vpack.c.bf16 %v6139_v19, %v6131_v40  ;;  %v6149_v46 = vpack.c.bf16 %v6141_v42, %v6133_v41  ;;  %v10484_v31 = vrot.slane %v6234_v27, %v9559_v34  ;;  %v10487_v32 = vrot.slane %v6234_v27, %v9583_v50 }
0x2457   : > { %v10490_v40 = vrot.slane %v6234_v27, %v9572_v38  ;;  %v10493_v41 = vrot.slane %v6234_v27, %v9589_v23 }
0x2458   : > { %6608 = vmatprep.mubr.bf16.mxu0 %v6147_v45  ;;  %6681 = vmatprep.mubr.bf16.mxu1 %v6147_v45 }
0x2459   : > { %6609 = vmatmul.mubr.bf16.vlgmr.msra.gmra.mrb[40].mxu0 %v6146_v43  ;;  %6682 = vmatmul.mubr.bf16.vlgmr.msra.gmra.mrb[84].mxu1 %v6146_v43 }
0x245a   : > { %6618 = vmatprep.mubr.bf16.mxu0 %v6149_v46  ;;  %6691 = vmatprep.mubr.bf16.mxu1 %v6149_v46 }
0x245b   : > { %6911 = vmatpush1.bf16.msra.mxu0 %v8413_v47 }
0x245c   : > { %6912 = vmatprep.subr.bf16.mxu0 %v8418_v53 }
0x245f   : > { %6913 = vmatpush1.bf16.msra.mxu0 %v8416_v55 }
0x2460   : > { %6914 = vmatprep.subr.bf16.mxu0 %v8421_v57 }
0x2461   : > { %6619 = vmatmul.mubr.bf16.gmra.mrb[44].mxu0 %v6148_v44  ;;  %6692 = vmatmul.mubr.bf16.gmra.mrb[88].mxu1 %v6148_v44 }
0x2463   : > { %6915 = vmatpush1.bf16.msra.mxu0 %v8419_v25 }
0x2464   : > { %6916 = vmatprep.subr.bf16.mxu0 %v8424_v39 }
0x2467   : > { %6917 = vmatpush1.bf16.msra.mxu0 %v8422_v28 }
0x2468   : > { %6918 = vmatprep.subr.bf16.mxu0 %v8427_v29 }
0x246b   : > { %6919 = vmatpush1.bf16.msra.mxu0 %v8425_v30 }
0x246c   : > { %6920 = vmatprep.subr.bf16.mxu0 %v8430_v58 }
0x246f   : > { %6921 = vmatpush1.bf16.msra.mxu0 %v8428_v59 }
0x2470   : > { %6922 = vmatprep.subr.bf16.mxu0 %v8433_v60 }
0x2473   : > { %6923 = vmatpush1.bf16.msra.mxu0 %v8431_v62 }
0x2474   : > { %6924 = vmatprep.subr.bf16.mxu0 %v8436_v36 }
0x2477   : > { %6925 = vmatpush1.bf16.msra.mxu0 %v8434_v63 }
0x24ce   : > { %v6035_v1 = vpop.f32.mrb[36].mxu0 }
0x24cf   : > { %v8189_v15 = vadd.f32 %v6035_v1, %v4485_v61  ;;  %v6121_v2 = vpop.f32.mrb[80].mxu1  ;;  %v6037_v33 = vpop.f32.mrb[37].mxu0 }
0x24d0   : > { %v8193_v3 = vadd.f32 %v6121_v2, %v4493_v37  ;;  %v8190_v4 = vadd.f32 %v6037_v33, %v4489_v0  ;;  %v6123_v49 = vpop.f32.mrb[81].mxu1  ;;  %v6039_v5 = vpop.f32.mrb[38].mxu0 }
0x24d1   : > { %v8194_v6 = vadd.f32 %v6123_v49, %v4497_v24  ;;  %v8191_v7 = vadd.f32 %v6039_v5, %v4485_v61  ;;  %v6125_v51 = vpop.f32.mrb[82].mxu1  ;;  %v6041_v35 = vpop.f32.mrb[39].mxu0  ;;  %v6134_v10 = vmax.f32 %v8189_v15, 0.0 }
0x24d2   : > { %v8195_v8 = vadd.f32 %v6125_v51, %v4493_v37  ;;  %v8192_v48 = vadd.f32 %v6041_v35, %v4489_v0  ;;  %v6127_v9 = vpop.f32.mrb[83].mxu1  ;;  %v6136_v13 = vmax.f32 %v8193_v3, 0.0  ;;  %v6135_v54 = vmax.f32 %v8190_v4, 0.0 }
0x24d3   : > { %v6142_v56 = vmax.f32 %v8191_v7, 0.0  ;;  %v8196_v11 = vadd.f32 %v6127_v9, %v4497_v24  ;;  %v6137_v16 = vmax.f32 %v8194_v6, 0.0 }
0x24d4   : > { %v6144_v12 = vmax.f32 %v8195_v8, 0.0  ;;  %v6143_v14 = vmax.f32 %v8192_v48, 0.0 }
0x24d5   : > { %v6150_v17 = vpack.c.bf16 %v6142_v56, %v6134_v10  ;;  %v6145_v18 = vmax.f32 %v8196_v11, 0.0 }
0x24d6   : > { %v6152_v20 = vpack.c.bf16 %v6144_v12, %v6136_v13  ;;  %v6151_v21 = vpack.c.bf16 %v6143_v14, %v6135_v54 }
0x24d7   : > { %v6153_v22 = vpack.c.bf16 %v6145_v18, %v6137_v16 }
0x24d8   : > { %6628 = vmatprep.mubr.bf16.mxu0 %v6151_v21  ;;  %6701 = vmatprep.mubr.bf16.mxu1 %v6151_v21 }
0x24d9   : > { %6629 = vmatmul.mubr.bf16.gmra.mrb[48].mxu0 %v6150_v17  ;;  %6702 = vmatmul.mubr.bf16.gmra.mrb[92].mxu1 %v6150_v17 }
0x24da   : > { %6638 = vmatprep.mubr.bf16.mxu0 %v6153_v22  ;;  %6711 = vmatprep.mubr.bf16.mxu1 %v6153_v22 }
0x24e1   : > { %6639 = vmatmul.mubr.bf16.gmra.mrb[52].mxu0 %v6152_v20  ;;  %6712 = vmatmul.mubr.bf16.gmra.mrb[96].mxu1 %v6152_v20 }
0x24e2   : > { %6942 = vmatprep.mubr.bf16.mxu0 %v8507_v26 }
0x252c   : > { %v6610_v19 = vpop.f32.mrb[40].mxu0  ;;  %v6683_v42 = vpop.f32.mrb[84].mxu1 }
0x252d   : > { %v6611_v43 = vadd.f32 %v6610_v19, %v10484_v31  ;;  %v6684_v44 = vadd.f32 %v6683_v42, %v10487_v32  ;;  %v6612_v45 = vpop.f32.mrb[41].mxu0  ;;  %v6685_v46 = vpop.f32.mrb[85].mxu1 }
0x252e   : > { %v6613_v47 = vadd.f32 %v6612_v45, %v10490_v40  ;;  %v6686_v52 = vadd.f32 %v6685_v46, %v10493_v41  ;;  %v6614_v50 = vpop.f32.mrb[42].mxu0  ;;  %v6687_v53 = vpop.f32.mrb[86].mxu1 }
0x252f   : > { %v6615_v55 = vadd.f32 %v6614_v50, %v10484_v31  ;;  %v6688_v57 = vadd.f32 %v6687_v53, %v10487_v32  ;;  %v6616_v23 = vpop.f32.mrb[43].mxu0  ;;  %v6689_v25 = vpop.f32.mrb[87].mxu1  ;;  %v6722_v29 = vmax.f32 %v6611_v43, 0.0  ;;  %v6724_v30 = vmax.f32 %v6684_v44, 0.0 }
0x2530   : > { %v6617_v39 = vadd.f32 %v6616_v23, %v10490_v40  ;;  %v6690_v28 = vadd.f32 %v6689_v25, %v10493_v41  ;;  %v6723_v60 = vmax.f32 %v6613_v47, 0.0  ;;  %v6725_v62 = vmax.f32 %v6686_v52, 0.0 }
0x2531   : > { %v6726_v58 = vmax.f32 %v6615_v55, 0.0  ;;  %v6728_v59 = vmax.f32 %v6688_v57, 0.0 }
0x2532   : > { %v6727_v36 = vmax.f32 %v6617_v39, 0.0  ;;  %v6729_v63 = vmax.f32 %v6690_v28, 0.0 }
0x2533   : > { %v6754_v61 = vpack.c.bf16 %v6726_v58, %v6722_v29  ;;  %v10503_v37 = vpack.c.bf16 %v6728_v59, %v6724_v30 }
0x2534   : > { %v10505_v0 = vpack.c.bf16 %v6727_v36, %v6723_v60  ;;  %v10507_v24 = vpack.c.bf16 %v6729_v63, %v6725_v62  ;;  %v6620_v1 = vpop.f32.mrb[44].mxu0  ;;  %v6693_v15 = vpop.f32.mrb[88].mxu1 }
0x2535   : > { %v6621_v2 = vadd.f32 %v6620_v1, %v10484_v31  ;;  %v6694_v33 = vadd.f32 %v6693_v15, %v10487_v32  ;;  %v6622_v3 = vpop.f32.mrb[45].mxu0  ;;  %v6695_v4 = vpop.f32.mrb[89].mxu1  ;;  %6943 = vmatmul.mubr.bf16.vlgmr.msra.gmra.mrb[56].mxu0 %v6754_v61 }
0x2536   : > { %v6623_v49 = vadd.f32 %v6622_v3, %v10490_v40  ;;  %v6696_v5 = vadd.f32 %v6695_v4, %v10493_v41  ;;  %v6624_v6 = vpop.f32.mrb[46].mxu0  ;;  %v6697_v7 = vpop.f32.mrb[90].mxu1  ;;  %6952 = vmatprep.mubr.bf16.mxu0 %v8507_v26 }
0x2537   : > { %v6625_v51 = vadd.f32 %v6624_v6, %v10484_v31  ;;  %v6698_v35 = vadd.f32 %v6697_v7, %v10487_v32  ;;  %v6626_v8 = vpop.f32.mrb[47].mxu0  ;;  %v6699_v48 = vpop.f32.mrb[91].mxu1  ;;  %v6730_v56 = vmax.f32 %v6621_v2, 0.0  ;;  %v6732_v11 = vmax.f32 %v6694_v33, 0.0 }
0x2538   : > { %v6627_v9 = vadd.f32 %v6626_v8, %v10490_v40  ;;  %v6700_v10 = vadd.f32 %v6699_v48, %v10493_v41  ;;  %v6731_v12 = vmax.f32 %v6623_v49, 0.0  ;;  %v6733_v14 = vmax.f32 %v6696_v5, 0.0 }
0x2539   : > { %v6734_v13 = vmax.f32 %v6625_v51, 0.0  ;;  %v6736_v54 = vmax.f32 %v6698_v35, 0.0 }
0x253a   : > { %v6735_v16 = vmax.f32 %v6627_v9, 0.0  ;;  %v6737_v17 = vmax.f32 %v6700_v10, 0.0 }
0x253b   : > { %v6758_v18 = vpack.c.bf16 %v6734_v13, %v6730_v56  ;;  %v10518_v20 = vpack.c.bf16 %v6736_v54, %v6732_v11 }
0x253c   : > { %v10520_v21 = vpack.c.bf16 %v6735_v16, %v6731_v12  ;;  %v10522_v22 = vpack.c.bf16 %v6737_v17, %v6733_v14 }
0x253d   : > { %6953 = vmatmul.mubr.bf16.gmra.mrb[60].mxu0 %v6758_v18 }
0x253e   : > { %6962 = vmatprep.mubr.bf16.mxu0 %v8507_v26 }
0x25ac   : > { %v6630_v27 = vpop.f32.mrb[48].mxu0  ;;  %v6703_v19 = vpop.f32.mrb[92].mxu1 }
0x25ad   : > { %v6631_v42 = vadd.f32 %v6630_v27, %v10484_v31  ;;  %v6704_v43 = vadd.f32 %v6703_v19, %v10487_v32  ;;  %v6632_v44 = vpop.f32.mrb[49].mxu0  ;;  %v6705_v45 = vpop.f32.mrb[93].mxu1 }
0x25ae   : > { %v6633_v46 = vadd.f32 %v6632_v44, %v10490_v40  ;;  %v6706_v47 = vadd.f32 %v6705_v45, %v10493_v41  ;;  %v6634_v52 = vpop.f32.mrb[50].mxu0  ;;  %v6707_v50 = vpop.f32.mrb[94].mxu1 }
0x25af   : > { %v6635_v53 = vadd.f32 %v6634_v52, %v10484_v31  ;;  %v6708_v55 = vadd.f32 %v6707_v50, %v10487_v32  ;;  %v6636_v57 = vpop.f32.mrb[51].mxu0  ;;  %v6709_v23 = vpop.f32.mrb[95].mxu1  ;;  %v6738_v28 = vmax.f32 %v6631_v42, 0.0  ;;  %v6740_v29 = vmax.f32 %v6704_v43, 0.0 }
0x25b0   : > { %v6637_v25 = vadd.f32 %v6636_v57, %v10490_v40  ;;  %v6710_v39 = vadd.f32 %v6709_v23, %v10493_v41  ;;  %v6739_v59 = vmax.f32 %v6633_v46, 0.0  ;;  %v6741_v60 = vmax.f32 %v6706_v47, 0.0 }
0x25b1   : > { %v6742_v30 = vmax.f32 %v6635_v53, 0.0  ;;  %v6744_v58 = vmax.f32 %v6708_v55, 0.0 }
0x25b2   : > { %v6743_v62 = vmax.f32 %v6637_v25, 0.0  ;;  %v6745_v36 = vmax.f32 %v6710_v39, 0.0 }
0x25b3   : > { %v6762_v63 = vpack.c.bf16 %v6742_v30, %v6738_v28  ;;  %v6764_v61 = vpack.c.bf16 %v6744_v58, %v6740_v29 }
0x25b4   : > { %v6763_v1 = vpack.c.bf16 %v6743_v62, %v6739_v59  ;;  %v10533_v15 = vpack.c.bf16 %v6745_v36, %v6741_v60  ;;  %v6640_v2 = vpop.f32.mrb[52].mxu0  ;;  %v6713_v33 = vpop.f32.mrb[96].mxu1 }
0x25b5   : > { %v6641_v3 = vadd.f32 %v6640_v2, %v10484_v31  ;;  %v6714_v4 = vadd.f32 %v6713_v33, %v10487_v32  ;;  %v6642_v49 = vpop.f32.mrb[53].mxu0  ;;  %v6715_v5 = vpop.f32.mrb[97].mxu1  ;;  %6963 = vmatmul.mubr.bf16.gmra.mrb[64].mxu0 %v6762_v63  ;;  %v10583_v63 = vld.sshfl [vmem:[%s10676_s25] sm:$0x33 pattern:$0x76325410] }
0x25b6   : > { %v6643_v6 = vadd.f32 %v6642_v49, %v10490_v40  ;;  %v6716_v7 = vadd.f32 %v6715_v5, %v10493_v41  ;;  %v6644_v51 = vpop.f32.mrb[54].mxu0  ;;  %v6717_v35 = vpop.f32.mrb[98].mxu1  ;;  %6972 = vmatprep.mubr.bf16.mxu0 %v8507_v26 }
0x25b7   : > { %v6645_v8 = vadd.f32 %v6644_v51, %v10484_v31  ;;  %v6718_v48 = vadd.f32 %v6717_v35, %v10487_v32  ;;  %v6646_v9 = vpop.f32.mrb[55].mxu0  ;;  %v6719_v10 = vpop.f32.mrb[99].mxu1  ;;  %v6746_v13 = vmax.f32 %v6641_v3, 0.0  ;;  %v6748_v54 = vmax.f32 %v6714_v4, 0.0  ;;  %v6818_v32 = vld [vmem:[%s10675_s24] sm:$0x3] }
0x25b8   : > { %v6647_v56 = vadd.f32 %v6646_v9, %v10490_v40  ;;  %v6720_v11 = vadd.f32 %v6719_v10, %v10493_v41  ;;  %v6747_v16 = vmax.f32 %v6643_v6, 0.0  ;;  %v6749_v17 = vmax.f32 %v6716_v7, 0.0 }
0x25b9   : > { %v6750_v12 = vmax.f32 %v6645_v8, 0.0  ;;  %v6752_v14 = vmax.f32 %v6718_v48, 0.0  ;;  %v10561_v40 = vrot.slane %v6818_v32, %v9559_v34  ;;  %v10565_v41 = vrot.slane %v6818_v32, %v9572_v38 }
0x25ba   : > { %v6751_v18 = vmax.f32 %v6647_v56, 0.0  ;;  %v6753_v27 = vmax.f32 %v6720_v11, 0.0 }
0x25bb   : > { %v6766_v19 = vpack.c.bf16 %v6750_v12, %v6746_v13  ;;  %v6768_v42 = vpack.c.bf16 %v6752_v14, %v6748_v54 }
0x25bc   : > { %v6767_v43 = vpack.c.bf16 %v6751_v18, %v6747_v16  ;;  %v6769_v31 = vpack.c.bf16 %v6753_v27, %v6749_v17 }
0x25bd   : > { %6973 = vmatmul.mubr.bf16.gmra.mrb[68].mxu0 %v6766_v19 }
0x25be   : > { %6982 = vmatprep.mubr.bf16.mxu0 %v8507_v26 }
0x25c5   : > { %6983 = vmatmul.mubr.bf16.gmra.mrb[72].mxu0 %v10505_v0 }
0x25c6   : > { %6992 = vmatprep.mubr.bf16.mxu0 %v8507_v26 }
0x25cd   : > { %6993 = vmatmul.mubr.bf16.gmra.mrb[76].mxu0 %v10520_v21 }
0x25ce   : > { %7002 = vmatprep.mubr.bf16.mxu0 %v8507_v26 }
0x25d5   : > { %7003 = vmatmul.mubr.bf16.gmra.mrb[80].mxu0 %v6763_v1  ;;  %v7874_v1 = vld [vmem:[#allocation5] ss:$0 sm:$0xff] }
0x25d6   : > { %7012 = vmatprep.mubr.bf16.mxu0 %v8507_v26  ;;  %7207 = vperm.xlu1 %8239, %v7874_v1  }
0x25dd   : > { %7013 = vmatmul.mubr.bf16.gmra.mrb[84].mxu0 %v6767_v43 }
0x25de   : > { %7022 = vmatprep.mubr.bf16.mxu0 %v8507_v26 }
0x25e5   : > { %7023 = vmatmul.mubr.bf16.gmra.mrb[88].mxu0 %v10503_v37 }
0x25e6   : > { %7032 = vmatprep.mubr.bf16.mxu0 %v8507_v26 }
0x25ed   : > { %7033 = vmatmul.mubr.bf16.gmra.mrb[92].mxu0 %v10518_v20 }
0x25ee   : > { %7042 = vmatprep.mubr.bf16.mxu0 %v8507_v26 }
0x25f5   : > { %7043 = vmatmul.mubr.bf16.gmra.mrb[96].mxu0 %v6764_v61  ;;  %v7218_v61 = vcombine.high %v10583_v63, %v10583_v63 }
0x25f6   : > { %7052 = vmatprep.mubr.bf16.mxu0 %v8507_v26 }
0x25f7   : > { %7253 = vmatprep.mubr.bf16.mxu1 %v7218_v61 }
0x25fd   : > { %7053 = vmatmul.mubr.bf16.gmra.mrb[100].mxu0 %v6768_v42 }
0x25fe   : > { %7062 = vmatprep.mubr.bf16.mxu0 %v8507_v26 }
0x2605   : > { %7063 = vmatmul.mubr.bf16.gmra.mrb[104].mxu0 %v10507_v24 }
0x2606   : > { %7072 = vmatprep.mubr.bf16.mxu0 %v8507_v26 }
0x2608   : > { %v6944_v37 = vpop.f32.mrb[56].mxu0 }
0x2609   : > { %v6945_v0 = vadd.f32 %v6944_v37, %v10561_v40  ;;  %v6946_v20 = vpop.f32.mrb[57].mxu0 }
0x260a   : > { %v6947_v21 = vadd.f32 %v6946_v20, %v10565_v41  ;;  %v6948_v44 = vpop.f32.mrb[58].mxu0 }
0x260b   : > { %v6949_v45 = vadd.f32 %v6948_v44, %v10561_v40  ;;  %v6950_v46 = vpop.f32.mrb[59].mxu0  ;;  %v7103_v47 = vmax.f32 %v6945_v0, 0.0 }
0x260c   : > { %v6951_v34 = vadd.f32 %v6950_v46, %v10565_v41  ;;  %v7104_v38 = vmax.f32 %v6947_v21, 0.0 }
0x260d   : > { %v7105_v52 = vmax.f32 %v6949_v45, 0.0  ;;  %7073 = vmatmul.mubr.bf16.gmra.mrb[108].mxu0 %v10522_v22 }
0x260e   : > { %v7106_v24 = vmax.f32 %v6951_v34, 0.0  ;;  %7082 = vmatprep.mubr.bf16.mxu0 %v8507_v26 }
0x260f   : > { %v7167_v50 = vpack.c.bf16 %v7105_v52, %v7103_v47 }
0x2610   : > { %v7168_v53 = vpack.c.bf16 %v7106_v24, %v7104_v38  ;;  %v6954_v55 = vpop.f32.mrb[60].mxu0 }
0x2611   : > { %v6955_v57 = vadd.f32 %v6954_v55, %v10561_v40  ;;  %v6956_v23 = vpop.f32.mrb[61].mxu0 }
0x2612   : > { %v6957_v25 = vadd.f32 %v6956_v23, %v10565_v41  ;;  %v6958_v39 = vpop.f32.mrb[62].mxu0  ;;  %7221 = vmatprep.subr.bf16.mxu1 %v7168_v53 }
0x2613   : > { %v6959_v28 = vadd.f32 %v6958_v39, %v10561_v40  ;;  %v6960_v29 = vpop.f32.mrb[63].mxu0  ;;  %7222 = vmatpush1.bf16.xpose.msra.mxu1 %v7167_v50  ;;  %v7107_v30 = vmax.f32 %v6955_v57, 0.0 }
0x2614   : > { %v6961_v22 = vadd.f32 %v6960_v29, %v10565_v41  ;;  %v7108_v59 = vmax.f32 %v6957_v25, 0.0 }
0x2615   : > { %v7109_v58 = vmax.f32 %v6959_v28, 0.0  ;;  %7083 = vmatmul.mubr.bf16.gmra.mrb[112].mxu0 %v10533_v15 }
0x2616   : > { %v7110_v60 = vmax.f32 %v6961_v22, 0.0  ;;  %7092 = vmatprep.mubr.bf16.mxu0 %v8507_v26 }
0x2617   : > { %v7169_v62 = vpack.c.bf16 %v7109_v58, %v7107_v30 }
0x2618   : > { %v7170_v36 = vpack.c.bf16 %v7110_v60, %v7108_v59 }
0x261a   : > { %7223 = vmatprep.subr.bf16.mxu1 %v7170_v36 }
0x261b   : > { %7224 = vmatpush1.bf16.xpose.msra.mxu1 %v7169_v62 }
0x261d   : > { %7093 = vmatmul.mubr.bf16.gmra.mrb[116].mxu0 %v6769_v31 }
0x2688   : > { %v6964_v15 = vpop.f32.mrb[64].mxu0 }
0x2689   : > { %v6965_v2 = vadd.f32 %v6964_v15, %v10561_v40  ;;  %v6966_v26 = vpop.f32.mrb[65].mxu0 }
0x268a   : > { %v6967_v33 = vadd.f32 %v6966_v26, %v10565_v41  ;;  %v6968_v3 = vpop.f32.mrb[66].mxu0 }
0x268b   : > { %v6969_v4 = vadd.f32 %v6968_v3, %v10561_v40  ;;  %v6970_v49 = vpop.f32.mrb[67].mxu0  ;;  %v7111_v6 = vmax.f32 %v6965_v2, 0.0 }
0x268c   : > { %v6971_v5 = vadd.f32 %v6970_v49, %v10565_v41  ;;  %v7112_v51 = vmax.f32 %v6967_v33, 0.0 }
0x268d   : > { %v7113_v7 = vmax.f32 %v6969_v4, 0.0 }
0x268e   : > { %v7114_v35 = vmax.f32 %v6971_v5, 0.0 }
0x268f   : > { %v7171_v8 = vpack.c.bf16 %v7113_v7, %v7111_v6 }
0x2690   : > { %v7172_v48 = vpack.c.bf16 %v7114_v35, %v7112_v51  ;;  %v6974_v9 = vpop.f32.mrb[68].mxu0 }
0x2691   : > { %v6975_v10 = vadd.f32 %v6974_v9, %v10561_v40  ;;  %v6976_v56 = vpop.f32.mrb[69].mxu0 }
0x2692   : > { %v6977_v11 = vadd.f32 %v6976_v56, %v10565_v41  ;;  %v6978_v13 = vpop.f32.mrb[70].mxu0  ;;  %7225 = vmatprep.subr.bf16.mxu1 %v7172_v48 }
0x2693   : > { %v6979_v54 = vadd.f32 %v6978_v13, %v10561_v40  ;;  %v6980_v12 = vpop.f32.mrb[71].mxu0  ;;  %7226 = vmatpush1.bf16.xpose.msra.mxu1 %v7171_v8  ;;  %v7115_v16 = vmax.f32 %v6975_v10, 0.0 }
0x2694   : > { %v6981_v14 = vadd.f32 %v6980_v12, %v10565_v41  ;;  %v7116_v18 = vmax.f32 %v6977_v11, 0.0 }
0x2695   : > { %v7117_v17 = vmax.f32 %v6979_v54, 0.0 }
0x2696   : > { %v7118_v27 = vmax.f32 %v6981_v14, 0.0 }
0x2697   : > { %v7173_v19 = vpack.c.bf16 %v7117_v17, %v7115_v16 }
0x2698   : > { %v7174_v42 = vpack.c.bf16 %v7118_v27, %v7116_v18  ;;  %v6984_v43 = vpop.f32.mrb[72].mxu0 }
0x2699   : > { %v6985_v31 = vadd.f32 %v6984_v43, %v10561_v40  ;;  %v6986_v32 = vpop.f32.mrb[73].mxu0 }
0x269a   : > { %v6987_v37 = vadd.f32 %v6986_v32, %v10565_v41  ;;  %v6988_v0 = vpop.f32.mrb[74].mxu0  ;;  %7227 = vmatprep.subr.bf16.mxu1 %v7174_v42 }
0x269b   : > { %v6989_v20 = vadd.f32 %v6988_v0, %v10561_v40  ;;  %v6990_v21 = vpop.f32.mrb[75].mxu0  ;;  %7228 = vmatpush1.bf16.xpose.msra.mxu1 %v7173_v19  ;;  %v7119_v45 = vmax.f32 %v6985_v31, 0.0 }
0x269c   : > { %v6991_v44 = vadd.f32 %v6990_v21, %v10565_v41  ;;  %v7120_v34 = vmax.f32 %v6987_v37, 0.0 }
0x269d   : > { %v7121_v46 = vmax.f32 %v6989_v20, 0.0 }
0x269e   : > { %v7122_v47 = vmax.f32 %v6991_v44, 0.0 }
0x269f   : > { %v7175_v52 = vpack.c.bf16 %v7121_v46, %v7119_v45 }
0x26a0   : > { %v7176_v38 = vpack.c.bf16 %v7122_v47, %v7120_v34  ;;  %v6994_v24 = vpop.f32.mrb[76].mxu0 }
0x26a1   : > { %v6995_v50 = vadd.f32 %v6994_v24, %v10561_v40  ;;  %v6996_v53 = vpop.f32.mrb[77].mxu0 }
0x26a2   : > { %v6997_v55 = vadd.f32 %v6996_v53, %v10565_v41  ;;  %v6998_v57 = vpop.f32.mrb[78].mxu0  ;;  %7229 = vmatprep.subr.bf16.mxu1 %v7176_v38 }
0x26a3   : > { %v6999_v23 = vadd.f32 %v6998_v57, %v10561_v40  ;;  %v7000_v25 = vpop.f32.mrb[79].mxu0  ;;  %7230 = vmatpush1.bf16.xpose.msra.mxu1 %v7175_v52  ;;  %v7123_v28 = vmax.f32 %v6995_v50, 0.0 }
0x26a4   : > { %v7001_v39 = vadd.f32 %v7000_v25, %v10565_v41  ;;  %v7124_v22 = vmax.f32 %v6997_v55, 0.0 }
0x26a5   : > { %v7125_v29 = vmax.f32 %v6999_v23, 0.0 }
0x26a6   : > { %v7126_v30 = vmax.f32 %v7001_v39, 0.0 }
0x26a7   : > { %v7177_v58 = vpack.c.bf16 %v7125_v29, %v7123_v28 }
0x26a8   : > { %v7178_v59 = vpack.c.bf16 %v7126_v30, %v7124_v22  ;;  %v7004_v60 = vpop.f32.mrb[80].mxu0 }
0x26a9   : > { %v7005_v62 = vadd.f32 %v7004_v60, %v10561_v40  ;;  %v7006_v36 = vpop.f32.mrb[81].mxu0 }
0x26aa   : > { %v7007_v61 = vadd.f32 %v7006_v36, %v10565_v41  ;;  %v7008_v1 = vpop.f32.mrb[82].mxu0  ;;  %7231 = vmatprep.subr.bf16.mxu1 %v7178_v59 }
0x26ab   : > { %v7009_v15 = vadd.f32 %v7008_v1, %v10561_v40  ;;  %v7010_v2 = vpop.f32.mrb[83].mxu0  ;;  %7232 = vmatpush1.bf16.xpose.msra.mxu1 %v7177_v58  ;;  %v7127_v33 = vmax.f32 %v7005_v62, 0.0 }
0x26ac   : > { %v7011_v26 = vadd.f32 %v7010_v2, %v10565_v41  ;;  %v7128_v4 = vmax.f32 %v7007_v61, 0.0 }
0x26ad   : > { %v7129_v3 = vmax.f32 %v7009_v15, 0.0 }
0x26ae   : > { %v7130_v49 = vmax.f32 %v7011_v26, 0.0 }
0x26af   : > { %v7179_v5 = vpack.c.bf16 %v7129_v3, %v7127_v33 }
0x26b0   : > { %v7180_v6 = vpack.c.bf16 %v7130_v49, %v7128_v4  ;;  %v7014_v7 = vpop.f32.mrb[84].mxu0 }
0x26b1   : > { %v7015_v51 = vadd.f32 %v7014_v7, %v10561_v40  ;;  %v7016_v35 = vpop.f32.mrb[85].mxu0 }
0x26b2   : > { %v7017_v8 = vadd.f32 %v7016_v35, %v10565_v41  ;;  %v7018_v48 = vpop.f32.mrb[86].mxu0  ;;  %7233 = vmatprep.subr.bf16.mxu1 %v7180_v6 }
0x26b3   : > { %v7019_v9 = vadd.f32 %v7018_v48, %v10561_v40  ;;  %v7020_v10 = vpop.f32.mrb[87].mxu0  ;;  %7234 = vmatpush1.bf16.xpose.msra.mxu1 %v7179_v5  ;;  %v7131_v11 = vmax.f32 %v7015_v51, 0.0 }
0x26b4   : > { %v7021_v56 = vadd.f32 %v7020_v10, %v10565_v41  ;;  %v7132_v54 = vmax.f32 %v7017_v8, 0.0 }
0x26b5   : > { %v7133_v13 = vmax.f32 %v7019_v9, 0.0 }
0x26b6   : > { %v7134_v12 = vmax.f32 %v7021_v56, 0.0 }
0x26b7   : > { %v7181_v14 = vpack.c.bf16 %v7133_v13, %v7131_v11 }
0x26b8   : > { %v7182_v16 = vpack.c.bf16 %v7134_v12, %v7132_v54  ;;  %v7024_v17 = vpop.f32.mrb[88].mxu0 }
0x26b9   : > { %v7025_v18 = vadd.f32 %v7024_v17, %v10561_v40  ;;  %v7026_v27 = vpop.f32.mrb[89].mxu0 }
0x26ba   : > { %v7027_v19 = vadd.f32 %v7026_v27, %v10565_v41  ;;  %v7028_v42 = vpop.f32.mrb[90].mxu0  ;;  %7235 = vmatprep.subr.bf16.mxu1 %v7182_v16 }
0x26bb   : > { %v7029_v43 = vadd.f32 %v7028_v42, %v10561_v40  ;;  %v7030_v31 = vpop.f32.mrb[91].mxu0  ;;  %7236 = vmatpush1.bf16.xpose.msra.mxu1 %v7181_v14  ;;  %v7135_v37 = vmax.f32 %v7025_v18, 0.0 }
0x26bc   : > { %v7031_v32 = vadd.f32 %v7030_v31, %v10565_v41  ;;  %v7136_v20 = vmax.f32 %v7027_v19, 0.0 }
0x26bd   : > { %v7137_v0 = vmax.f32 %v7029_v43, 0.0 }
0x26be   : > { %v7138_v21 = vmax.f32 %v7031_v32, 0.0 }
0x26bf   : > { %v7183_v44 = vpack.c.bf16 %v7137_v0, %v7135_v37 }
0x26c0   : > { %v7184_v45 = vpack.c.bf16 %v7138_v21, %v7136_v20  ;;  %v7034_v46 = vpop.f32.mrb[92].mxu0 }
0x26c1   : > { %v7035_v34 = vadd.f32 %v7034_v46, %v10561_v40  ;;  %v7036_v47 = vpop.f32.mrb[93].mxu0 }
0x26c2   : > { %v7037_v52 = vadd.f32 %v7036_v47, %v10565_v41  ;;  %v7038_v38 = vpop.f32.mrb[94].mxu0  ;;  %7237 = vmatprep.subr.bf16.mxu1 %v7184_v45 }
0x26c3   : > { %v7039_v24 = vadd.f32 %v7038_v38, %v10561_v40  ;;  %v7040_v50 = vpop.f32.mrb[95].mxu0  ;;  %7238 = vmatpush1.bf16.xpose.msra.mxu1 %v7183_v44  ;;  %v7139_v55 = vmax.f32 %v7035_v34, 0.0 }
0x26c4   : > { %v7041_v53 = vadd.f32 %v7040_v50, %v10565_v41  ;;  %v7140_v23 = vmax.f32 %v7037_v52, 0.0 }
0x26c5   : > { %v7141_v57 = vmax.f32 %v7039_v24, 0.0 }
0x26c6   : > { %v7142_v25 = vmax.f32 %v7041_v53, 0.0 }
0x26c7   : > { %v7185_v39 = vpack.c.bf16 %v7141_v57, %v7139_v55 }
0x26c8   : > { %v7186_v28 = vpack.c.bf16 %v7142_v25, %v7140_v23  ;;  %v7044_v29 = vpop.f32.mrb[96].mxu0 }
0x26c9   : > { %v7045_v22 = vadd.f32 %v7044_v29, %v10561_v40  ;;  %v7046_v30 = vpop.f32.mrb[97].mxu0 }
0x26ca   : > { %v7047_v58 = vadd.f32 %v7046_v30, %v10565_v41  ;;  %v7048_v59 = vpop.f32.mrb[98].mxu0  ;;  %7239 = vmatprep.subr.bf16.mxu1 %v7186_v28 }
0x26cb   : > { %v7049_v60 = vadd.f32 %v7048_v59, %v10561_v40  ;;  %v7050_v62 = vpop.f32.mrb[99].mxu0  ;;  %7240 = vmatpush1.bf16.xpose.msra.mxu1 %v7185_v39  ;;  %v7143_v61 = vmax.f32 %v7045_v22, 0.0 }
0x26cc   : > { %v7051_v36 = vadd.f32 %v7050_v62, %v10565_v41  ;;  %v7144_v15 = vmax.f32 %v7047_v58, 0.0 }
0x26cd   : > { %v7145_v1 = vmax.f32 %v7049_v60, 0.0 }
0x26ce   : > { %v7146_v2 = vmax.f32 %v7051_v36, 0.0 }
0x26cf   : > { %v7187_v26 = vpack.c.bf16 %v7145_v1, %v7143_v61 }
0x26d0   : > { %v7188_v33 = vpack.c.bf16 %v7146_v2, %v7144_v15  ;;  %v7054_v3 = vpop.f32.mrb[100].mxu0 }
0x26d1   : > { %v7055_v4 = vadd.f32 %v7054_v3, %v10561_v40  ;;  %v7056_v49 = vpop.f32.mrb[101].mxu0 }
0x26d2   : > { %v7057_v5 = vadd.f32 %v7056_v49, %v10565_v41  ;;  %v7058_v6 = vpop.f32.mrb[102].mxu0  ;;  %7241 = vmatprep.subr.bf16.mxu1 %v7188_v33 }
0x26d3   : > { %v7059_v7 = vadd.f32 %v7058_v6, %v10561_v40  ;;  %v7060_v51 = vpop.f32.mrb[103].mxu0  ;;  %7242 = vmatpush1.bf16.xpose.msra.mxu1 %v7187_v26  ;;  %v7147_v8 = vmax.f32 %v7055_v4, 0.0 }
0x26d4   : > { %v7061_v35 = vadd.f32 %v7060_v51, %v10565_v41  ;;  %v7148_v9 = vmax.f32 %v7057_v5, 0.0 }
0x26d5   : > { %v7149_v48 = vmax.f32 %v7059_v7, 0.0 }
0x26d6   : > { %v7150_v10 = vmax.f32 %v7061_v35, 0.0 }
0x26d7   : > { %v7189_v56 = vpack.c.bf16 %v7149_v48, %v7147_v8  ;;  %v7208_v48 = vpop.permute.xlu1 %7207 }
0x26d8   : > { %v7190_v11 = vpack.c.bf16 %v7150_v10, %v7148_v9  ;;  %v7064_v13 = vpop.f32.mrb[104].mxu0 }
0x26d9   : > { %v7065_v54 = vadd.f32 %v7064_v13, %v10561_v40  ;;  %v7066_v12 = vpop.f32.mrb[105].mxu0 }
0x26da   : > { %v7067_v14 = vadd.f32 %v7066_v12, %v10565_v41  ;;  %v7068_v16 = vpop.f32.mrb[106].mxu0  ;;  %7243 = vmatprep.subr.bf16.mxu1 %v7190_v11 }
0x26db   : > { %v7069_v17 = vadd.f32 %v7068_v16, %v10561_v40  ;;  %v7070_v18 = vpop.f32.mrb[107].mxu0  ;;  %7244 = vmatpush1.bf16.xpose.msra.mxu1 %v7189_v56  ;;  %v7151_v19 = vmax.f32 %v7065_v54, 0.0 }
0x26dc   : > { %v7071_v27 = vadd.f32 %v7070_v18, %v10565_v41  ;;  %v7152_v43 = vmax.f32 %v7067_v14, 0.0 }
0x26dd   : > { %v7153_v42 = vmax.f32 %v7069_v17, 0.0 }
0x26de   : > { %v7154_v31 = vmax.f32 %v7071_v27, 0.0 }
0x26df   : > { %v7191_v32 = vpack.c.bf16 %v7153_v42, %v7151_v19 }
0x26e0   : > { %v7192_v37 = vpack.c.bf16 %v7154_v31, %v7152_v43  ;;  %v7074_v0 = vpop.f32.mrb[108].mxu0 }
0x26e1   : > { %v7075_v20 = vadd.f32 %v7074_v0, %v10561_v40  ;;  %v7076_v21 = vpop.f32.mrb[109].mxu0 }
0x26e2   : > { %v7077_v44 = vadd.f32 %v7076_v21, %v10565_v41  ;;  %v7078_v45 = vpop.f32.mrb[110].mxu0  ;;  %7245 = vmatprep.subr.bf16.mxu1 %v7192_v37 }
0x26e3   : > { %v7079_v46 = vadd.f32 %v7078_v45, %v10561_v40  ;;  %v7080_v34 = vpop.f32.mrb[111].mxu0  ;;  %7246 = vmatpush1.bf16.xpose.msra.mxu1 %v7191_v32  ;;  %v7155_v52 = vmax.f32 %v7075_v20, 0.0 }
0x26e4   : > { %v7081_v47 = vadd.f32 %v7080_v34, %v10565_v41  ;;  %v7156_v24 = vmax.f32 %v7077_v44, 0.0 }
0x26e5   : > { %v7157_v38 = vmax.f32 %v7079_v46, 0.0 }
0x26e6   : > { %v7158_v50 = vmax.f32 %v7081_v47, 0.0 }
0x26e7   : > { %v7193_v53 = vpack.c.bf16 %v7157_v38, %v7155_v52 }
0x26e8   : > { %v7194_v55 = vpack.c.bf16 %v7158_v50, %v7156_v24  ;;  %v7084_v57 = vpop.f32.mrb[112].mxu0 }
0x26e9   : > { %v7085_v23 = vadd.f32 %v7084_v57, %v10561_v40  ;;  %v7086_v25 = vpop.f32.mrb[113].mxu0 }
0x26ea   : > { %v7087_v39 = vadd.f32 %v7086_v25, %v10565_v41  ;;  %v7088_v28 = vpop.f32.mrb[114].mxu0  ;;  %7247 = vmatprep.subr.bf16.mxu1 %v7194_v55 }
0x26eb   : > { %v7089_v29 = vadd.f32 %v7088_v28, %v10561_v40  ;;  %v7090_v22 = vpop.f32.mrb[115].mxu0  ;;  %7248 = vmatpush1.bf16.xpose.msra.mxu1 %v7193_v53  ;;  %v7159_v58 = vmax.f32 %v7085_v23, 0.0 }
0x26ec   : > { %v7091_v30 = vadd.f32 %v7090_v22, %v10565_v41  ;;  %v7160_v60 = vmax.f32 %v7087_v39, 0.0 }
0x26ed   : > { %v7161_v59 = vmax.f32 %v7089_v29, 0.0 }
0x26ee   : > { %v7162_v62 = vmax.f32 %v7091_v30, 0.0 }
0x26ef   : > { %v7195_v36 = vpack.c.bf16 %v7161_v59, %v7159_v58 }
0x26f0   : > { %v7196_v61 = vpack.c.bf16 %v7162_v62, %v7160_v60  ;;  %v7094_v1 = vpop.f32.mrb[116].mxu0 }
0x26f1   : > { %v7095_v15 = vadd.f32 %v7094_v1, %v10561_v40  ;;  %v7096_v2 = vpop.f32.mrb[117].mxu0 }
0x26f2   : > { %v7097_v26 = vadd.f32 %v7096_v2, %v10565_v41  ;;  %v7098_v33 = vpop.f32.mrb[118].mxu0  ;;  %7249 = vmatprep.subr.bf16.mxu1 %v7196_v61 }
0x26f3   : > { %v7099_v3 = vadd.f32 %v7098_v33, %v10561_v40  ;;  %v7100_v4 = vpop.f32.mrb[119].mxu0  ;;  %7250 = vmatpush1.bf16.xpose.msra.mxu1 %v7195_v36  ;;  %v7163_v5 = vmax.f32 %v7095_v15, 0.0 }
0x26f4   : > { %v7101_v49 = vadd.f32 %v7100_v4, %v10565_v41  ;;  %v7164_v7 = vmax.f32 %v7097_v26, 0.0 }
0x26f5   : > { %v7165_v6 = vmax.f32 %v7099_v3, 0.0 }
0x26f6   : > { %v7166_v51 = vmax.f32 %v7101_v49, 0.0 }
0x26f7   : > { %v7197_v35 = vpack.c.bf16 %v7165_v6, %v7163_v5 }
0x26f8   : > { %v7198_v8 = vpack.c.bf16 %v7166_v51, %v7164_v7 }
0x26fa   : > { %7251 = vmatprep.subr.bf16.mxu1 %v7198_v8 }
0x26fb   : > { %7252 = vmatpush1.bf16.xpose.msra.mxu1 %v7197_v35 }
0x2702   : > { %7254 = vmatmul.mubr.bf16.vlgmr.msra.gmra.mrb[100].mxu1 %v10583_v63 }
0x27d5   : > { %v7255_v9 = vpop.f32.mrb[100].mxu1 }
0x27d6   : > { %v7257_v10 = vpop.f32.mrb[101].mxu1  ;;  %v7256_v56 = vadd.f32 %v7255_v9, %v7208_v48 }
0x27d7   : > { %v7259_v40 = vpop.f32.mrb[102].mxu1  ;;  %v7258_v11 = vadd.f32 %v7257_v10, %v7208_v48 }
0x27d8   : > { %v7260_v41 = vpop.f32.mrb[103].mxu1 }
0x27d9   : > { %v7264_v13 = vcombine.low %v7256_v56, %v7258_v11 }
0x27db   : > { %7266 = vst [vmem:[%s820_s26] sm:$0xff] %v7264_v13 }
0x27dc PF: > { %s10749_s1 = sld [smem:[#allocation6_spill]] }
0x27e2   : > { %s39_s8 = sadd.s32 1, %s10749_s1  }
0x27e3   : > { %p36_p4 = scmp.ge.s32.totalorder %s39_s8, 4  }
0x27e5   :  { %38 = sbr.rel (!%p36_p4) target bundleno = 14 (0xe), region = 170 }

</bundles_post_ra>
